<compile_context>
chip_gen: v5e
topology: v5e:2x2
jax: 0.10.0
libtpu: 0.0.40
codegen_flags: <defaults>
</compile_context>

<pallas_src>
import math
from functools import partial

import jax
import jax.numpy as jnp
from jax.experimental import pallas as pl
from jax.experimental.pallas import tpu as pltpu


@partial(jax.jit,
         static_argnames=("psf_size", "width", "x_scale", "y_scale",
                          "z_scale", "e_tile"))
def gaus3d_pallas(x_offset, y_offset, z_offset, *, psf_size, width,
                  x_scale, y_scale, z_scale, e_tile=128):
    """x/y/z_offset: (Num_E, 1, 1, 1) float32 -> (Num_E, DZ, DY, DX) float32."""
    n = x_offset.shape[0]
    # torch.arange(-sz//2, sz//2 + 1) has length 2*(sz//2) + 1
    sx = 2 * (psf_size[0] // 2) + 1          # fastest output axis
    sy = 2 * (psf_size[1] // 2) + 1
    sz = 2 * (psf_size[2] // 2) + 1          # slowest output axis
    L = sz * sy * sx                         # flattened PSF volume (lane axis)

    # --- Emitter tile selection --------------------------------------------
    # Multiple of 8 sublanes; divides N when possible so the output needs no
    # post-kernel strip.  VMEM budget: double-buffered output is
    # 2 * e_tile * L * 4 B plus ~e_tile * L * 12 B resident coords ->
    # keep e_tile <= ~2048 on v7x (64 MiB VMEM), <= ~4096 on v5e/v6e (128 MiB).
    # 128 already gives >= 2 grid steps per v7x TensorCore at N ~ 512.
    e_tile = max(8, (int(e_tile) // 8) * 8)
    if n % 8 == 0:
        e_tile = min(e_tile, n)
        while n % e_tile != 0:
            e_tile -= 8                      # terminates: 8 divides n
    else:
        e_tile = min(e_tile, ((n + 7) // 8) * 8)
    n_tiles = pl.cdiv(n, e_tile)
    n_pad = n_tiles * e_tile

    # --- Host-side precompute ------------------------------------------------
    # Pre-scale by 1/sqrt(scale) so the kernel computes w = d*d directly.
    inv_rx = 1.0 / math.sqrt(x_scale)
    inv_ry = 1.0 / math.sqrt(y_scale)
    inv_rz = 1.0 / math.sqrt(z_scale)

    vx = jnp.arange(-(psf_size[0] // 2), psf_size[0] // 2 + 1,
                    dtype=jnp.float32) * inv_rx
    vy = jnp.arange(-(psf_size[1] // 2), psf_size[1] // 2 + 1,
                    dtype=jnp.float32) * inv_ry
    vz = jnp.arange(-(psf_size[2] // 2), psf_size[2] // 2 + 1,
                    dtype=jnp.float32) * inv_rz
    czg, cyg, cxg = jnp.meshgrid(vz, vy, vx, indexing="ij")      # (sz, sy, sx)
    coords = jnp.stack([cxg.reshape(-1), cyg.reshape(-1), czg.reshape(-1)],
                       axis=0)                                    # (3, L)
    # Replicate across all e_tile sublanes: no in-kernel sublane broadcasts.
    coords = jnp.broadcast_to(coords[:, None, :], (3, e_tile, L))

    # Pack pre-scaled offsets into one (n_pad, 3) stream (one DMA per step).
    xo = x_offset.reshape(n).astype(jnp.float32) * inv_rx
    yo = y_offset.reshape(n).astype(jnp.float32) * inv_ry
    zo = z_offset.reshape(n).astype(jnp.float32) * inv_rz
    offs = jnp.stack([xo, yo, zo], axis=-1)                       # (n, 3)
    if n_pad != n:
        offs = jnp.pad(offs, ((0, n_pad - n), (0, 0)))

    # Static module parameters folded into the kernel as immediates.
    two_w2 = float(2.0 * width * width)
    taylor = 1.0 / 12.0

    def kernel(coords_ref, off_ref, o_ref):
        cx = coords_ref[0]                   # (e_tile, L), pre-scaled coords
        cy = coords_ref[1]
        cz = coords_ref[2]
        xo_t = off_ref[:, 0:1]               # (e_tile, 1), pre-scaled offsets
        yo_t = off_ref[:, 1:2]
        zo_t = off_ref[:, 2:3]
        dxv = cx - xo_t
        dyv = cy - yo_t
        dzv = cz - zo_t
        w_x = dxv * dxv
        w_y = dyv * dyv
        w_z = dzv * dzv
        numer = w_x + w_y + w_z
        denom = two_w2 * (w_z * w_z) + taylor
        # Exact reciprocal-then-multiply keeps 1e-5 agreement with reference.
        # TODO(synk): switch to approx=True reciprocal (and/or bf16 output)
        # where the consumer's tolerance allows; trims VALU/store cost.
        o_ref[...] = jnp.exp(-numer * pl.reciprocal(denom, approx=False))

    out2d = pl.pallas_call(
        kernel,
        out_shape=jax.ShapeDtypeStruct((n_pad, L), jnp.float32),
        grid=(n_tiles,),
        in_specs=[
            # Coords: constant index_map -> block stays resident across steps.
            pl.BlockSpec((3, e_tile, L), lambda t: (0, 0, 0)),
            pl.BlockSpec((e_tile, 3), lambda t: (t, 0)),
        ],
        # Output block covers the full last dim (693): lane-dense stores, and
        # no (n_pad, l_pad) slab to strip afterwards.
        out_specs=pl.BlockSpec((e_tile, L), lambda t: (t, 0)),
        compiler_params=pltpu.CompilerParams(
            dimension_semantics=("parallel",)),
    )(coords, offs)

    if n_pad != n:                           # only for ragged N (not mult of 8)
        out2d = out2d[:n]
    return out2d.reshape(n, sz, sy, sx)      # free reshape


def gaus3d_ref(x_offset, y_offset, z_offset, *, psf_size, width,
               x_scale, y_scale, z_scale):
    """Pure-JAX reference mirroring the PyTorch forward exactly."""
    vx = jnp.arange(-(psf_size[0] // 2), psf_size[0] // 2 + 1,
                    dtype=jnp.float32).reshape(1, 1, -1)
    vy = jnp.arange(-(psf_size[1] // 2), psf_size[1] // 2 + 1,
                    dtype=jnp.float32).reshape(1, -1, 1)
    vz = jnp.arange(-(psf_size[2] // 2), psf_size[2] // 2 + 1,
                    dtype=jnp.float32).reshape(-1, 1, 1)
    x = (vx - x_offset) ** 2
    y = (vy - y_offset) ** 2
    z = (vz - z_offset) ** 2
    w_x = x / x_scale
    w_y = y / y_scale
    w_z = z / z_scale
    return jnp.exp(-(w_x + w_y + w_z)
                   / (2.0 * (w_z * width) ** 2 + 1.0 / 12.0))


if __name__ == "__main__":
    psf_size = (7, 9, 11)          # (SX, SY, SZ) as in the PyTorch module
    width, x_scale, y_scale, z_scale = 1.3, 1.2, 1.1, 0.9
    num_e = 512                    # 4 grid steps at e_tile=128 (2 per v7x TC)

    key = jax.random.PRNGKey(0)
    kx, ky, kz = jax.random.split(key, 3)
    x_off = jax.random.uniform(kx, (num_e, 1, 1, 1), jnp.float32, -1.0, 1.0)
    y_off = jax.random.uniform(ky, (num_e, 1, 1, 1), jnp.float32, -1.0, 1.0)
    z_off = jax.random.uniform(kz, (num_e, 1, 1, 1), jnp.float32, -1.0, 1.0)

    out = gaus3d_pallas(x_off, y_off, z_off, psf_size=psf_size, width=width,
                        x_scale=x_scale, y_scale=y_scale, z_scale=z_scale,
                        e_tile=128)
    out = jax.block_until_ready(out)

    ref = gaus3d_ref(x_off, y_off, z_off, psf_size=psf_size, width=width,
                     x_scale=x_scale, y_scale=y_scale, z_scale=z_scale)

    expected_shape = (num_e,
                      2 * (psf_size[2] // 2) + 1,
                      2 * (psf_size[1] // 2) + 1,
                      2 * (psf_size[0] // 2) + 1)
    assert out.shape == expected_shape, (out.shape, expected_shape)
    assert jnp.allclose(out, ref, atol=1e-5, rtol=1e-5), \
        float(jnp.max(jnp.abs(out - ref)))
    print("KERNEL_OK")
</pallas_src>

<mosaic_0001>
module attributes {stable_mosaic.version = 11 : i64} {
  func.func @kernel(%arg0: i32, %arg1: memref<3x128x693xf32, #tpu.memory_space<vmem>>, %arg2: memref<128x3xf32, #tpu.memory_space<vmem>>, %arg3: memref<128x693xf32, #tpu.memory_space<vmem>>) attributes {dimension_semantics = [#tpu.dimension_semantics<parallel>], iteration_bounds = array<i64: 4>, scalar_prefetch = 0 : i64, scratch_operands = 0 : i64, tpu.core_type = #tpu.core_type<tc>, window_params = [{pipeline_mode = #tpu.pipeline_mode<synchronous>, transform_indices = @transform_0, window_bounds = array<i64: 3, 128, 693>}, {transform_indices = @transform_1, window_bounds = array<i64: 128, 3>}, {transform_indices = @transform_2, window_bounds = array<i64: 128, 693>}]} {
    %c0 = arith.constant 0 : index
    %c0_0 = arith.constant 0 : index
    %c0_1 = arith.constant 0 : index
    %0 = vector.load %arg1[%c0, %c0_0, %c0_1] : memref<3x128x693xf32, #tpu.memory_space<vmem>>, vector<1x128x693xf32>
    %1 = vector.shape_cast %0 : vector<1x128x693xf32> to vector<128x693xf32>
    %c1 = arith.constant 1 : index
    %c0_2 = arith.constant 0 : index
    %c0_3 = arith.constant 0 : index
    %2 = vector.load %arg1[%c1, %c0_2, %c0_3] : memref<3x128x693xf32, #tpu.memory_space<vmem>>, vector<1x128x693xf32>
    %3 = vector.shape_cast %2 : vector<1x128x693xf32> to vector<128x693xf32>
    %c2 = arith.constant 2 : index
    %c0_4 = arith.constant 0 : index
    %c0_5 = arith.constant 0 : index
    %4 = vector.load %arg1[%c2, %c0_4, %c0_5] : memref<3x128x693xf32, #tpu.memory_space<vmem>>, vector<1x128x693xf32>
    %5 = vector.shape_cast %4 : vector<1x128x693xf32> to vector<128x693xf32>
    %c0_6 = arith.constant 0 : index
    %c0_7 = arith.constant 0 : index
    %6 = vector.load %arg2[%c0_6, %c0_7] : memref<128x3xf32, #tpu.memory_space<vmem>>, vector<128x1xf32>
    %c0_8 = arith.constant 0 : index
    %c1_9 = arith.constant 1 : index
    %7 = vector.load %arg2[%c0_8, %c1_9] : memref<128x3xf32, #tpu.memory_space<vmem>>, vector<128x1xf32>
    %c0_10 = arith.constant 0 : index
    %c2_11 = arith.constant 2 : index
    %8 = vector.load %arg2[%c0_10, %c2_11] : memref<128x3xf32, #tpu.memory_space<vmem>>, vector<128x1xf32>
    %9 = vector.broadcast %6 : vector<128x1xf32> to vector<128x693xf32>
    %10 = arith.subf %1, %9 : vector<128x693xf32>
    %11 = vector.broadcast %7 : vector<128x1xf32> to vector<128x693xf32>
    %12 = arith.subf %3, %11 : vector<128x693xf32>
    %13 = vector.broadcast %8 : vector<128x1xf32> to vector<128x693xf32>
    %14 = arith.subf %5, %13 : vector<128x693xf32>
    %15 = arith.mulf %10, %10 : vector<128x693xf32>
    %16 = arith.mulf %12, %12 : vector<128x693xf32>
    %17 = arith.mulf %14, %14 : vector<128x693xf32>
    %18 = arith.addf %15, %16 : vector<128x693xf32>
    %19 = arith.addf %18, %17 : vector<128x693xf32>
    %20 = arith.mulf %17, %17 : vector<128x693xf32>
    %cst = arith.constant 3.380000e+00 : f32
    %21 = vector.broadcast %cst : f32 to vector<128x693xf32>
    %22 = arith.mulf %21, %20 : vector<128x693xf32>
    %cst_12 = arith.constant 0.0833333358 : f32
    %23 = vector.broadcast %cst_12 : f32 to vector<128x693xf32>
    %24 = arith.addf %22, %23 : vector<128x693xf32>
    %cst_13 = arith.constant 0.000000e+00 : f32
    %25 = vector.broadcast %cst_13 : f32 to vector<128x693xf32>
    %26 = arith.subf %25, %19 : vector<128x693xf32>
    %27 = tpu.reciprocal %24 : vector<128x693xf32> -> vector<128x693xf32>
    %28 = arith.mulf %26, %27 : vector<128x693xf32>
    %29 = math.exp %28 : vector<128x693xf32>
    %c0_14 = arith.constant 0 : index
    %c0_15 = arith.constant 0 : index
    %30 = vector.load %arg3[%c0_14, %c0_15] : memref<128x693xf32, #tpu.memory_space<vmem>>, vector<128x693xf32>
    tpu.vector_store %arg3[%c0_14, %c0_15], %29 {strides = array<i32>} : memref<128x693xf32, #tpu.memory_space<vmem>>, vector<128x693xf32>,
    return
  }
  func.func @transform_0(%arg0: i32) -> (i32, i32, i32) {
    %c0_i32 = arith.constant 0 : i32
    %c0_i32_0 = arith.constant 0 : i32
    %c0_i32_1 = arith.constant 0 : i32
    %c0_i32_2 = arith.constant 0 : i32
    return %c0_i32, %c0_i32_0, %c0_i32_1 : i32, i32, i32
  }
  func.func @transform_1(%arg0: i32) -> (i32, i32) {
    %c0_i32 = arith.constant 0 : i32
    %c0_i32_0 = arith.constant 0 : i32
    return %arg0, %c0_i32 : i32, i32
  }
  func.func @transform_2(%arg0: i32) -> (i32, i32) {
    %c0_i32 = arith.constant 0 : i32
    %c0_i32_0 = arith.constant 0 : i32
    return %arg0, %c0_i32 : i32, i32
  }
}

</mosaic_0001>

<bundles_post_ra>
// kernel: gaus3d_pallas.1
= control target key start
LH: loop header
LB: loop body
LE: loop exit
PB: predicated region body
PF: predicated region fallthrough
CT: control target
= control target key end

     0   :  { %s4236_s9 = smov 0   ;;  %s8557_s0 = inlined_call_operand.vmem [shape: f32[3,128,693], index: 0, kind: input, shape index: {}]   ;;  %s8558_s1 = inlined_call_operand.vmem [shape: f32[512,3], index: 1, kind: input, shape index: {}]   ;;  %s8559_s2 = inlined_call_operand.vmem [shape: f32[512,693], index: 2, kind: output, shape index: {}]  }
   0x1 LB: > { %s3602_s10 = sadd.s32 4294967295, %s4216_s9   ;;  %p3606_p0 = scmp.ge.s32.totalorder %s4216_s9, 1  ;;  %s4216_s9 = sphi %s4236_s9, %s12_s9  }
   0x2   : > { %p113_p1 = scmp.lt.s32.totalorder %s4216_s9, 5 }
   0x4   : > { %p114_p2 = pnand %p3606_p0, %p113_p1 }
   0x6   : > { %117 = sbr.rel (%p114_p2) target bundleno = 833 (0x341), region = 28 }
   0xb   : > { %s3607_s11 = sshll.u32 %s3602_s10, 4  ;;  %v4218_v0 = vmov 0   ;;  %v4219_v17 = vmov 1   ;;  %v4220_v18 = vmov 2   ;;  %v173_v26 = vld [vmem:[%s8557_s0 + $0xc0] sm:$0xff]  ;;  %v174_v27 = vld [vmem:[%s8557_s0 + $0xc8] sm:$0xff] }
   0xc   : > { %3819 = vset.pattern.permute.xlu2 %v4218_v0  ;;  %3818 = vset.pattern.permute.xlu1 %v4218_v0  ;;  %p137_p3 = scmp.lt.s32.totalorder %s3607_s11, 63  ;;  %v175_v28 = vld [vmem:[%s8557_s0 + $0xd0] sm:$0xff]  ;;  %v176_v29 = vld [vmem:[%s8557_s0 + $0xd8] sm:$0xff]  ;;  %v177_v30 = vld [vmem:[%s8557_s0 + $0xe0] sm:$0xff] }
   0xd   : > { %3817 = vset.pattern.permute.xlu0 %v4218_v0  ;;  %v178_v31 = vld [vmem:[%s8557_s0 + $0xe8] sm:$0xff]  ;;  %v179_v32 = vld [vmem:[%s8557_s0 + $0xf0] sm:$0xff]  ;;  %v180_v36 = vld [vmem:[%s8557_s0 + $0xf8] sm:$0xff] }
   0xe   : > { %s9063_s11 = smov (!%p137_p3, %s3607_s11), 63  ;;  %v181_v37 = vld [vmem:[%s8557_s0 + $0x100] sm:$0xff]  ;;  %v182_v41 = vld [vmem:[%s8557_s0 + $0x108] sm:$0xff]  ;;  %v183_v42 = vld [vmem:[%s8557_s0 + $0x110] sm:$0xff] }
   0xf   : > { %s3608_s12 = sshll.u32 %s9063_s11, 3  ;;  %v184_v44 = vld [vmem:[%s8557_s0 + $0x118] sm:$0xff]  ;;  %v155_v48 = vld [vmem:[%s8557_s0 + $0x30] sm:$0xff]  ;;  %v157_v54 = vld [vmem:[%s8557_s0 + $0x40] sm:$0xff]  ;;  %s3805_s16 = smul.u32 48, %s9063_s11 }
  0x10   : > { %s4250_s15 = scalar_lea.vmem %s8558_s1, %s3608_s12  ;;  %v156_v49 = vld [vmem:[%s8557_s0 + $0x38] sm:$0xff]  ;;  %v158_v55 = vld [vmem:[%s8557_s0 + $0x48] sm:$0xff]  ;;  %v159_v61 = vld [vmem:[%s8557_s0 + $0x50] sm:$0xff] }
  0x11   : > { %v443_v1 = vld [vmem:[%s4250_s15 + $0x20] sm:$0xff]  ;;  %v441_v2 = vld [vmem:[%s4250_s15 + $0x10] sm:$0xff]  ;;  %v444_v4 = vld [vmem:[%s4250_s15 + $0x28] sm:$0xff]  ;;  %s5316_s18 = scalar_lea.vmem %s8559_s2, %s3805_s16 }
  0x12   : > { %v439_v3 = vld [vmem:[%s4250_s15] sm:$0xff]  ;;  %477 = vperm.xlu2 %3819, %v443_v1   ;;  %467 = vperm.xlu1 %3818, %v441_v2   ;;  %v442_v5 = vld [vmem:[%s4250_s15 + $0x18] sm:$0xff]  ;;  %v440_v6 = vld [vmem:[%s4250_s15 + $0x8] sm:$0xff] }
  0x13   : > { %457 = vperm.xlu0 %3817, %v439_v3   ;;  %v447_v7 = vld [vmem:[%s4250_s15 + $0x40] sm:$0xff]  ;;  %v446_v8 = vld [vmem:[%s4250_s15 + $0x38] sm:$0xff]  ;;  %v445_v9 = vld [vmem:[%s4250_s15 + $0x30] sm:$0xff] }
  0x14   : > { %v450_v10 = vld [vmem:[%s4250_s15 + $0x58] sm:$0xff]  ;;  %v449_v11 = vld [vmem:[%s4250_s15 + $0x50] sm:$0xff]  ;;  %v448_v12 = vld [vmem:[%s4250_s15 + $0x48] sm:$0xff] }
  0x15   : > { %v453_v13 = vld [vmem:[%s4250_s15 + $0x70] sm:$0xff]  ;;  %v452_v14 = vld [vmem:[%s4250_s15 + $0x68] sm:$0xff]  ;;  %v451_v15 = vld [vmem:[%s4250_s15 + $0x60] sm:$0xff] }
  0x16   : > { %v4268_v16 = vld [vmem:[%s4250_s15 + $0x78] sm:$0xff] }
  0x17   : > { %v160_v62 = vld [vmem:[%s8557_s0 + $0x58] sm:$0xff] }
  0x1a   : > { %482 = vperm.xlu2 %3819, %v444_v4   ;;  %472 = vperm.xlu1 %3818, %v442_v5  }
  0x1b   : > { %462 = vperm.xlu0 %3817, %v440_v6  }
  0x22   : > { %497 = vperm.xlu2 %3819, %v447_v7   ;;  %492 = vperm.xlu1 %3818, %v446_v8  }
  0x23   : > { %487 = vperm.xlu0 %3817, %v445_v9  }
  0x2a   : > { %512 = vperm.xlu2 %3819, %v450_v10   ;;  %507 = vperm.xlu1 %3818, %v449_v11  }
  0x2b   : > { %502 = vperm.xlu0 %3817, %v448_v12  }
  0x32   : > { %527 = vperm.xlu2 %3819, %v453_v13   ;;  %522 = vperm.xlu1 %3818, %v452_v14  }
  0x33   : > { %517 = vperm.xlu0 %3817, %v451_v15  }
  0x3a   : > { %3821 = vset.pattern.permute.xlu2 %v4219_v17  ;;  %3820 = vset.pattern.permute.xlu1 %v4219_v17 }
  0x3b   : > { %532 = vperm.xlu0 %3817, %v4268_v16   ;;  %636 = vperm.xlu2 %3821, %v440_v6  }
  0x3c   : > { %632 = vperm.xlu1 %3820, %v439_v3  }
  0x43   : > { %3822 = vset.pattern.permute.xlu0 %v4219_v17  ;;  %648 = vperm.xlu2 %3821, %v443_v1   ;;  %v3617_v17 = vld [vmem:[%s8557_s0 + $0x330] sm:$0xff] }
  0x44   : > { %644 = vperm.xlu1 %3820, %v442_v5   ;;  %640 = vperm.xlu0 %3822, %v441_v2  }
  0x4b   : > { %656 = vperm.xlu2 %3821, %v445_v9  }
  0x4c   : > { %652 = vperm.xlu1 %3820, %v444_v4   ;;  %660 = vperm.xlu0 %3822, %v446_v8  }
  0x53   : > { %668 = vperm.xlu2 %3821, %v448_v12  }
  0x54   : > { %664 = vperm.xlu1 %3820, %v447_v7   ;;  %672 = vperm.xlu0 %3822, %v449_v11  }
  0x5b   : > { %680 = vperm.xlu2 %3821, %v451_v15  }
  0x5c   : > { %676 = vperm.xlu1 %3820, %v450_v10   ;;  %684 = vperm.xlu0 %3822, %v452_v14  }
  0x63   : > { %692 = vperm.xlu2 %3821, %v4268_v16  }
  0x64   : > { %688 = vperm.xlu1 %3820, %v453_v13   ;;  %3823 = vset.pattern.permute.xlu0 %v4220_v18 }
  0x65   : > { %792 = vperm.xlu0 %3823, %v439_v3   ;;  %v198_v3 = vld [vmem:[%s8557_s0 + $0x188] sm:$0xff] }
  0x6b   : > { %3825 = vset.pattern.permute.xlu2 %v4220_v18 }
  0x6c   : > { %3824 = vset.pattern.permute.xlu1 %v4220_v18  ;;  %v478_v19 = vpop.permute.xlu2 %477  ;;  %800 = vperm.xlu2 %3825, %v441_v2   ;;  %v197_v2 = vld [vmem:[%s8557_s0 + $0x180] sm:$0xff]  ;;  %v3618_v18 = vld [vmem:[%s8557_s0 + $0x338] sm:$0xff] }
  0x6d   : > { %796 = vperm.xlu1 %3824, %v440_v6   ;;  %812 = vperm.xlu0 %3823, %v444_v4   ;;  %v559_v34 = vsub.f32 %v173_v26, %v478_v19  ;;  %v560_v35 = vsub.f32 %v174_v27, %v478_v19  ;;  %v561_v38 = vsub.f32 %v175_v28, %v478_v19  ;;  %v199_v4 = vld [vmem:[%s8557_s0 + $0x190] sm:$0xff] }
  0x6e   : > { %v562_v39 = vsub.f32 %v176_v29, %v478_v19  ;;  %v563_v40 = vsub.f32 %v177_v30, %v478_v19  ;;  %v564_v43 = vsub.f32 %v178_v31, %v478_v19  ;;  %v3619_v29 = vld [vmem:[%s8557_s0 + $0x340] sm:$0xff]  ;;  %v3620_v30 = vld [vmem:[%s8557_s0 + $0x348] sm:$0xff] }
  0x6f   : > { %v4326_v50 = vmul.f32 %v559_v34, %v559_v34  ;;  %v4328_v51 = vmul.f32 %v560_v35, %v560_v35  ;;  %v4337_v57 = vmul.f32 %v561_v38, %v561_v38  ;;  %v202_v38 = vld [vmem:[%s8557_s0 + $0x1a8] sm:$0xff] }
  0x70   : > { %v4339_v58 = vmul.f32 %v562_v39, %v562_v39  ;;  %v4341_v59 = vmul.f32 %v563_v40, %v563_v40  ;;  %v4349_v0 = vmul.f32 %v564_v43, %v564_v43  ;;  %v215_v39 = vld [vmem:[%s8557_s0 + $0x210] sm:$0xff] }
  0x74   : > { %v483_v20 = vpop.permute.xlu2 %482  ;;  %808 = vperm.xlu2 %3825, %v443_v1  }
  0x75   : > { %804 = vperm.xlu1 %3824, %v442_v5   ;;  %824 = vperm.xlu0 %3823, %v447_v7   ;;  %v565_v45 = vsub.f32 %v179_v32, %v483_v20  ;;  %v566_v46 = vsub.f32 %v180_v36, %v483_v20  ;;  %v567_v47 = vsub.f32 %v181_v37, %v483_v20  ;;  %v3621_v36 = vld [vmem:[%s8557_s0 + $0x350] sm:$0xff]  ;;  %v3622_v37 = vld [vmem:[%s8557_s0 + $0x358] sm:$0xff] }
  0x76   : > { %v568_v52 = vsub.f32 %v182_v41, %v483_v20  ;;  %v569_v53 = vsub.f32 %v183_v42, %v483_v20  ;;  %v570_v60 = vsub.f32 %v184_v44, %v483_v20 }
  0x77   : > { %v4351_v1 = vmul.f32 %v565_v45, %v565_v45  ;;  %v4362_v7 = vmul.f32 %v566_v46, %v566_v46 }
  0x78   : > { %v4382_v19 = vmul.f32 %v570_v60, %v570_v60 }
  0x7c   : > { %v4272_v21 = vpop.permute.xlu2 %497  ;;  %820 = vperm.xlu2 %3825, %v446_v8   ;;  %v4364_v8 = vmul.f32 %v567_v47, %v567_v47 }
  0x7d   : > { %816 = vperm.xlu1 %3824, %v445_v9   ;;  %836 = vperm.xlu0 %3823, %v450_v10   ;;  %v200_v9 = vld [vmem:[%s8557_s0 + $0x198] sm:$0xff]  ;;  %v201_v10 = vld [vmem:[%s8557_s0 + $0x1a0] sm:$0xff]  ;;  %v583_v20 = vsub.f32 %v197_v2, %v4272_v21  ;;  %v584_v26 = vsub.f32 %v198_v3, %v4272_v21  ;;  %v585_v27 = vsub.f32 %v199_v4, %v4272_v21 }
  0x7e   : > { %v586_v31 = vsub.f32 %v200_v9, %v4272_v21  ;;  %v587_v32 = vsub.f32 %v201_v10, %v4272_v21  ;;  %v588_v60 = vsub.f32 %v202_v38, %v4272_v21 }
  0x84   : > { %v4274_v22 = vpop.permute.xlu2 %512  ;;  %832 = vperm.xlu2 %3825, %v449_v11   ;;  %v4276_v23 = vpop.permute.xlu1 %467 }
  0x85   : > { %828 = vperm.xlu1 %3824, %v448_v12   ;;  %848 = vperm.xlu0 %3823, %v453_v13   ;;  %v4278_v24 = vpop.permute.xlu0 %457  ;;  %v4372_v13 = vmul.f32 %v568_v52, %v568_v52 }
  0x8c   : > { %v4280_v25 = vpop.permute.xlu2 %527  ;;  %844 = vperm.xlu2 %3825, %v452_v14   ;;  %v4303_v33 = vpop.permute.xlu1 %472  ;;  %v4374_v14 = vmul.f32 %v569_v53, %v569_v53 }
  0x8d   : > { %8567 = vst [vmem:[#allocation2_spill] sm:$0xff] %v4280_v25  ;;  %840 = vperm.xlu1 %3824, %v451_v15   ;;  %v463_v63 = vpop.permute.xlu0 %462 }
  0x8e   : > { %v541_v5 = vsub.f32 %v155_v48, %v463_v63  ;;  %v542_v6 = vsub.f32 %v156_v49, %v463_v63  ;;  %v543_v11 = vsub.f32 %v157_v54, %v463_v63  ;;  %v544_v12 = vsub.f32 %v158_v55, %v463_v63  ;;  %v216_v48 = vld [vmem:[%s8557_s0 + $0x218] sm:$0xff]  ;;  %v217_v49 = vld [vmem:[%s8557_s0 + $0x220] sm:$0xff] }
  0x8f   : > { %v545_v15 = vsub.f32 %v159_v61, %v463_v63  ;;  %v218_v61 = vld [vmem:[%s8557_s0 + $0x228] sm:$0xff]  ;;  %v602_v10 = vsub.f32 %v216_v48, %v4274_v22 }
  0x90   : > { %v957_v34 = vmul.f32 %v541_v5, %v541_v5  ;;  %v958_v35 = vmul.f32 %v542_v6, %v542_v6  ;;  %v959_v40 = vmul.f32 %v543_v11, %v543_v11  ;;  %v960_v41 = vmul.f32 %v544_v12, %v544_v12  ;;  %v161_v12 = vld [vmem:[%s8557_s0 + $0x60] sm:$0xff] }
  0x91   : > { %v961_v44 = vmul.f32 %v545_v15, %v545_v15  ;;  %v603_v11 = vsub.f32 %v217_v49, %v4274_v22  ;;  %v3638_v49 = vld [vmem:[%s8557_s0 + $0x3d8] sm:$0xff] }
  0x94   : > { %v4387_v28 = vpop.permute.xlu1 %492 }
  0x95   : > { %852 = vperm.xlu1 %3824, %v4268_v16   ;;  %v637_v56 = vpop.permute.xlu2 %636  ;;  %v546_v16 = vsub.f32 %v160_v62, %v463_v63  ;;  %v219_v62 = vld [vmem:[%s8557_s0 + $0x230] sm:$0xff]  ;;  %v601_v63 = vsub.f32 %v215_v39, %v4274_v22 }
  0x96   : > { %v701_v42 = vsub.f32 %v3617_v17, %v637_v56  ;;  %v702_v43 = vsub.f32 %v3618_v18, %v637_v56  ;;  %v703_v46 = vsub.f32 %v3619_v29, %v637_v56  ;;  %v704_v47 = vsub.f32 %v3620_v30, %v637_v56  ;;  %v162_v29 = vld [vmem:[%s8557_s0 + $0x68] sm:$0xff]  ;;  %v163_v39 = vld [vmem:[%s8557_s0 + $0x70] sm:$0xff] }
  0x97   : > { %v962_v45 = vmul.f32 %v546_v16, %v546_v16  ;;  %v705_v52 = vsub.f32 %v3621_v36, %v637_v56  ;;  %v706_v53 = vsub.f32 %v3622_v37, %v637_v56  ;;  %v220_v56 = vld [vmem:[%s8557_s0 + $0x238] sm:$0xff]  ;;  %v604_v17 = vsub.f32 %v218_v61, %v4274_v22 }
  0x98   : > { %v1053_v54 = vmul.f32 %v701_v42, %v701_v42  ;;  %v1054_v55 = vmul.f32 %v702_v43, %v702_v43  ;;  %v1055_v2 = vmul.f32 %v703_v46, %v703_v46  ;;  %v1056_v3 = vmul.f32 %v704_v47, %v704_v47  ;;  %v185_v42 = vld [vmem:[%s8557_s0 + $0x120] sm:$0xff]  ;;  %v186_v43 = vld [vmem:[%s8557_s0 + $0x128] sm:$0xff]  ;;  %v188_v61 = vld [vmem:[%s8557_s0 + $0x138] sm:$0xff] }
  0x99   : > { %v1057_v5 = vmul.f32 %v705_v52, %v705_v52  ;;  %v1058_v6 = vmul.f32 %v706_v53, %v706_v53  ;;  %v605_v18 = vsub.f32 %v219_v62, %v4274_v22  ;;  %v4450_v36 = vmul.f32 %v584_v26, %v584_v26  ;;  %v3639_v52 = vld [vmem:[%s8557_s0 + $0x3e0] sm:$0xff]  ;;  %v3640_v53 = vld [vmem:[%s8557_s0 + $0x3e8] sm:$0xff] }
  0x9a   : > { %v4426_v21 = vadd.f32 %v1053_v54, %v957_v34  ;;  %v4428_v9 = vadd.f32 %v1054_v55, %v958_v35  ;;  %v4435_v15 = vadd.f32 %v1055_v2, %v959_v40  ;;  %v4437_v16 = vadd.f32 %v1056_v3, %v960_v41  ;;  %v3635_v40 = vld [vmem:[%s8557_s0 + $0x3c0] sm:$0xff]  ;;  %v3636_v41 = vld [vmem:[%s8557_s0 + $0x3c8] sm:$0xff] }
  0x9b   : > { %v4444_v30 = vadd.f32 %v1057_v5, %v961_v44  ;;  %v4446_v34 = vadd.f32 %v1058_v6, %v962_v45  ;;  %v4448_v35 = vmul.f32 %v583_v20, %v583_v20  ;;  %v4452_v37 = vmul.f32 %v585_v27, %v585_v27  ;;  %v488_v44 = vpop.permute.xlu0 %487  ;;  %v189_v6 = vld [vmem:[%s8557_s0 + $0x140] sm:$0xff] }
  0x9c   : > { %8568 = vst [vmem:[#allocation3_spill] sm:$0xff] %v4426_v21  ;;  %v606_v38 = vsub.f32 %v220_v56, %v4274_v22  ;;  %v4464_v20 = vmul.f32 %v586_v31, %v586_v31  ;;  %v4466_v26 = vmul.f32 %v587_v32, %v587_v32  ;;  %v4468_v27 = vmul.f32 %v588_v60, %v588_v60  ;;  %v4477_v45 = vpop.permute.xlu1 %507  ;;  %v3637_v31 = vld [vmem:[%s8557_s0 + $0x3d0] sm:$0xff]  ;;  %v208_v21 = vld [vmem:[%s8557_s0 + $0x1d8] sm:$0xff] }
  0x9d   : > { %v649_v4 = vpop.permute.xlu2 %648  ;;  %8569 = vst [vmem:[#allocation4_spill] sm:$0xff] %v4428_v9  ;;  %v547_v22 = vsub.f32 %v161_v12, %v4276_v23  ;;  %v4482_v32 = vmul.f32 %v601_v63, %v601_v63  ;;  %v4484_v46 = vmul.f32 %v602_v10, %v602_v10  ;;  %v4486_v47 = vmul.f32 %v603_v11, %v603_v11  ;;  %v187_v60 = vld [vmem:[%s8557_s0 + $0x130] sm:$0xff]  ;;  %v190_v10 = vld [vmem:[%s8557_s0 + $0x148] sm:$0xff] }
  0x9e   : > { %8570 = vst [vmem:[#allocation5_spill] sm:$0xff] %v4435_v15  ;;  %v548_v48 = vsub.f32 %v162_v29, %v4276_v23  ;;  %v4498_v54 = vmul.f32 %v604_v17, %v604_v17  ;;  %v4500_v55 = vmul.f32 %v605_v18, %v605_v18  ;;  %v719_v62 = vsub.f32 %v3635_v40, %v649_v4 }
  0x9f   : > { %8571 = vst [vmem:[#allocation6_spill] sm:$0xff] %v4437_v16  ;;  %v720_v63 = vsub.f32 %v3636_v41, %v649_v4  ;;  %v4508_v2 = vmul.f32 %v606_v38, %v606_v38  ;;  %v4511_v3 = vsub.f32 %v163_v39, %v4276_v23  ;;  %v571_v56 = vsub.f32 %v185_v42, %v488_v44  ;;  %v164_v42 = vld [vmem:[%s8557_s0 + $0x78] sm:$0xff] }
  0xa0   : > { %8572 = vst [vmem:[#allocation7_spill] sm:$0xff] %v4444_v30  ;;  %v572_v5 = vsub.f32 %v186_v43, %v488_v44  ;;  %v721_v11 = vsub.f32 %v3637_v31, %v649_v4  ;;  %v722_v12 = vsub.f32 %v3638_v49, %v649_v4  ;;  %v723_v17 = vsub.f32 %v3639_v52, %v649_v4  ;;  %v165_v43 = vld [vmem:[%s8557_s0 + $0x80] sm:$0xff]  ;;  %v166_v31 = vld [vmem:[%s8557_s0 + $0x88] sm:$0xff]  ;;  %v3650_v30 = vld [vmem:[%s8557_s0 + $0x438] sm:$0xff] }
  0xa1   : > { %8573 = vst [vmem:[#allocation8_spill] sm:$0xff] %v4446_v34  ;;  %v724_v18 = vsub.f32 %v3640_v53, %v649_v4  ;;  %v573_v29 = vsub.f32 %v187_v60, %v488_v44  ;;  %v574_v38 = vsub.f32 %v188_v61, %v488_v44  ;;  %v1071_v40 = vmul.f32 %v719_v62, %v719_v62  ;;  %v149_v60 = vld [vmem:[%s8557_s0] sm:$0xff]  ;;  %v150_v61 = vld [vmem:[%s8557_s0 + $0x8] sm:$0xff]  ;;  %v151_v62 = vld [vmem:[%s8557_s0 + $0x10] sm:$0xff] }
  0xa2   : > { %8574 = vst [vmem:[#allocation9_spill] sm:$0xff] %v4482_v32  ;;  %v1072_v41 = vmul.f32 %v720_v63, %v720_v63  ;;  %v1073_v49 = vmul.f32 %v721_v11, %v721_v11  ;;  %v1074_v52 = vmul.f32 %v722_v12, %v722_v12  ;;  %v1075_v4 = vmul.f32 %v723_v17, %v723_v17  ;;  %v152_v12 = vld [vmem:[%s8557_s0 + $0x18] sm:$0xff]  ;;  %v153_v17 = vld [vmem:[%s8557_s0 + $0x20] sm:$0xff] }
  0xa3   : > { %8575 = vst [vmem:[#allocation10_spill] sm:$0xff] %v4484_v46  ;;  %v1076_v53 = vmul.f32 %v724_v18, %v724_v18  ;;  %v575_v63 = vsub.f32 %v189_v6, %v488_v44  ;;  %v576_v25 = vsub.f32 %v190_v10, %v488_v44  ;;  %v4538_v34 = vadd.f32 %v1071_v40, %v4326_v50 }
  0xa4   : > { %8576 = vst [vmem:[#allocation11_spill] sm:$0xff] %v4486_v47  ;;  %v4541_v11 = vadd.f32 %v1072_v41, %v4328_v51  ;;  %v4550_v18 = vadd.f32 %v1073_v49, %v4337_v57  ;;  %v4553_v6 = vadd.f32 %v1074_v52, %v4339_v58  ;;  %v4556_v50 = vadd.f32 %v1075_v4, %v4341_v59  ;;  %v203_v58 = vld [vmem:[%s8557_s0 + $0x1b0] sm:$0xff]  ;;  %v204_v59 = vld [vmem:[%s8557_s0 + $0x1b8] sm:$0xff]  ;;  %v3648_v49 = vld [vmem:[%s8557_s0 + $0x428] sm:$0xff] }
  0xa5   : > { %8577 = vst [vmem:[#allocation12_spill] sm:$0xff] %v4498_v54  ;;  %v657_v39 = vpop.permute.xlu2 %656  ;;  %v4559_v51 = vadd.f32 %v1076_v53, %v4349_v0  ;;  %v4562_v44 = vsub.f32 %v164_v42, %v4276_v23  ;;  %v4565_v10 = vsub.f32 %v165_v43, %v4276_v23  ;;  %v4568_v40 = vsub.f32 %v166_v31, %v4276_v23  ;;  %v503_v43 = vpop.permute.xlu0 %502 }
  0xa6   : > { %8578 = vst [vmem:[#allocation13_spill] sm:$0xff] %v4500_v55  ;;  %v4570_v57 = vmul.f32 %v547_v22, %v547_v22  ;;  %v4578_v0 = vmul.f32 %v548_v48, %v548_v48  ;;  %v4581_v41 = vsub.f32 %v149_v60, %v4278_v24  ;;  %v4584_v42 = vsub.f32 %v150_v61, %v4278_v24  ;;  %v205_v22 = vld [vmem:[%s8557_s0 + $0x1c0] sm:$0xff]  ;;  %v4592_v31 = vpop.permute.xlu1 %522  ;;  %v206_v61 = vld [vmem:[%s8557_s0 + $0x1c8] sm:$0xff] }
  0xa7   : > { %8579 = vst [vmem:[#allocation14_spill] sm:$0xff] %v4508_v2  ;;  %v4587_v23 = vsub.f32 %v151_v62, %v4278_v24  ;;  %v3647_v48 = vld [vmem:[%s8557_s0 + $0x420] sm:$0xff]  ;;  %v4601_v52 = vsub.f32 %v152_v12, %v4278_v24  ;;  %v4604_v4 = vsub.f32 %v153_v17, %v4278_v24  ;;  %v987_v53 = vmul.f32 %v571_v56, %v571_v56  ;;  %v3649_v62 = vld [vmem:[%s8557_s0 + $0x430] sm:$0xff] }
  0xa8   : > { %8580 = vst [vmem:[#allocation15_spill] sm:$0xff] %v4538_v34  ;;  %v988_v60 = vmul.f32 %v572_v5, %v572_v5  ;;  %v989_v16 = vmul.f32 %v573_v29, %v573_v29  ;;  %v990_v12 = vmul.f32 %v574_v38, %v574_v38  ;;  %v991_v15 = vmul.f32 %v575_v63, %v575_v63  ;;  %v3651_v56 = vld [vmem:[%s8557_s0 + $0x440] sm:$0xff]  ;;  %v3652_v5 = vld [vmem:[%s8557_s0 + $0x448] sm:$0xff]  ;;  %v207_v17 = vld [vmem:[%s8557_s0 + $0x1d0] sm:$0xff] }
  0xa9   : > { %8581 = vst [vmem:[#allocation16_spill] sm:$0xff] %v4541_v11  ;;  %v992_v9 = vmul.f32 %v576_v25, %v576_v25  ;;  %v589_v29 = vsub.f32 %v203_v58, %v503_v43  ;;  %v590_v38 = vsub.f32 %v204_v59, %v503_v43  ;;  %v731_v63 = vsub.f32 %v3647_v48, %v657_v39  ;;  %v167_v11 = vld [vmem:[%s8557_s0 + $0x90] sm:$0xff]  ;;  %v168_v34 = vld [vmem:[%s8557_s0 + $0x98] sm:$0xff]  ;;  %v169_v59 = vld [vmem:[%s8557_s0 + $0xa0] sm:$0xff] }
  0xaa   : > { %8582 = vst [vmem:[#allocation17_spill] sm:$0xff] %v4550_v18  ;;  %v732_v25 = vsub.f32 %v3648_v49, %v657_v39  ;;  %v734_v18 = vsub.f32 %v3650_v30, %v657_v39  ;;  %v735_v2 = vsub.f32 %v3651_v56, %v657_v39  ;;  %v736_v55 = vsub.f32 %v3652_v5, %v657_v39  ;;  %v170_v30 = vld [vmem:[%s8557_s0 + $0xa8] sm:$0xff] }
  0xab   : > { %8583 = vst [vmem:[#allocation18_spill] sm:$0xff] %v4553_v6  ;;  %v733_v6 = vsub.f32 %v3649_v62, %v657_v39  ;;  %v1083_v54 = vmul.f32 %v731_v63, %v731_v63  ;;  %v594_v48 = vsub.f32 %v208_v21, %v503_v43  ;;  %v553_v56 = vsub.f32 %v167_v11, %v4303_v33  ;;  %v3665_v21 = vld [vmem:[%s8557_s0 + $0x4b0] sm:$0xff]  ;;  %v3668_v11 = vld [vmem:[%s8557_s0 + $0x4c8] sm:$0xff] }
  0xac   : > { %8584 = vst [vmem:[#allocation19_spill] sm:$0xff] %v4556_v50  ;;  %v592_v50 = vsub.f32 %v206_v61, %v503_v43  ;;  %v1084_v47 = vmul.f32 %v732_v25, %v732_v25  ;;  %v1086_v61 = vmul.f32 %v734_v18, %v734_v18  ;;  %v1087_v62 = vmul.f32 %v735_v2, %v735_v2  ;;  %v3669_v18 = vld [vmem:[%s8557_s0 + $0x4d0] sm:$0xff] }
  0xad   : > { %8585 = vst [vmem:[#allocation20_spill] sm:$0xff] %v4559_v51  ;;  %v591_v51 = vsub.f32 %v205_v22, %v503_v43  ;;  %v669_v58 = vpop.permute.xlu2 %668  ;;  %v593_v22 = vsub.f32 %v207_v17, %v503_v43  ;;  %v1085_v49 = vmul.f32 %v733_v6, %v733_v6  ;;  %v1088_v46 = vmul.f32 %v736_v55, %v736_v55  ;;  %v3666_v55 = vld [vmem:[%s8557_s0 + $0x4b8] sm:$0xff] }
  0xae   : > { %8586 = vst [vmem:[#allocation21_spill] sm:$0xff] %v4570_v57  ;;  %v4639_v32 = vadd.f32 %v1083_v54, %v987_v53  ;;  %v4641_v39 = vadd.f32 %v1084_v47, %v988_v60  ;;  %v554_v5 = vsub.f32 %v168_v34, %v4303_v33  ;;  %v4647_v25 = vadd.f32 %v1086_v61, %v990_v12  ;;  %v3667_v47 = vld [vmem:[%s8557_s0 + $0x4c0] sm:$0xff]  ;;  %v3670_v6 = vld [vmem:[%s8557_s0 + $0x4d8] sm:$0xff]  ;;  %v4679_v17 = vpop.permute.xlu1 %632 }
  0xaf   : > { %8587 = vst [vmem:[#allocation22_spill] sm:$0xff] %v4578_v0  ;;  %v4645_v63 = vadd.f32 %v1085_v49, %v989_v16  ;;  %v555_v54 = vsub.f32 %v169_v59, %v4303_v33  ;;  %v556_v34 = vsub.f32 %v170_v30, %v4303_v33  ;;  %v4660_v16 = vadd.f32 %v1087_v62, %v991_v15  ;;  %v222_v15 = vld [vmem:[%s8557_s0 + $0x248] sm:$0xff] }
  0xb0   : > { %8588 = vst [vmem:[#allocation23_spill] sm:$0xff] %v4592_v31  ;;  %v4662_v2 = vadd.f32 %v1088_v46, %v992_v9  ;;  %v1005_v43 = vmul.f32 %v589_v29, %v589_v29  ;;  %v1006_v53 = vmul.f32 %v590_v38, %v590_v38  ;;  %v1007_v60 = vmul.f32 %v591_v51, %v591_v51  ;;  %v221_v9 = vld [vmem:[%s8557_s0 + $0x240] sm:$0xff]  ;;  %v518_v46 = vpop.permute.xlu0 %517  ;;  %v223_v51 = vld [vmem:[%s8557_s0 + $0x250] sm:$0xff] }
  0xb1   : > { %8589 = vst [vmem:[#allocation24_spill] sm:$0xff] %v4639_v32  ;;  %v1008_v12 = vmul.f32 %v592_v50, %v592_v50  ;;  %v1009_v59 = vmul.f32 %v593_v22, %v593_v22  ;;  %v1010_v30 = vmul.f32 %v594_v48, %v594_v48  ;;  %v749_v49 = vsub.f32 %v3665_v21, %v669_v58  ;;  %v224_v50 = vld [vmem:[%s8557_s0 + $0x258] sm:$0xff]  ;;  %v3684_v32 = vld [vmem:[%s8557_s0 + $0x548] sm:$0xff] }
  0xb2   : > { %8590 = vst [vmem:[#allocation25_spill] sm:$0xff] %v4641_v39  ;;  %v750_v61 = vsub.f32 %v3666_v55, %v669_v58  ;;  %v751_v29 = vsub.f32 %v3667_v47, %v669_v58  ;;  %v752_v38 = vsub.f32 %v3668_v11, %v669_v58  ;;  %v753_v62 = vsub.f32 %v3669_v18, %v669_v58  ;;  %v3683_v39 = vld [vmem:[%s8557_s0 + $0x540] sm:$0xff] }
  0xb3   : > { %8591 = vst [vmem:[#allocation26_spill] sm:$0xff] %v4645_v63  ;;  %v607_v22 = vsub.f32 %v221_v9, %v518_v46  ;;  %v608_v48 = vsub.f32 %v222_v15, %v518_v46  ;;  %v1101_v21 = vmul.f32 %v749_v49, %v749_v49  ;;  %v225_v63 = vld [vmem:[%s8557_s0 + $0x260] sm:$0xff]  ;;  %v609_v9 = vsub.f32 %v223_v51, %v518_v46 }
  0xb4   : > { %8592 = vst [vmem:[#allocation27_spill] sm:$0xff] %v4647_v25  ;;  %v1102_v55 = vmul.f32 %v750_v61, %v750_v61  ;;  %v172_v25 = vld [vmem:[%s8557_s0 + $0xb8] sm:$0xff]  ;;  %v1103_v47 = vmul.f32 %v751_v29, %v751_v29  ;;  %v1104_v11 = vmul.f32 %v752_v38, %v752_v38  ;;  %v1105_v18 = vmul.f32 %v753_v62, %v753_v62  ;;  %v3685_v62 = vld [vmem:[%s8557_s0 + $0x550] sm:$0xff] }
  0xb5   : > { %8593 = vst [vmem:[#allocation28_spill] sm:$0xff] %v4660_v16  ;;  %v171_v16 = vld [vmem:[%s8557_s0 + $0xb0] sm:$0xff]  ;;  %v610_v15 = vsub.f32 %v224_v50, %v518_v46  ;;  %v4699_v49 = vadd.f32 %v1101_v21, %v1005_v43  ;;  %v681_v0 = vpop.permute.xlu2 %680  ;;  %v611_v50 = vsub.f32 %v225_v63, %v518_v46  ;;  %v970_v21 = vmul.f32 %v554_v5, %v554_v5  ;;  %v3630_v5 = vld [vmem:[%s8557_s0 + $0x398] sm:$0xff] }
  0xb6   : > { %8594 = vst [vmem:[#allocation29_spill] sm:$0xff] %v4662_v2  ;;  %v754_v2 = vsub.f32 %v3670_v6, %v669_v58  ;;  %v226_v58 = vld [vmem:[%s8557_s0 + $0x268] sm:$0xff]  ;;  %v4701_v61 = vadd.f32 %v1102_v55, %v1006_v53  ;;  %v4709_v57 = vadd.f32 %v1103_v47, %v1007_v60  ;;  %v4711_v29 = vadd.f32 %v1104_v11, %v1008_v12  ;;  %v3686_v60 = vld [vmem:[%s8557_s0 + $0x558] sm:$0xff] }
  0xb7   : > { %8595 = vst [vmem:[#allocation30_spill] sm:$0xff] %v4699_v49  ;;  %v557_v43 = vsub.f32 %v171_v16, %v4303_v33  ;;  %v558_v53 = vsub.f32 %v172_v25, %v4303_v33  ;;  %v612_v38 = vsub.f32 %v226_v58, %v518_v46  ;;  %v969_v12 = vmul.f32 %v553_v56, %v553_v56  ;;  %v3688_v33 = vld [vmem:[%s8557_s0 + $0x568] sm:$0xff]  ;;  %v3629_v56 = vld [vmem:[%s8557_s0 + $0x390] sm:$0xff] }
  0xb8   : > { %v1106_v6 = vmul.f32 %v754_v2, %v754_v2  ;;  %8596 = vst [vmem:[#allocation31_spill] sm:$0xff] %v4701_v61  ;;  %v4713_v2 = vadd.f32 %v1105_v18, %v1009_v59  ;;  %v3687_v59 = vld [vmem:[%s8557_s0 + $0x560] sm:$0xff]  ;;  %v767_v63 = vsub.f32 %v3683_v39, %v681_v0  ;;  %v768_v25 = vsub.f32 %v3684_v32, %v681_v0 }
  0xb9   : > { %8597 = vst [vmem:[#allocation32_spill] sm:$0xff] %v4709_v57  ;;  %v971_v16 = vmul.f32 %v555_v54, %v555_v54  ;;  %v972_v46 = vmul.f32 %v556_v34, %v556_v34  ;;  %v1024_v55 = vmul.f32 %v608_v48, %v608_v48  ;;  %v1025_v58 = vmul.f32 %v609_v9, %v609_v9  ;;  %v154_v57 = vld [vmem:[%s8557_s0 + $0x28] sm:$0xff] }
  0xba   : > { %8598 = vst [vmem:[#allocation33_spill] sm:$0xff] %v4711_v29  ;;  %v4715_v51 = vadd.f32 %v1106_v6, %v1010_v30  ;;  %v1023_v30 = vmul.f32 %v607_v22, %v607_v22  ;;  %v1026_v47 = vmul.f32 %v610_v15, %v610_v15  ;;  %v769_v11 = vsub.f32 %v3685_v62, %v681_v0  ;;  %v645_v6 = vpop.permute.xlu1 %644  ;;  %v3631_v15 = vld [vmem:[%s8557_s0 + $0x3a0] sm:$0xff]  ;;  %v3632_v62 = vld [vmem:[%s8557_s0 + $0x3a8] sm:$0xff] }
  0xbb   : > { %8599 = vst [vmem:[#allocation34_spill] sm:$0xff] %v4713_v2  ;;  %v770_v18 = vsub.f32 %v3686_v60, %v681_v0  ;;  %v1028_v39 = vmul.f32 %v612_v38, %v612_v38  ;;  %v771_v32 = vsub.f32 %v3687_v59, %v681_v0  ;;  %v772_v54 = vsub.f32 %v3688_v33, %v681_v0  ;;  %v3634_v0 = vld [vmem:[%s8557_s0 + $0x3b8] sm:$0xff] }
  0xbc   : > { %8600 = vst [vmem:[#allocation35_spill] sm:$0xff] %v4715_v51  ;;  %v1027_v51 = vmul.f32 %v611_v50, %v611_v50  ;;  %v1119_v34 = vmul.f32 %v767_v63, %v767_v63  ;;  %v1120_v22 = vmul.f32 %v768_v25, %v768_v25  ;;  %v1121_v48 = vmul.f32 %v769_v11, %v769_v11  ;;  %v3633_v50 = vld [vmem:[%s8557_s0 + $0x3b0] sm:$0xff] }
  0xbd   : > { %v1122_v9 = vmul.f32 %v770_v18, %v770_v18  ;;  %v1123_v60 = vmul.f32 %v771_v32, %v771_v32  ;;  %v1124_v2 = vmul.f32 %v772_v54, %v772_v54  ;;  %v713_v38 = vsub.f32 %v3629_v56, %v645_v6 }
  0xbe   : > { %v714_v59 = vsub.f32 %v3630_v5, %v645_v6  ;;  %v4749_v33 = vadd.f32 %v1119_v34, %v1023_v30  ;;  %v4751_v63 = vadd.f32 %v1120_v22, %v1024_v55  ;;  %v4753_v25 = vadd.f32 %v1121_v48, %v1025_v58  ;;  %v191_v30 = vld [vmem:[%s8557_s0 + $0x150] sm:$0xff]  ;;  %v194_v48 = vld [vmem:[%s8557_s0 + $0x168] sm:$0xff] }
  0xbf   : > { %v4755_v11 = vadd.f32 %v1122_v9, %v1026_v47  ;;  %v4757_v18 = vadd.f32 %v1123_v60, %v1027_v51  ;;  %v4759_v32 = vadd.f32 %v1124_v2, %v1028_v39  ;;  %v715_v54 = vsub.f32 %v3631_v15, %v645_v6  ;;  %v192_v2 = vld [vmem:[%s8557_s0 + $0x158] sm:$0xff]  ;;  %v193_v51 = vld [vmem:[%s8557_s0 + $0x160] sm:$0xff] }
  0xc0   : > { %8601 = vst [vmem:[#allocation36_spill] sm:$0xff] %v4749_v33  ;;  %v716_v29 = vsub.f32 %v3632_v62, %v645_v6  ;;  %v717_v55 = vsub.f32 %v3633_v50, %v645_v6  ;;  %v718_v56 = vsub.f32 %v3634_v0, %v645_v6  ;;  %v1065_v58 = vmul.f32 %v713_v38, %v713_v38  ;;  %v195_v6 = vld [vmem:[%s8557_s0 + $0x170] sm:$0xff] }
  0xc1   : > { %8602 = vst [vmem:[#allocation37_spill] sm:$0xff] %v4751_v63  ;;  %v1066_v5 = vmul.f32 %v714_v59, %v714_v59  ;;  %v973_v47 = vmul.f32 %v557_v43, %v557_v43  ;;  %v974_v34 = vmul.f32 %v558_v53, %v558_v53  ;;  %v1067_v39 = vmul.f32 %v715_v54, %v715_v54  ;;  %v196_v43 = vld [vmem:[%s8557_s0 + $0x178] sm:$0xff] }
  0xc2   : > { %8603 = vst [vmem:[#allocation38_spill] sm:$0xff] %v4753_v25  ;;  %v1068_v22 = vmul.f32 %v716_v29, %v716_v29  ;;  %v1069_v53 = vmul.f32 %v717_v55, %v717_v55  ;;  %v1070_v9 = vmul.f32 %v718_v56, %v718_v56  ;;  %v4782_v15 = vadd.f32 %v1065_v58, %v969_v12  ;;  %v4830_v58 = vpop.permute.xlu0 %532 }
  0xc3   : > { %8604 = vst [vmem:[#allocation39_spill] sm:$0xff] %v4755_v11  ;;  %v4784_v62 = vadd.f32 %v1066_v5, %v970_v21  ;;  %v540_v29 = vsub.f32 %v154_v57, %v4278_v24  ;;  %v577_v60 = vsub.f32 %v191_v30, %v4387_v28  ;;  %v4788_v50 = vadd.f32 %v1067_v39, %v971_v16  ;;  %v653_v16 = vpop.permute.xlu1 %652  ;;  %v213_v39 = vld [vmem:[%s8557_s0 + $0x200] sm:$0xff] }
  0xc4   : > { %8605 = vst [vmem:[#allocation40_spill] sm:$0xff] %v4757_v18  ;;  %v4790_v0 = vadd.f32 %v1068_v22, %v972_v46  ;;  %v578_v38 = vsub.f32 %v192_v2, %v4387_v28  ;;  %v579_v59 = vsub.f32 %v193_v51, %v4387_v28  ;;  %v4794_v54 = vadd.f32 %v1069_v53, %v973_v47  ;;  %v3643_v22 = vld [vmem:[%s8557_s0 + $0x400] sm:$0xff] }
  0xc5   : > { %8606 = vst [vmem:[#allocation41_spill] sm:$0xff] %v4759_v32  ;;  %v4796_v55 = vadd.f32 %v1070_v9, %v974_v34  ;;  %v4800_v12 = vmul.f32 %v4511_v3, %v4511_v3  ;;  %v580_v24 = vsub.f32 %v194_v48, %v4387_v28  ;;  %v581_v57 = vsub.f32 %v195_v6, %v4387_v28  ;;  %v212_v34 = vld [vmem:[%s8557_s0 + $0x1f8] sm:$0xff]  ;;  %v3644_v48 = vld [vmem:[%s8557_s0 + $0x408] sm:$0xff] }
  0xc6   : > { %8607 = vst [vmem:[#allocation42_spill] sm:$0xff] %v4782_v15  ;;  %v582_v21 = vsub.f32 %v196_v43, %v4387_v28  ;;  %v4807_v46 = vmul.f32 %v4562_v44, %v4562_v44  ;;  %v4811_v30 = vmul.f32 %v4565_v10, %v4565_v10  ;;  %v4815_v56 = vmul.f32 %v4568_v40, %v4568_v40  ;;  %v209_v28 = vld [vmem:[%s8557_s0 + $0x1e0] sm:$0xff]  ;;  %v210_v44 = vld [vmem:[%s8557_s0 + $0x1e8] sm:$0xff]  ;;  %v211_v10 = vld [vmem:[%s8557_s0 + $0x1f0] sm:$0xff] }
  0xc7   : > { %8608 = vst [vmem:[#allocation43_spill] sm:$0xff] %v4784_v62  ;;  %v4819_v3 = vmul.f32 %v4581_v41, %v4581_v41  ;;  %v4834_v40 = vmul.f32 %v4584_v42, %v4584_v42  ;;  %v4838_v41 = vmul.f32 %v4587_v23, %v4587_v23  ;;  %v4842_v5 = vmul.f32 %v4601_v52, %v4601_v52  ;;  %v3641_v42 = vld [vmem:[%s8557_s0 + $0x3f0] sm:$0xff]  ;;  %v3642_v23 = vld [vmem:[%s8557_s0 + $0x3f8] sm:$0xff] }
  0xc8   : > { %8609 = vst [vmem:[#allocation44_spill] sm:$0xff] %v4788_v50  ;;  %v4846_v47 = vmul.f32 %v4604_v4, %v4604_v4  ;;  %v4857_v2 = vmul.f32 %v540_v29, %v540_v29  ;;  %v4859_v52 = vmul.f32 %v577_v60, %v577_v60  ;;  %v4861_v51 = vmul.f32 %v578_v38, %v578_v38  ;;  %v3645_v29 = vld [vmem:[%s8557_s0 + $0x410] sm:$0xff]  ;;  %v3646_v60 = vld [vmem:[%s8557_s0 + $0x418] sm:$0xff]  ;;  %v214_v38 = vld [vmem:[%s8557_s0 + $0x208] sm:$0xff] }
  0xc9   : > { %8610 = vst [vmem:[#allocation45_spill] sm:$0xff] %v4790_v0  ;;  %v4863_v4 = vmul.f32 %v579_v59, %v579_v59  ;;  %v4874_v6 = vmul.f32 %v580_v24, %v580_v24  ;;  %v4876_v43 = vmul.f32 %v581_v57, %v581_v57  ;;  %v4878_v53 = vmul.f32 %v582_v21, %v582_v21 }
  0xca   : > { %8611 = vst [vmem:[#allocation46_spill] sm:$0xff] %v4794_v54  ;;  %v595_v9 = vsub.f32 %v209_v28, %v4477_v45  ;;  %v596_v59 = vsub.f32 %v210_v44, %v4477_v45  ;;  %v597_v24 = vsub.f32 %v211_v10, %v4477_v45  ;;  %v725_v57 = vsub.f32 %v3641_v42, %v653_v16  ;;  %v227_v44 = vld [vmem:[%s8557_s0 + $0x270] sm:$0xff]  ;;  %v228_v10 = vld [vmem:[%s8557_s0 + $0x278] sm:$0xff] }
  0xcb   : > { %8612 = vst [vmem:[#allocation47_spill] sm:$0xff] %v4796_v55  ;;  %v726_v21 = vsub.f32 %v3642_v23, %v653_v16  ;;  %v598_v28 = vsub.f32 %v212_v34, %v4477_v45  ;;  %v599_v32 = vsub.f32 %v213_v39, %v4477_v45  ;;  %v727_v18 = vsub.f32 %v3643_v22, %v653_v16  ;;  %v229_v34 = vld [vmem:[%s8557_s0 + $0x280] sm:$0xff]  ;;  %v3612_v23 = vld [vmem:[%s8557_s0 + $0x308] sm:$0xff]  ;;  %v3613_v39 = vld [vmem:[%s8557_s0 + $0x310] sm:$0xff]  ;;  %v4915_v22 = vpop.permute.xlu2 %692 }
  0xcc   : > { %8613 = vst [vmem:[#allocation48_spill] sm:$0xff] %v4830_v58  ;;  %v728_v11 = vsub.f32 %v3644_v48, %v653_v16  ;;  %v729_v25 = vsub.f32 %v3645_v29, %v653_v16  ;;  %v730_v63 = vsub.f32 %v3646_v60, %v653_v16  ;;  %v1077_v33 = vmul.f32 %v725_v57, %v725_v57  ;;  %v3625_v55 = vld [vmem:[%s8557_s0 + $0x370] sm:$0xff] }
  0xcd   : > { %8614 = vst [vmem:[#allocation49_spill] sm:$0xff] %v4857_v2  ;;  %v1078_v61 = vmul.f32 %v726_v21, %v726_v21  ;;  %v600_v49 = vsub.f32 %v214_v38, %v4477_v45  ;;  %v4895_v58 = vmul.f32 %v595_v9, %v595_v9  ;;  %v1079_v42 = vmul.f32 %v727_v18, %v727_v18  ;;  %v3611_v45 = vld [vmem:[%s8557_s0 + $0x300] sm:$0xff]  ;;  %v3614_v38 = vld [vmem:[%s8557_s0 + $0x318] sm:$0xff] }
  0xce   : > { %8615 = vst [vmem:[#allocation50_spill] sm:$0xff] %v4859_v52  ;;  %v1080_v16 = vmul.f32 %v728_v11, %v728_v11  ;;  %v1081_v48 = vmul.f32 %v729_v25, %v729_v25  ;;  %v1082_v9 = vmul.f32 %v730_v63, %v730_v63  ;;  %v4918_v29 = vadd.f32 %v1077_v33, %v4351_v1  ;;  %v3659_v1 = vld [vmem:[%s8557_s0 + $0x480] sm:$0xff] }
  0xcf   : > { %8616 = vst [vmem:[#allocation51_spill] sm:$0xff] %v4861_v51  ;;  %v4921_v11 = vadd.f32 %v1078_v61, %v4362_v7  ;;  %v4923_v18 = vmul.f32 %v596_v59, %v596_v59  ;;  %v4925_v60 = vmul.f32 %v597_v24, %v597_v24  ;;  %v4931_v57 = vadd.f32 %v1079_v42, %v4364_v8  ;;  %v3660_v7 = vld [vmem:[%s8557_s0 + $0x488] sm:$0xff]  ;;  %v665_v61 = vpop.permute.xlu1 %664  ;;  %v3615_v8 = vld [vmem:[%s8557_s0 + $0x320] sm:$0xff]  ;;  %v641_v24 = vpop.permute.xlu0 %640 }
  0xd0   : > { %8617 = vst [vmem:[#allocation52_spill] sm:$0xff] %v4863_v4  ;;  %v4934_v25 = vadd.f32 %v1080_v16, %v4372_v13  ;;  %v4942_v33 = vmul.f32 %v598_v28, %v598_v28  ;;  %v4944_v63 = vmul.f32 %v599_v32, %v599_v32  ;;  %v3623_v13 = vld [vmem:[%s8557_s0 + $0x360] sm:$0xff]  ;;  %v3624_v59 = vld [vmem:[%s8557_s0 + $0x368] sm:$0xff]  ;;  %v4956_v21 = vadd.f32 %v1081_v48, %v4374_v14  ;;  %v3661_v14 = vld [vmem:[%s8557_s0 + $0x490] sm:$0xff] }
  0xd1   : > { %8618 = vst [vmem:[#allocation53_spill] sm:$0xff] %v4874_v6  ;;  %v4959_v28 = vadd.f32 %v1082_v9, %v4382_v19  ;;  %v4961_v32 = vmul.f32 %v600_v49, %v600_v49  ;;  %v4964_v42 = vsub.f32 %v227_v44, %v4592_v31  ;;  %v4967_v16 = vsub.f32 %v228_v10, %v4592_v31  ;;  %v3662_v19 = vld [vmem:[%s8557_s0 + $0x498] sm:$0xff]  ;;  %v3663_v10 = vld [vmem:[%s8557_s0 + $0x4a0] sm:$0xff] }
  0xd2   : > { %8619 = vst [vmem:[#allocation54_spill] sm:$0xff] %v4876_v43  ;;  %v695_v49 = vsub.f32 %v3611_v45, %v4679_v17  ;;  %v696_v44 = vsub.f32 %v3612_v23, %v4679_v17  ;;  %v743_v48 = vsub.f32 %v3659_v1, %v665_v61  ;;  %v744_v9 = vsub.f32 %v3660_v7, %v665_v61  ;;  %v3626_v45 = vld [vmem:[%s8557_s0 + $0x378] sm:$0xff]  ;;  %v3627_v23 = vld [vmem:[%s8557_s0 + $0x380] sm:$0xff] }
  0xd3   : > { %8620 = vst [vmem:[#allocation55_spill] sm:$0xff] %v4878_v53  ;;  %v697_v54 = vsub.f32 %v3613_v39, %v4679_v17  ;;  %v698_v0 = vsub.f32 %v3614_v38, %v4679_v17  ;;  %v699_v50 = vsub.f32 %v3615_v8, %v4679_v17  ;;  %v707_v62 = vsub.f32 %v3623_v13, %v641_v24  ;;  %v3628_v39 = vld [vmem:[%s8557_s0 + $0x388] sm:$0xff] }
  0xd4   : > { %8621 = vst [vmem:[#allocation56_spill] sm:$0xff] %v4895_v58  ;;  %v708_v15 = vsub.f32 %v3624_v59, %v641_v24  ;;  %v746_v1 = vsub.f32 %v3662_v19, %v665_v61  ;;  %v747_v38 = vsub.f32 %v3663_v10, %v665_v61  ;;  %v1095_v8 = vmul.f32 %v743_v48, %v743_v48  ;;  %v230_v13 = vld [vmem:[%s8557_s0 + $0x288] sm:$0xff] }
  0xd5   : > { %8622 = vst [vmem:[#allocation57_spill] sm:$0xff] %v4915_v22  ;;  %v4970_v22 = vsub.f32 %v229_v34, %v4592_v31  ;;  %v3664_v34 = vld [vmem:[%s8557_s0 + $0x4a8] sm:$0xff]  ;;  %v712_v10 = vsub.f32 %v3628_v39, %v641_v24  ;;  %v5057_v39 = vmul.f32 %v699_v50, %v699_v50 }
  0xd6   : > { %8623 = vst [vmem:[#allocation58_spill] sm:$0xff] %v4918_v29  ;;  %v748_v7 = vsub.f32 %v3664_v34, %v665_v61  ;;  %v1099_v59 = vmul.f32 %v747_v38, %v747_v38  ;;  %v5008_v19 = vadd.f32 %v1095_v8, %v4448_v35  ;;  %v1059_v34 = vmul.f32 %v707_v62, %v707_v62  ;;  %v8645_v38 = vld [vmem:[#allocation22_spill] sm:$0xff] }
  0xd7   : > { %8624 = vst [vmem:[#allocation59_spill] sm:$0xff] %v4921_v11  ;;  %v711_v11 = vsub.f32 %v3627_v23, %v641_v24  ;;  %v1060_v23 = vmul.f32 %v708_v15, %v708_v15  ;;  %v5029_v62 = vsub.f32 %v230_v13, %v4592_v31  ;;  %v3720_v15 = vld [vmem:[%s8557_s0 + $0x668] sm:$0xff] }
  0xd8   : > { %8625 = vst [vmem:[#allocation60_spill] sm:$0xff] %v4923_v18  ;;  %v5023_v35 = vadd.f32 %v1099_v59, %v4466_v26  ;;  %v3721_v26 = vld [vmem:[%s8557_s0 + $0x670] sm:$0xff] }
  0xd9   : > { %8626 = vst [vmem:[#allocation61_spill] sm:$0xff] %v4925_v60  ;;  %v3653_v59 = vld [vmem:[%s8557_s0 + $0x450] sm:$0xff] }
  0xda   : > { %8627 = vst [vmem:[#allocation62_spill] sm:$0xff] %v4931_v57  ;;  %v710_v57 = vsub.f32 %v3626_v45, %v641_v24  ;;  %v801_v45 = vpop.permute.xlu2 %800 }
  0xdb   : > { %8628 = vst [vmem:[#allocation63_spill] sm:$0xff] %v4934_v25  ;;  %v1096_v25 = vmul.f32 %v744_v9, %v744_v9  ;;  %v3719_v9 = vld [vmem:[%s8557_s0 + $0x660] sm:$0xff]  ;;  %v868_v13 = vsub.f32 %v3720_v15, %v801_v45 }
  0xdc   : > { %8629 = vst [vmem:[#allocation64_spill] sm:$0xff] %v4942_v33 }
  0xdd   : > { %8630 = vst [vmem:[#allocation65_spill] sm:$0xff] %v4944_v63 }
  0xde   : > { %8631 = vst [vmem:[#allocation66_spill] sm:$0xff] %v4956_v21  ;;  %v745_v21 = vsub.f32 %v3661_v14, %v665_v61  ;;  %v1100_v14 = vmul.f32 %v748_v7, %v748_v7  ;;  %v5011_v61 = vadd.f32 %v1096_v25, %v4450_v36  ;;  %v1063_v25 = vmul.f32 %v711_v11, %v711_v11 }
  0xdf   : > { %8632 = vst [vmem:[#allocation67_spill] sm:$0xff] %v4959_v28  ;;  %v709_v28 = vsub.f32 %v3625_v55, %v641_v24  ;;  %v3616_v55 = vld [vmem:[%s8557_s0 + $0x328] sm:$0xff]  ;;  %v3723_v24 = vld [vmem:[%s8557_s0 + $0x680] sm:$0xff]  ;;  %v1252_v7 = vadd.f32 %v1060_v23, %v8645_v38 }
  0xe0   : > { %8633 = vst [vmem:[#allocation68_spill] sm:$0xff] %v4961_v32  ;;  %v1097_v29 = vmul.f32 %v745_v21, %v745_v21  ;;  %v5026_v36 = vadd.f32 %v1100_v14, %v4468_v27  ;;  %v5044_v27 = vmul.f32 %v697_v54, %v697_v54  ;;  %v1064_v54 = vmul.f32 %v712_v10, %v712_v10  ;;  %v5068_v14 = vpop.permute.xlu0 %660 }
  0xe1   : > { %8634 = vst [vmem:[#allocation69_spill] sm:$0xff] %v4964_v42  ;;  %v871_v10 = vsub.f32 %v3723_v24, %v801_v45 }
  0xe2   : > { %8635 = vst [vmem:[#allocation70_spill] sm:$0xff] %v4967_v16  ;;  %v5014_v21 = vadd.f32 %v1097_v29, %v4452_v37  ;;  %v5032_v37 = vsub.f32 %v3616_v55, %v4679_v17  ;;  %v1062_v29 = vmul.f32 %v710_v57, %v710_v57  ;;  %v3722_v17 = vld [vmem:[%s8557_s0 + $0x678] sm:$0xff]  ;;  %v869_v55 = vsub.f32 %v3721_v26, %v801_v45  ;;  %v3677_v26 = vld [vmem:[%s8557_s0 + $0x510] sm:$0xff] }
  0xe3   : > { %8636 = vst [vmem:[#allocation71_spill] sm:$0xff] %v4970_v22  ;;  %v1098_v22 = vmul.f32 %v746_v1, %v746_v1  ;;  %v1061_v1 = vmul.f32 %v709_v28, %v709_v28  ;;  %v3724_v28 = vld [vmem:[%s8557_s0 + $0x688] sm:$0xff]  ;;  %v8644_v57 = vld [vmem:[#allocation21_spill] sm:$0xff]  ;;  %v870_v50 = vsub.f32 %v3722_v17, %v801_v45  ;;  %v1256_v38 = vadd.f32 %v1064_v54, %v4815_v56 }
  0xe4   : > { %8637 = vst [vmem:[#allocation72_spill] sm:$0xff] %v5008_v19  ;;  %v1251_v11 = vadd.f32 %v1059_v34, %v8644_v57  ;;  %v1254_v23 = vadd.f32 %v1062_v29, %v4807_v46  ;;  %v1157_v15 = vmul.f32 %v869_v55, %v869_v55  ;;  %v5075_v57 = vpop.permute.xlu1 %676 }
  0xe5   : > { %8638 = vst [vmem:[#allocation73_spill] sm:$0xff] %v5011_v61  ;;  %v5017_v48 = vadd.f32 %v1098_v22, %v4464_v20  ;;  %v5034_v20 = vmul.f32 %v695_v49, %v695_v49  ;;  %v5036_v22 = vmul.f32 %v696_v44, %v696_v44  ;;  %v867_v49 = vsub.f32 %v3719_v9, %v801_v45 }
  0xe6   : > { %8639 = vst [vmem:[#allocation74_spill] sm:$0xff] %v5014_v21  ;;  %v5055_v44 = vmul.f32 %v698_v0, %v698_v0  ;;  %v1253_v8 = vadd.f32 %v1061_v1, %v4800_v12  ;;  %v3654_v0 = vld [vmem:[%s8557_s0 + $0x458] sm:$0xff]  ;;  %v872_v9 = vsub.f32 %v3724_v28, %v801_v45  ;;  %v1255_v12 = vadd.f32 %v1063_v25, %v4811_v30 }
  0xe7   : > { %8640 = vst [vmem:[#allocation75_spill] sm:$0xff] %v5017_v48  ;;  %v1155_v34 = vmul.f32 %v867_v49, %v867_v49  ;;  %v1156_v1 = vmul.f32 %v868_v13, %v868_v13  ;;  %v5079_v45 = vsub.f32 %v3653_v59, %v5068_v14  ;;  %v5082_v46 = vsub.f32 %v3654_v0, %v5068_v14  ;;  %v3678_v25 = vld [vmem:[%s8557_s0 + $0x518] sm:$0xff]  ;;  %v3681_v48 = vld [vmem:[%s8557_s0 + $0x530] sm:$0xff] }
  0xe8   : > { %8641 = vst [vmem:[#allocation76_spill] sm:$0xff] %v5023_v35  ;;  %v1159_v35 = vmul.f32 %v871_v10, %v871_v10  ;;  %v1160_v17 = vmul.f32 %v872_v9, %v872_v9  ;;  %v1445_v56 = vmul.f32 %v1157_v15, %v1157_v15  ;;  %v5092_v49 = vsub.f32 %v3677_v26, %v5075_v57  ;;  %v3679_v9 = vld [vmem:[%s8557_s0 + $0x520] sm:$0xff] }
  0xe9   : > { %8642 = vst [vmem:[#allocation77_spill] sm:$0xff] %v5026_v36  ;;  %v1158_v36 = vmul.f32 %v870_v50, %v870_v50  ;;  %v1443_v30 = vmul.f32 %v1155_v34, %v1155_v34  ;;  %v1444_v29 = vmul.f32 %v1156_v1, %v1156_v1  ;;  %v5087_v24 = vadd.f32 %v1251_v11, %v1155_v34  ;;  %v3680_v11 = vld [vmem:[%s8557_s0 + $0x528] sm:$0xff] }
  0xea   : > { %8643 = vst [vmem:[#allocation78_spill] sm:$0xff] %v5029_v62  ;;  %v5089_v28 = vadd.f32 %v1252_v7, %v1156_v1  ;;  %v1447_v13 = vmul.f32 %v1159_v35, %v1159_v35  ;;  %v1448_v55 = vmul.f32 %v1160_v17, %v1160_v17  ;;  %v5094_v0 = vadd.f32 %v1253_v8, %v1157_v15 }
  0xeb   : > { %8646 = vst [vmem:[#allocation21_spill] sm:$0xff] %v5082_v46  ;;  %v1446_v54 = vmul.f32 %v1158_v36, %v1158_v36  ;;  %v1539_v59 = vmul.f32 3.38, %v1443_v30  ;;  %v1540_v50 = vmul.f32 3.38, %v1444_v29  ;;  %v5103_v7 = vsub.f32 %v3678_v25, %v5075_v57 }
  0xec   : > { %v1541_v10 = vmul.f32 3.38, %v1445_v56  ;;  %v5105_v34 = vadd.f32 %v1254_v23, %v1158_v36  ;;  %v1543_v26 = vmul.f32 3.38, %v1447_v13  ;;  %v1544_v30 = vmul.f32 3.38, %v1448_v55 }
  0xed   : > { %v1542_v1 = vmul.f32 3.38, %v1446_v54  ;;  %v5107_v8 = vadd.f32 %v1255_v12, %v1159_v35  ;;  %v5109_v15 = vadd.f32 %v1256_v38, %v1160_v17  ;;  %v5111_v29 = vadd.f32 0.083333336, %v1539_v59 }
  0xee   : > { %v5113_v56 = vadd.f32 0.083333336, %v1540_v50  ;;  %v5118_v21 = vadd.f32 0.083333336, %v1541_v10  ;;  %v5123_v25 = vsub.f32 %v3679_v9, %v5075_v57  ;;  %v5127_v12 = vadd.f32 0.083333336, %v1543_v26 }
  0xef   : > { %v5125_v35 = vadd.f32 0.083333336, %v1542_v1  ;;  %v5129_v38 = vadd.f32 0.083333336, %v1544_v30  ;;  %v5132_v17 = vsub.f32 %v3680_v11, %v5075_v57  ;;  %3826 = vrcp.f32 %v5111_v29 }
  0xf0   : > { %v1994_v13 = vand.u32 2147483648, %v5111_v29  ;;  %v5138_v55 = vsub.f32 %v3681_v48, %v5075_v57  ;;  %v1992_v50 = vand.u32 2147483647, %v5111_v29  ;;  %3828 = vrcp.f32 %v5113_v56 }
  0xf1   : > { %v2008_v10 = vand.u32 2147483648, %v5113_v56  ;;  %v2006_v1 = vand.u32 2147483647, %v5113_v56  ;;  %3830 = vrcp.f32 %v5118_v21  ;;  %vm1988_vm0 = vweird.f32 %v5111_v29 }
  0xf2   : > { %vm2002_vm1 = vweird.f32 %v5113_v56  ;;  %v2020_v48 = vand.u32 2147483647, %v5118_v21  ;;  %v2022_v26 = vand.u32 2147483648, %v5118_v21  ;;  %v5152_v30 = vor.u32 1.1754944e-38, %v1994_v13 }
  0xf3   : > { %vm2016_vm2 = vweird.f32 %v5118_v21  ;;  %3832 = vrcp.f32 %v5125_v35  ;;  %v2036_v11 = vand.u32 2147483648, %v5125_v35  ;;  %vm5157_vm3 = vcmp.eq.f32.partialorder %v1992_v50, 8.507059e+37 }
  0xf4   : > { %v5161_v59 = vor.u32 1.1754944e-38, %v2008_v10  ;;  %v2034_v54 = vand.u32 2147483647, %v5125_v35  ;;  %3834 = vrcp.f32 %v5127_v12  ;;  %vm5166_vm5 = vcmp.eq.f32.partialorder %v2006_v1, 8.507059e+37 }
  0xf5   : > { %v3827_v13 = vpop.eup %3826  ;;  %v5170_v36 = vor.u32 1.1754944e-38, %v2022_v26  ;;  %v2048_v50 = vand.u32 2147483647, %v5127_v12  ;;  %v2050_v10 = vand.u32 2147483648, %v5127_v12  ;;  %vm5176_vm8 = vcmp.eq.f32.partialorder %v2020_v48, 8.507059e+37  ;;  %v3682_v26 = vld [vmem:[%s8557_s0 + $0x538] sm:$0xff] }
  0xf6   : > { %v3829_v61 = vpop.eup %3828  ;;  %v1984_v19 = vmul.f32 %v3827_v13, %v5111_v29  ;;  %vm1989_vm7 = vweird.f32 %v3827_v13  ;;  %v5180_v1 = vor.u32 1.1754944e-38, %v2036_v11  ;;  %3836 = vrcp.f32 %v5129_v38 }
  0xf7   : > { %v3831_v16 = vpop.eup %3830  ;;  %v1998_v42 = vmul.f32 %v3829_v61, %v5113_v56  ;;  %vm2003_vm9 = vweird.f32 %v3829_v61  ;;  %v5187_v32 = vor.u32 1.1754944e-38, %v2050_v10  ;;  %vm5191_vm12 = vcmp.eq.f32.partialorder %v2034_v54, 8.507059e+37  ;;  %vm5212_vm15 = vmor %vm1988_vm0, %vm1989_vm7 }
  0xf8   : > { %v1985_v48 = vsub.f32 1.0, %v1984_v19  ;;  %v2012_v31 = vmul.f32 %v3831_v16, %v5118_v21  ;;  %vm2017_vm11 = vweird.f32 %v3831_v16  ;;  %v2062_v63 = vand.u32 2147483647, %v5129_v38  ;;  %vm5224_vm4 = vmor %vm2002_vm1, %vm2003_vm9 }
  0xf9   : > { %v3833_v33 = vpop.eup %3832  ;;  %v1999_v60 = vsub.f32 1.0, %v1998_v42  ;;  %vm5196_vm13 = vcmp.eq.f32.partialorder %v2048_v50, 8.507059e+37  ;;  %v2064_v10 = vand.u32 2147483648, %v5129_v38  ;;  %v5202_v58 = vsub.f32 %v3682_v26, %v5075_v57  ;;  %vm5231_vm0 = vmor %vm2016_vm2, %vm2017_vm11 }
  0xfa   : > { %v5206_v19 = vmul.f32 %v5092_v49, %v5092_v49  ;;  %v3835_v54 = vpop.eup %3834  ;;  %v1986_v53 = vmul.f32 %v3827_v13, %v1985_v48  ;;  %v2013_v43 = vsub.f32 1.0, %v2012_v31  ;;  %v2026_v6 = vmul.f32 %v3833_v33, %v5125_v35 }
  0xfb   : > { %vm2031_vm14 = vweird.f32 %v3833_v33  ;;  %v2000_v50 = vmul.f32 %v3829_v61, %v1999_v60  ;;  %v2040_v57 = vmul.f32 %v3835_v54, %v5127_v12  ;;  %vm2045_vm10 = vweird.f32 %v3835_v54 }
  0xfc   : > { %vm5217_vm6 = vcmp.eq.f32.partialorder %v2062_v63, 8.507059e+37  ;;  %v3837_v26 = vpop.eup %3836  ;;  %v1987_v31 = vadd.f32 %v3827_v13, %v1986_v53  ;;  %v2014_v29 = vmul.f32 %v3831_v16, %v2013_v43  ;;  %v2027_v4 = vsub.f32 1.0, %v2026_v6 }
  0xfd   : > { %v2065_v51 = vor.u32 1.1754944e-38, %v2064_v10  ;;  %v2001_v60 = vadd.f32 %v3829_v61, %v2000_v50  ;;  %v2041_v52 = vsub.f32 1.0, %v2040_v57  ;;  %v2054_v53 = vmul.f32 %v3837_v26, %v5129_v38  ;;  %v3656_v10 = vld [vmem:[%s8557_s0 + $0x468] sm:$0xff] }
  0xfe   : > { %vm2059_vm7 = vweird.f32 %v3837_v26  ;;  %v1991_v56 = vsel %vm5212_vm15, %v3827_v13, %v1987_v31  ;;  %v2015_v2 = vadd.f32 %v3831_v16, %v2014_v29  ;;  %v2028_v46 = vmul.f32 %v3833_v33, %v2027_v4 }
  0xff   : > { %v1114_v6 = vmul.f32 %v5103_v7, %v5103_v7  ;;  %v1996_v43 = vsel %vm5157_vm3, %v5152_v30, %v1991_v56  ;;  %v2005_v21 = vsel %vm5224_vm4, %v3829_v61, %v2001_v60  ;;  %vm8665_vm1 = vweird.f32 %v5125_v35 }
 0x100   : > { %vm5248_vm2 = vmor %vm8665_vm1, %vm2031_vm14  ;;  %v2042_v13 = vmul.f32 %v3835_v54, %v2041_v52  ;;  %v2055_v42 = vsub.f32 1.0, %v2054_v53  ;;  %v2010_v4 = vsel %vm5166_vm5, %v5161_v59, %v2005_v21  ;;  %v2019_v7 = vsel %vm5231_vm0, %v3831_v16, %v2015_v2  ;;  %v809_v21 = vpop.permute.xlu2 %808 }
 0x101   : > { %v2029_v9 = vadd.f32 %v3833_v33, %v2028_v46  ;;  %vm8668_vm3 = vweird.f32 %v5127_v12  ;;  %v8671_v35 = vsub.f32 0.0, %v5087_v24  ;;  %v2024_v23 = vsel %vm5176_vm8, %v5170_v36, %v2019_v7 }
 0x102   : > { %vm5260_vm4 = vmor %vm8668_vm3, %vm2045_vm10  ;;  %v2043_v59 = vadd.f32 %v3835_v54, %v2042_v13  ;;  %v2056_v30 = vmul.f32 %v3837_v26, %v2055_v42  ;;  %v8672_v2 = vsub.f32 0.0, %v5089_v28  ;;  %vm8673_vm5 = vweird.f32 %v5129_v38  ;;  %v3658_v13 = vld [vmem:[%s8557_s0 + $0x478] sm:$0xff] }
 0x103   : > { %v3171_v52 = vmul.f32 %v1996_v43, %v8671_v35  ;;  %v2033_v46 = vsel %vm5248_vm2, %v3833_v33, %v2029_v9  ;;  %vm5276_vm9 = vmor %vm8673_vm5, %vm2059_vm7  ;;  %v8676_v24 = vsub.f32 0.0, %v5094_v0  ;;  %v1115_v36 = vmul.f32 %v5123_v25, %v5123_v25  ;;  %v8689_v9 = vld [vmem:[#allocation14_spill] sm:$0xff] }
 0x104   : > { %v3172_v16 = vmul.f32 %v2010_v4, %v8672_v2  ;;  %v2038_v28 = vsel %vm5191_vm12, %v5180_v1, %v2033_v46  ;;  %v2047_v33 = vsel %vm5260_vm4, %v3835_v54, %v2043_v59  ;;  %v2057_v57 = vadd.f32 %v3837_v26, %v2056_v30  ;;  %v8687_v4 = vld [vmem:[#allocation13_spill] sm:$0xff]  ;;  %v3732_v2 = vld [vmem:[%s8557_s0 + $0x6c8] sm:$0xff] }
 0x105   : > { %v3173_v50 = vmul.f32 %v2024_v23, %v8676_v24  ;;  %v3279_v62 = vmul.f32 1.442695, %v3171_v52  ;;  %v2052_v31 = vsel %vm5196_vm13, %v5187_v32, %v2047_v33  ;;  %v8677_v0 = vsub.f32 0.0, %v5105_v34  ;;  %v8691_v24 = vld [vmem:[#allocation21_spill] sm:$0xff] }
 0x106   : > { %v3281_v38 = vmul.f32 1.442695, %v3172_v16  ;;  %v2061_v25 = vsel %vm5276_vm9, %v3837_v26, %v2057_v57  ;;  %v8678_v1 = vsub.f32 0.0, %v5107_v8  ;;  %v1116_v54 = vmul.f32 %v5132_v17, %v5132_v17  ;;  %v8680_v26 = vld [vmem:[#allocation9_spill] sm:$0xff] }
 0x107   : > { %v3174_v48 = vmul.f32 %v2038_v28, %v8677_v0  ;;  %3838 = vpow2.f32 %v3279_v62  ;;  %v3283_v29 = vmul.f32 1.442695, %v3173_v50  ;;  %v2066_v60 = vsel %vm5217_vm6, %v2065_v51, %v2061_v25  ;;  %v3655_v51 = vld [vmem:[%s8557_s0 + $0x460] sm:$0xff] }
 0x108   : > { %v3175_v11 = vmul.f32 %v2052_v31, %v8678_v1  ;;  %3840 = vpow2.f32 %v3281_v38  ;;  %v1117_v32 = vmul.f32 %v5138_v55, %v5138_v55  ;;  %v8679_v34 = vsub.f32 0.0, %v5109_v15  ;;  %v8681_v15 = vld [vmem:[#allocation10_spill] sm:$0xff]  ;;  %v8683_v55 = vld [vmem:[#allocation11_spill] sm:$0xff] }
 0x109   : > { %3842 = vpow2.f32 %v3283_v29  ;;  %v3285_v18 = vmul.f32 1.442695, %v3174_v48  ;;  %v1118_v8 = vmul.f32 %v5202_v58, %v5202_v58  ;;  %v5311_v56 = vadd.f32 %v5206_v19, %v8680_v26  ;;  %v8685_v58 = vld [vmem:[#allocation12_spill] sm:$0xff]  ;;  %v3731_v19 = vld [vmem:[%s8557_s0 + $0x6c0] sm:$0xff]  ;;  %v8692_v48 = vld [vmem:[#allocation49_spill] sm:$0xff] }
 0x10a   : > { %v3176_v63 = vmul.f32 %v2066_v60, %v8679_v34  ;;  %v3287_v53 = vmul.f32 1.442695, %v3175_v11  ;;  %v5322_v17 = vadd.f32 %v1114_v6, %v8681_v15  ;;  %v5325_v49 = vadd.f32 %v1115_v36, %v8683_v55  ;;  %v3657_v6 = vld [vmem:[%s8557_s0 + $0x470] sm:$0xff] }
 0x10b   : > { %3844 = vpow2.f32 %v3285_v18  ;;  %v5328_v43 = vadd.f32 %v1116_v54, %v8685_v58  ;;  %v5343_v7 = vadd.f32 %v1117_v32, %v8687_v4  ;;  %v5346_v61 = vadd.f32 %v1118_v8, %v8689_v9  ;;  %v8693_v8 = vld [vmem:[#allocation50_spill] sm:$0xff]  ;;  %v5415_v4 = vpop.permute.xlu0 %672  ;;  %v8696_v9 = vld [vmem:[#allocation15_spill] sm:$0xff] }
 0x10c   : > { %8682 = vst [vmem:[#allocation22_spill] sm:$0xff] %v5322_v17  ;;  %3846 = vpow2.f32 %v3287_v53  ;;  %v3289_v42 = vmul.f32 1.442695, %v3176_v63  ;;  %v1052_v52 = vmul.f32 %v5032_v37, %v5032_v37  ;;  %v5352_v23 = vadd.f32 %v5034_v20, %v4819_v3  ;;  %v3733_v37 = vld [vmem:[%s8557_s0 + $0x6d0] sm:$0xff]  ;;  %v3735_v20 = vld [vmem:[%s8557_s0 + $0x6e0] sm:$0xff] }
 0x10d   : > { %8684 = vst [vmem:[#allocation9_spill] sm:$0xff] %v5325_v49  ;;  %v3839_v35 = vpop.eup %3838  ;;  %v5356_v59 = vadd.f32 %v5036_v22, %v4834_v40  ;;  %v5360_v30 = vadd.f32 %v5044_v27, %v4838_v41  ;;  %v5370_v3 = vadd.f32 %v5055_v44, %v4842_v5  ;;  %v5374_v40 = vadd.f32 %v5057_v39, %v4846_v47  ;;  %v3734_v41 = vld [vmem:[%s8557_s0 + $0x6d8] sm:$0xff]  ;;  %v3736_v5 = vld [vmem:[%s8557_s0 + $0x6e8] sm:$0xff] }
 0x10e   : > { %8686 = vst [vmem:[#allocation10_spill] sm:$0xff] %v5328_v43  ;;  %v3841_v16 = vpop.eup %3840  ;;  %3848 = vpow2.f32 %v3289_v42  ;;  %v879_v22 = vsub.f32 %v3731_v19, %v809_v21  ;;  %v739_v44 = vsub.f32 %v3655_v51, %v5068_v14  ;;  %v740_v47 = vsub.f32 %v3656_v10, %v5068_v14  ;;  %v8694_v51 = vld [vmem:[#allocation51_spill] sm:$0xff]  ;;  %v3671_v42 = vld [vmem:[%s8557_s0 + $0x4e0] sm:$0xff] }
 0x10f   : > { %8688 = vst [vmem:[#allocation11_spill] sm:$0xff] %v5343_v7  ;;  %v3843_v27 = vpop.eup %3842  ;;  %v741_v39 = vsub.f32 %v3657_v6, %v5068_v14  ;;  %v742_v46 = vsub.f32 %v3658_v13, %v5068_v14  ;;  %v1089_v12 = vmul.f32 %v5079_v45, %v5079_v45  ;;  %v1090_v50 = vmul.f32 %v8691_v24, %v8691_v24  ;;  %v8695_v6 = vld [vmem:[#allocation52_spill] sm:$0xff] }
 0x110   : > { %8690 = vst [vmem:[#allocation12_spill] sm:$0xff] %v5346_v61  ;;  %v880_v62 = vsub.f32 %v3732_v2, %v809_v21  ;;  %v881_v36 = vsub.f32 %v3733_v37, %v809_v21  ;;  %v882_v33 = vsub.f32 %v3734_v41, %v809_v21  ;;  %v883_v57 = vsub.f32 %v3735_v20, %v809_v21  ;;  %v8697_v37 = vld [vmem:[#allocation53_spill] sm:$0xff]  ;;  %v8698_v41 = vld [vmem:[#allocation16_spill] sm:$0xff] }
 0x111   : > { %3460 = vst [vmem:[%s5316_s18 + $0x60] sm:$0xff] %v3839_v35  ;;  %v3845_v28 = vpop.eup %3844  ;;  %v884_v38 = vsub.f32 %v3736_v5, %v809_v21  ;;  %v1167_v31 = vmul.f32 %v879_v22, %v879_v22  ;;  %v5397_v29 = vadd.f32 %v1052_v52, %v8692_v48  ;;  %vm8565_vm6 = vcmask 433152  }
 0x112   : > { %3461 = vst [vmem:[%s5316_s18 + $0x68] sm:$0xff] %v3841_v16  ;;  %v3847_v0 = vpop.eup %3846  ;;  %v1168_v14 = vmul.f32 %v880_v62, %v880_v62  ;;  %v1169_v45 = vmul.f32 %v881_v36, %v881_v36  ;;  %v1091_v25 = vmul.f32 %v739_v44, %v739_v44  ;;  %v1170_v1 = vmul.f32 %v882_v33, %v882_v33  ;;  %v8701_v62 = vld [vmem:[#allocation17_spill] sm:$0xff]  ;;  %v8702_v33 = vld [vmem:[#allocation18_spill] sm:$0xff] }
 0x113   : > { %3462 = vst [vmem:[%s5316_s18 + $0x70] sm:$0xff] %v3843_v27  ;;  %v1171_v11 = vmul.f32 %v883_v57, %v883_v57  ;;  %v1172_v54 = vmul.f32 %v884_v38, %v884_v38  ;;  %v1092_v18 = vmul.f32 %v740_v47, %v740_v47  ;;  %v1093_v32 = vmul.f32 %v741_v39, %v741_v39  ;;  %v8699_v27 = vld [vmem:[#allocation54_spill] sm:$0xff]  ;;  %v8703_v38 = vld [vmem:[#allocation19_spill] sm:$0xff] }
 0x114   : > { %3463 = vst [vmem:[%s5316_s18 + $0x78] sm:$0xff] %v3845_v28  ;;  %v3849_v60 = vpop.eup %3848  ;;  %v1455_v34 = vmul.f32 %v1167_v31, %v1167_v31  ;;  %v1456_v63 = vmul.f32 %v1168_v14, %v1168_v14  ;;  %v1094_v53 = vmul.f32 %v742_v46, %v742_v46  ;;  %v5402_v26 = vadd.f32 %v1089_v12, %v8693_v8  ;;  %v8700_v12 = vld [vmem:[#allocation55_spill] sm:$0xff] }
 0x115   : > { %3464 = vst [vmem:[%s5316_s18 + $0x80] sm:$0xff] %v3847_v0  ;;  %v5405_v15 = vadd.f32 %v1090_v50, %v8694_v51  ;;  %v1457_v55 = vmul.f32 %v1169_v45, %v1169_v45  ;;  %v1458_v58 = vmul.f32 %v1170_v1, %v1170_v1  ;;  %v1459_v19 = vmul.f32 %v1171_v11, %v1171_v11  ;;  %v8704_v0 = vld [vmem:[#allocation20_spill] sm:$0xff] }
 0x116   : > { %3465 = vst.msk [vmem:[%s5316_s18 + $0x88] sm:$0xff] %vm8565_vm6, %v3849_v60  ;;  %v1460_v21 = vmul.f32 %v1172_v54, %v1172_v54  ;;  %v1551_v10 = vmul.f32 3.38, %v1455_v34  ;;  %v5410_v13 = vadd.f32 %v1091_v25, %v8695_v6  ;;  %v5418_v35 = vadd.f32 %v8696_v9, %v1167_v31 }
 0x117   : > { %v1552_v52 = vmul.f32 3.38, %v1456_v63  ;;  %v1553_v2 = vmul.f32 3.38, %v1457_v55  ;;  %v5421_v16 = vadd.f32 %v1092_v18, %v8697_v37  ;;  %v5424_v20 = vadd.f32 %v8698_v41, %v1168_v14 }
 0x118   : > { %v1554_v5 = vmul.f32 3.38, %v1458_v58  ;;  %v1555_v22 = vmul.f32 3.38, %v1459_v19  ;;  %v5427_v44 = vadd.f32 %v1093_v32, %v8699_v27  ;;  %v1556_v47 = vmul.f32 3.38, %v1460_v21 }
 0x119   : > { %v5429_v39 = vadd.f32 0.083333336, %v1551_v10  ;;  %v5431_v46 = vadd.f32 0.083333336, %v1552_v52  ;;  %v5434_v24 = vadd.f32 %v1094_v53, %v8700_v12  ;;  %v5437_v50 = vsub.f32 %v3671_v42, %v5415_v4 }
 0x11a   : > { %v5440_v36 = vadd.f32 %v8701_v62, %v1169_v45  ;;  %v5442_v28 = vadd.f32 0.083333336, %v1553_v2  ;;  %v5445_v57 = vadd.f32 %v8702_v33, %v1170_v1  ;;  %v5448_v31 = vadd.f32 %v8703_v38, %v1171_v11  ;;  %v821_v33 = vpop.permute.xlu2 %820  ;;  %v3674_v45 = vld [vmem:[%s8557_s0 + $0x4f8] sm:$0xff] }
 0x11b   : > { %v5451_v48 = vadd.f32 %v8704_v0, %v1172_v54  ;;  %v5454_v25 = vadd.f32 0.083333336, %v1554_v5  ;;  %v5456_v60 = vadd.f32 0.083333336, %v1555_v22  ;;  %3850 = vrcp.f32 %v5429_v39 }
 0x11c   : > { %v5460_v18 = vadd.f32 0.083333336, %v1556_v47  ;;  %v2160_v1 = vand.u32 2147483647, %v5429_v39  ;;  %v2162_v11 = vand.u32 2147483648, %v5429_v39  ;;  %3852 = vrcp.f32 %v5431_v46 }
 0x11d   : > { %v2174_v32 = vand.u32 2147483647, %v5431_v46  ;;  %v2176_v34 = vand.u32 2147483648, %v5431_v46  ;;  %3854 = vrcp.f32 %v5442_v28  ;;  %v2188_v8 = vand.u32 2147483647, %v5442_v28 }
 0x11e   : > { %v2190_v51 = vand.u32 2147483648, %v5442_v28  ;;  %vm2156_vm8 = vweird.f32 %v5429_v39  ;;  %vm2170_vm10 = vweird.f32 %v5431_v46  ;;  %3856 = vrcp.f32 %v5454_v25 }
 0x11f   : > { %v2204_v55 = vand.u32 2147483648, %v5454_v25  ;;  %vm5477_vm11 = vcmp.eq.f32.partialorder %v2160_v1, 8.507059e+37  ;;  %v2163_v19 = vor.u32 1.1754944e-38, %v2162_v11  ;;  %vm2184_vm12 = vweird.f32 %v5442_v28  ;;  %v3751_v1 = vld [vmem:[%s8557_s0 + $0x760] sm:$0xff] }
 0x120   : > { %v2202_v21 = vand.u32 2147483647, %v5454_v25  ;;  %3858 = vrcp.f32 %v5456_v60  ;;  %vm5484_vm13 = vcmp.eq.f32.partialorder %v2174_v32, 8.507059e+37  ;;  %v2177_v42 = vor.u32 1.1754944e-38, %v2176_v34 }
 0x121   : > { %v3851_v10 = vpop.eup %3850  ;;  %vm2198_vm14 = vweird.f32 %v5454_v25  ;;  %v2216_v9 = vand.u32 2147483647, %v5456_v60  ;;  %v2218_v52 = vand.u32 2147483648, %v5456_v60  ;;  %vm5492_vm15 = vcmp.eq.f32.partialorder %v2188_v8, 8.507059e+37 }
 0x122   : > { %v3853_v2 = vpop.eup %3852  ;;  %v2152_v37 = vmul.f32 %v3851_v10, %v5429_v39  ;;  %v2191_v5 = vor.u32 1.1754944e-38, %v2190_v51  ;;  %3860 = vrcp.f32 %v5460_v18  ;;  %vm2157_vm0 = vweird.f32 %v3851_v10 }
 0x123   : > { %v3855_v22 = vpop.eup %3854  ;;  %v2166_v27 = vmul.f32 %v3853_v2, %v5431_v46  ;;  %v2205_v47 = vor.u32 1.1754944e-38, %v2204_v55  ;;  %vm2171_vm1 = vweird.f32 %v3853_v2  ;;  %vm5500_vm2 = vcmp.eq.f32.partialorder %v2202_v21, 8.507059e+37  ;;  %vm5514_vm9 = vmor %vm2156_vm8, %vm2157_vm0  ;;  %v5551_v21 = vpop.permute.xlu0 %684 }
 0x124   : > { %v2153_v12 = vsub.f32 1.0, %v2152_v37  ;;  %v2180_v62 = vmul.f32 %v3855_v22, %v5442_v28  ;;  %v3857_v38 = vpop.eup %3856  ;;  %vm5505_vm4 = vcmp.eq.f32.partialorder %v2216_v9, 8.507059e+37  ;;  %v2219_v11 = vor.u32 1.1754944e-38, %v2218_v52  ;;  %vm5523_vm3 = vmor %vm2170_vm10, %vm2171_vm1 }
 0x125   : > { %v2167_v0 = vsub.f32 1.0, %v2166_v27  ;;  %v2230_v32 = vand.u32 2147483647, %v5460_v18  ;;  %vm2185_vm5 = vweird.f32 %v3855_v22  ;;  %v2194_v55 = vmul.f32 %v3857_v38, %v5454_v25 }
 0x126   : > { %v3859_v34 = vpop.eup %3858  ;;  %v2154_v8 = vmul.f32 %v3851_v10, %v2153_v12  ;;  %v2181_v51 = vsub.f32 1.0, %v2180_v62  ;;  %vm2199_vm6 = vweird.f32 %v3857_v38  ;;  %v2232_v52 = vand.u32 2147483648, %v5460_v18  ;;  %vm5529_vm0 = vmor %vm2184_vm12, %vm2185_vm5 }
 0x127   : > { %v2168_v9 = vmul.f32 %v3853_v2, %v2167_v0  ;;  %v2208_v37 = vmul.f32 %v3859_v34, %v5456_v60  ;;  %v2195_v62 = vsub.f32 1.0, %v2194_v55  ;;  %vm2213_vm8 = vweird.f32 %v3859_v34  ;;  %vm5547_vm12 = vmor %vm2198_vm14, %vm2199_vm6 }
 0x128   : > { %v3861_v27 = vpop.eup %3860  ;;  %v2155_v53 = vadd.f32 %v3851_v10, %v2154_v8  ;;  %v2182_v39 = vmul.f32 %v3855_v22, %v2181_v51  ;;  %vm5534_vm7 = vcmp.eq.f32.partialorder %v2230_v32, 8.507059e+37  ;;  %vm8730_vm6 = vweird.f32 %v5460_v18  ;;  %v3754_v32 = vld [vmem:[%s8557_s0 + $0x778] sm:$0xff] }
 0x129   : > { %v2169_v63 = vadd.f32 %v3853_v2, %v2168_v9  ;;  %v2209_v54 = vsub.f32 1.0, %v2208_v37  ;;  %v2222_v8 = vmul.f32 %v3861_v27, %v5460_v18  ;;  %v2196_v55 = vmul.f32 %v3857_v38, %v2195_v62 }
 0x12a   : > { %v2159_v46 = vsel %vm5514_vm9, %v3851_v10, %v2155_v53  ;;  %v2183_v51 = vadd.f32 %v3855_v22, %v2182_v39  ;;  %vm2227_vm10 = vweird.f32 %v3861_v27  ;;  %v8733_v39 = vsub.f32 0.0, %v5440_v36 }
 0x12b   : > { %v2164_v28 = vsel %vm5477_vm11, %v2163_v19, %v2159_v46  ;;  %v2173_v9 = vsel %vm5523_vm3, %v3853_v2, %v2169_v63  ;;  %v2210_v37 = vmul.f32 %v3859_v34, %v2209_v54  ;;  %v2223_v14 = vsub.f32 1.0, %v2222_v8 }
 0x12c   : > { %v2178_v53 = vsel %vm5484_vm13, %v2177_v42, %v2173_v9  ;;  %v2187_v58 = vsel %vm5529_vm0, %v3855_v22, %v2183_v51  ;;  %v2197_v19 = vadd.f32 %v3857_v38, %v2196_v55  ;;  %vm8725_vm11 = vweird.f32 %v5456_v60  ;;  %vm5575_vm13 = vmor %vm8730_vm6, %vm2227_vm10  ;;  %v3753_v9 = vld [vmem:[%s8557_s0 + $0x770] sm:$0xff] }
 0x12d   : > { %vm5560_vm1 = vmor %vm8725_vm11, %vm2213_vm8  ;;  %v8728_v63 = vsub.f32 0.0, %v5418_v35  ;;  %v2192_v10 = vsel %vm5492_vm15, %v2191_v5, %v2187_v58  ;;  %v2211_v2 = vadd.f32 %v3859_v34, %v2210_v37  ;;  %v2224_v6 = vmul.f32 %v3861_v27, %v2223_v14 }
 0x12e   : > { %v8729_v42 = vsub.f32 0.0, %v5424_v20  ;;  %v2201_v22 = vsel %vm5547_vm12, %v3857_v38, %v2197_v19  ;;  %v2233_v35 = vor.u32 1.1754944e-38, %v2232_v52  ;;  %v3185_v41 = vmul.f32 %v2192_v10, %v8733_v39  ;;  %v3672_v20 = vld [vmem:[%s8557_s0 + $0x4e8] sm:$0xff]  ;;  %v3673_v52 = vld [vmem:[%s8557_s0 + $0x4f0] sm:$0xff]  ;;  %v3675_v10 = vld [vmem:[%s8557_s0 + $0x500] sm:$0xff] }
 0x12f   : > { %v3183_v54 = vmul.f32 %v2164_v28, %v8728_v63  ;;  %v2206_v14 = vsel %vm5500_vm2, %v2205_v47, %v2201_v22  ;;  %v2215_v38 = vsel %vm5560_vm1, %v3859_v34, %v2211_v2  ;;  %v2225_v18 = vadd.f32 %v3861_v27, %v2224_v6  ;;  %v3749_v47 = vld [vmem:[%s8557_s0 + $0x750] sm:$0xff]  ;;  %v3676_v2 = vld [vmem:[%s8557_s0 + $0x508] sm:$0xff] }
 0x130   : > { %v3184_v12 = vmul.f32 %v2178_v53, %v8729_v42  ;;  %v2220_v36 = vsel %vm5505_vm4, %v2219_v11, %v2215_v38  ;;  %v8734_v0 = vsub.f32 0.0, %v5445_v57  ;;  %v3307_v46 = vmul.f32 1.442695, %v3185_v41  ;;  %v3750_v57 = vld [vmem:[%s8557_s0 + $0x758] sm:$0xff]  ;;  %v3752_v11 = vld [vmem:[%s8557_s0 + $0x768] sm:$0xff] }
 0x131   : > { %v3303_v5 = vmul.f32 1.442695, %v3183_v54  ;;  %v1748_v34 = vsub.f32 0.0, %v5451_v48  ;;  %v2229_v51 = vsel %vm5575_vm13, %v3861_v27, %v2225_v18  ;;  %v8735_v55 = vsub.f32 0.0, %v5448_v31 }
 0x132   : > { %v3305_v62 = vmul.f32 1.442695, %v3184_v12  ;;  %v3186_v8 = vmul.f32 %v2206_v14, %v8734_v0  ;;  %v756_v48 = vsub.f32 %v3672_v20, %v5415_v4  ;;  %v2234_v27 = vsel %vm5534_vm7, %v2233_v35, %v2229_v51  ;;  %v5636_v20 = vpop.permute.xlu0 %792 }
 0x133   : > { %3862 = vpow2.f32 %v3303_v5  ;;  %v3187_v28 = vmul.f32 %v2220_v36, %v8735_v55  ;;  %v5622_v37 = vsub.f32 %v3673_v52, %v5415_v4  ;;  %v3188_v53 = vmul.f32 %v2234_v27, %v1748_v34  ;;  %v3707_v5 = vld [vmem:[%s8557_s0 + $0x600] sm:$0xff] }
 0x134   : > { %3864 = vpow2.f32 %v3305_v62  ;;  %v3309_v31 = vmul.f32 1.442695, %v3186_v8  ;;  %v897_v19 = vsub.f32 %v3749_v47, %v821_v33  ;;  %v898_v25 = vsub.f32 %v3750_v57, %v821_v33 }
 0x135   : > { %3866 = vpow2.f32 %v3307_v46  ;;  %v3311_v58 = vmul.f32 1.442695, %v3187_v28  ;;  %v899_v63 = vsub.f32 %v3751_v1, %v821_v33  ;;  %v900_v54 = vsub.f32 %v3752_v11, %v821_v33  ;;  %v3708_v1 = vld [vmem:[%s8557_s0 + $0x608] sm:$0xff] }
 0x136   : > { %3868 = vpow2.f32 %v3309_v31  ;;  %v3313_v6 = vmul.f32 1.442695, %v3188_v53  ;;  %v901_v42 = vsub.f32 %v3753_v9, %v821_v33  ;;  %v902_v12 = vsub.f32 %v3754_v32, %v821_v33  ;;  %v3710_v32 = vld [vmem:[%s8557_s0 + $0x618] sm:$0xff] }
 0x137   : > { %3870 = vpow2.f32 %v3311_v58  ;;  %v1185_v60 = vmul.f32 %v897_v19, %v897_v19  ;;  %v1186_v35 = vmul.f32 %v898_v25, %v898_v25  ;;  %v1187_v39 = vmul.f32 %v899_v63, %v899_v63 }
 0x138   : > { %v1188_v41 = vmul.f32 %v900_v54, %v900_v54  ;;  %v5639_v38 = vsub.f32 %v3674_v45, %v5415_v4  ;;  %3872 = vpow2.f32 %v3313_v6  ;;  %v1189_v18 = vmul.f32 %v901_v42, %v901_v42 }
 0x139   : > { %v3863_v22 = vpop.eup %3862  ;;  %v1190_v62 = vmul.f32 %v902_v12, %v902_v12  ;;  %v5643_v36 = vsub.f32 %v3675_v10, %v5415_v4  ;;  %v5646_v0 = vsub.f32 %v3676_v2, %v5415_v4  ;;  %v5650_v8 = vmul.f32 %v5437_v50, %v5437_v50 }
 0x13a   : > { %v3865_v14 = vpop.eup %3864  ;;  %3472 = vst [vmem:[%s5316_s18 + $0xc0] sm:$0xff] %v3863_v22  ;;  %v5652_v46 = vmul.f32 %v756_v48, %v756_v48  ;;  %v5657_v47 = vadd.f32 %v5402_v26, %v1185_v60  ;;  %v1473_v33 = vmul.f32 %v1185_v60, %v1185_v60  ;;  %v1474_v34 = vmul.f32 %v1186_v35, %v1186_v35  ;;  %v3709_v26 = vld [vmem:[%s8557_s0 + $0x610] sm:$0xff] }
 0x13b   : > { %v3867_v52 = vpop.eup %3866  ;;  %3473 = vst [vmem:[%s5316_s18 + $0xc8] sm:$0xff] %v3865_v14  ;;  %v5660_v51 = vsub.f32 %v3707_v5, %v5636_v20  ;;  %v1475_v55 = vmul.f32 %v1187_v39, %v1187_v39  ;;  %v1476_v28 = vmul.f32 %v1188_v41, %v1188_v41  ;;  %v1477_v57 = vmul.f32 %v1189_v18, %v1189_v18 }
 0x13c   : > { %3474 = vst [vmem:[%s5316_s18 + $0xd0] sm:$0xff] %v3867_v52  ;;  %v3869_v4 = vpop.eup %3868  ;;  %v1478_v50 = vmul.f32 %v1190_v62, %v1190_v62  ;;  %v5670_v48 = vadd.f32 %v5405_v15, %v1186_v35  ;;  %v5673_v27 = vadd.f32 %v5410_v13, %v1187_v39  ;;  %v1569_v31 = vmul.f32 3.38, %v1473_v33  ;;  %v3711_v13 = vld [vmem:[%s8557_s0 + $0x620] sm:$0xff] }
 0x13d   : > { %v3871_v11 = vpop.eup %3870  ;;  %3475 = vst [vmem:[%s5316_s18 + $0xd8] sm:$0xff] %v3869_v4  ;;  %v1570_v9 = vmul.f32 3.38, %v1474_v34  ;;  %v5680_v53 = vadd.f32 %v5421_v16, %v1188_v41  ;;  %v5683_v58 = vadd.f32 %v5427_v44, %v1189_v18  ;;  %v1571_v19 = vmul.f32 3.38, %v1475_v55 }
 0x13e   : > { %3476 = vst [vmem:[%s5316_s18 + $0xe0] sm:$0xff] %v3871_v11  ;;  %v1572_v15 = vmul.f32 3.38, %v1476_v28  ;;  %v3873_v45 = vpop.eup %3872  ;;  %v5689_v25 = vadd.f32 %v5434_v24, %v1190_v62  ;;  %v1573_v63 = vmul.f32 3.38, %v1477_v57  ;;  %vm8736_vm14 = vcmask 433152  }
 0x13f   : > { %v1574_v54 = vmul.f32 3.38, %v1478_v50  ;;  %v1665_v10 = vadd.f32 0.083333336, %v1569_v31  ;;  %3477 = vst.msk [vmem:[%s5316_s18 + $0xe8] sm:$0xff] %vm8736_vm14, %v3873_v45  ;;  %v5699_v6 = vsub.f32 %v3708_v1, %v5636_v20  ;;  %v5703_v24 = vsub.f32 %v3709_v26, %v5636_v20 }
 0x140   : > { %v5693_v16 = vadd.f32 0.083333336, %v1570_v9  ;;  %v5695_v2 = vadd.f32 0.083333336, %v1571_v19  ;;  %v5706_v12 = vsub.f32 %v3710_v32, %v5636_v20  ;;  %v5708_v22 = vadd.f32 0.083333336, %v1572_v15 }
 0x141   : > { %3874 = vrcp.f32 %v1665_v10  ;;  %v5710_v60 = vadd.f32 0.083333336, %v1573_v63  ;;  %v5714_v39 = vsub.f32 %v3711_v13, %v5636_v20  ;;  %v5716_v41 = vadd.f32 0.083333336, %v1574_v54 }
 0x142   : > { %v2412_v5 = vand.u32 2147483647, %v1665_v10  ;;  %v2414_v14 = vand.u32 2147483648, %v1665_v10  ;;  %3876 = vrcp.f32 %v5693_v16  ;;  %v2426_v62 = vand.u32 2147483647, %v5693_v16 }
 0x143   : > { %v2428_v52 = vand.u32 2147483648, %v5693_v16  ;;  %3878 = vrcp.f32 %v5695_v2  ;;  %v2440_v4 = vand.u32 2147483647, %v5695_v2  ;;  %v2442_v55 = vand.u32 2147483648, %v5695_v2 }
 0x144   : > { %vm2408_vm15 = vweird.f32 %v1665_v10  ;;  %vm2422_vm7 = vweird.f32 %v5693_v16  ;;  %vm2436_vm2 = vweird.f32 %v5695_v2  ;;  %3880 = vrcp.f32 %v5708_v22 }
 0x145   : > { %vm5730_vm3 = vcmp.eq.f32.partialorder %v2412_v5, 8.507059e+37  ;;  %v2415_v50 = vor.u32 1.1754944e-38, %v2414_v14  ;;  %v2454_v1 = vand.u32 2147483647, %v5708_v22  ;;  %v2456_v26 = vand.u32 2147483648, %v5708_v22 }
 0x146   : > { %vm5736_vm4 = vcmp.eq.f32.partialorder %v2426_v62, 8.507059e+37  ;;  %v2429_v9 = vor.u32 1.1754944e-38, %v2428_v52  ;;  %vm2450_vm5 = vweird.f32 %v5708_v22  ;;  %3882 = vrcp.f32 %v5710_v60 }
 0x147   : > { %v3875_v28 = vpop.eup %3874  ;;  %vm5742_vm8 = vcmp.eq.f32.partialorder %v2440_v4, 8.507059e+37  ;;  %v2443_v15 = vor.u32 1.1754944e-38, %v2442_v55  ;;  %v2468_v13 = vand.u32 2147483647, %v5710_v60  ;;  %v2470_v45 = vand.u32 2147483648, %v5710_v60 }
 0x148   : > { %v2404_v11 = vmul.f32 %v3875_v28, %v1665_v10  ;;  %v3877_v32 = vpop.eup %3876  ;;  %vm2409_vm9 = vweird.f32 %v3875_v28  ;;  %vm2464_vm0 = vweird.f32 %v5710_v60  ;;  %3884 = vrcp.f32 %v5716_v41 }
 0x149   : > { %v3879_v63 = vpop.eup %3878  ;;  %v2418_v5 = vmul.f32 %v3877_v32, %v5693_v16  ;;  %vm2423_vm10 = vweird.f32 %v3877_v32  ;;  %vm5752_vm12 = vcmp.eq.f32.partialorder %v2454_v1, 8.507059e+37  ;;  %v2457_v52 = vor.u32 1.1754944e-38, %v2456_v26  ;;  %vm5759_vm1 = vmor %vm2408_vm15, %vm2409_vm9 }
 0x14a   : > { %v2405_v54 = vsub.f32 1.0, %v2404_v11  ;;  %v2432_v14 = vmul.f32 %v3879_v63, %v5695_v2  ;;  %v3881_v4 = vpop.eup %3880  ;;  %vm2437_vm11 = vweird.f32 %v3879_v63  ;;  %v2482_v11 = vand.u32 2147483647, %v5716_v41  ;;  %vm5775_vm15 = vmor %vm2422_vm7, %vm2423_vm10 }
 0x14b   : > { %v2419_v34 = vsub.f32 1.0, %v2418_v5  ;;  %v2446_v35 = vmul.f32 %v3881_v4, %v5708_v22  ;;  %vm5764_vm6 = vcmp.eq.f32.partialorder %v2468_v13, 8.507059e+37  ;;  %v2471_v26 = vor.u32 1.1754944e-38, %v2470_v45  ;;  %vm5786_vm9 = vmor %vm2436_vm2, %vm2437_vm11 }
 0x14c   : > { %v2406_v55 = vmul.f32 %v3875_v28, %v2405_v54  ;;  %v2433_v18 = vsub.f32 1.0, %v2432_v14  ;;  %v3712_v54 = vld [vmem:[%s8557_s0 + $0x628] sm:$0xff]  ;;  %v3883_v5 = vpop.eup %3882  ;;  %vm2451_vm13 = vweird.f32 %v3881_v4  ;;  %vm2478_vm14 = vweird.f32 %v5716_v41 }
 0x14d   : > { %v2420_v44 = vmul.f32 %v3877_v32, %v2419_v34  ;;  %v2447_v14 = vsub.f32 1.0, %v2446_v35  ;;  %v2460_v45 = vmul.f32 %v3883_v5, %v5710_v60  ;;  %v2484_v61 = vand.u32 2147483648, %v5716_v41  ;;  %vm5802_vm2 = vmor %vm2450_vm5, %vm2451_vm13 }
 0x14e   : > { %v2407_v42 = vadd.f32 %v3875_v28, %v2406_v55  ;;  %v2434_v13 = vmul.f32 %v3879_v63, %v2433_v18  ;;  %v3885_v7 = vpop.eup %3884  ;;  %vm2465_vm7 = vweird.f32 %v3883_v5  ;;  %vm5790_vm10 = vcmp.eq.f32.partialorder %v2482_v11, 8.507059e+37 }
 0x14f   : > { %v2421_v55 = vadd.f32 %v3877_v32, %v2420_v44  ;;  %v860_v35 = vsub.f32 %v3712_v54, %v5636_v20  ;;  %v2461_v44 = vsub.f32 1.0, %v2460_v45  ;;  %v2474_v11 = vmul.f32 %v3885_v7, %v5716_v41 }
 0x150   : > { %v2411_v34 = vsel %vm5759_vm1, %v3875_v28, %v2407_v42  ;;  %v2435_v33 = vadd.f32 %v3879_v63, %v2434_v13  ;;  %v2448_v42 = vmul.f32 %v3881_v4, %v2447_v14  ;;  %vm2479_vm11 = vweird.f32 %v3885_v7 }
 0x151   : > { %v2416_v43 = vsel %vm5730_vm3, %v2415_v50, %v2411_v34  ;;  %v2425_v2 = vsel %vm5775_vm15, %v3877_v32, %v2421_v55  ;;  %v8757_v20 = vsub.f32 0.0, %v5657_v47  ;;  %v2462_v10 = vmul.f32 %v3883_v5, %v2461_v44  ;;  %vm5818_vm3 = vmor %vm2464_vm0, %vm2465_vm7 }
 0x152   : > { %v2430_v50 = vsel %vm5736_vm4, %v2429_v9, %v2425_v2  ;;  %v2439_v54 = vsel %vm5786_vm9, %v3879_v63, %v2435_v33  ;;  %v2449_v32 = vadd.f32 %v3881_v4, %v2448_v42  ;;  %v2475_v47 = vsub.f32 1.0, %v2474_v11  ;;  %vm5835_vm4 = vmor %vm2478_vm14, %vm2479_vm11 }
 0x153   : > { %v3201_v57 = vmul.f32 %v2416_v43, %v8757_v20  ;;  %v2444_v22 = vsel %vm5742_vm8, %v2443_v15, %v2439_v54  ;;  %v8760_v43 = vsub.f32 0.0, %v5670_v48  ;;  %v2463_v14 = vadd.f32 %v3883_v5, %v2462_v10 }
 0x154   : > { %v2453_v63 = vsel %vm5802_vm2, %v3881_v4, %v2449_v32  ;;  %v2485_v45 = vor.u32 1.1754944e-38, %v2484_v61  ;;  %v8761_v19 = vsub.f32 0.0, %v5673_v27  ;;  %v2476_v34 = vmul.f32 %v3885_v7, %v2475_v47  ;;  %v3768_v47 = vld [vmem:[%s8557_s0 + $0x7e8] sm:$0xff] }
 0x155   : > { %v3202_v31 = vmul.f32 %v2430_v50, %v8760_v43  ;;  %v3339_v9 = vmul.f32 1.442695, %v3201_v57  ;;  %v2458_v60 = vsel %vm5752_vm12, %v2457_v52, %v2453_v63  ;;  %v2467_v16 = vsel %vm5818_vm3, %v3883_v5, %v2463_v14 }
 0x156   : > { %v3203_v15 = vmul.f32 %v2444_v22, %v8761_v19  ;;  %v8764_v61 = vsub.f32 0.0, %v5680_v53  ;;  %v1143_v62 = vmul.f32 %v5660_v51, %v5660_v51  ;;  %v2472_v52 = vsel %vm5764_vm6, %v2471_v26, %v2467_v16 }
 0x157   : > { %3886 = vpow2.f32 %v3339_v9  ;;  %v3341_v55 = vmul.f32 1.442695, %v3202_v31  ;;  %v2477_v33 = vadd.f32 %v3885_v7, %v2476_v34  ;;  %v1144_v5 = vmul.f32 %v5699_v6, %v5699_v6 }
 0x158   : > { %v3204_v27 = vmul.f32 %v2458_v60, %v8764_v61  ;;  %v3343_v4 = vmul.f32 1.442695, %v3203_v15  ;;  %v8765_v41 = vsub.f32 0.0, %v5683_v58  ;;  %v1145_v53 = vmul.f32 %v5703_v24, %v5703_v24 }
 0x159   : > { %3888 = vpow2.f32 %v3341_v55  ;;  %v2481_v51 = vsel %vm5835_vm4, %v3885_v7, %v2477_v33  ;;  %v1146_v1 = vmul.f32 %v5706_v12, %v5706_v12  ;;  %v1147_v26 = vmul.f32 %v5714_v39, %v5714_v39 }
 0x15a   : > { %v3205_v42 = vmul.f32 %v2472_v52, %v8765_v41  ;;  %3890 = vpow2.f32 %v3343_v4  ;;  %v3345_v44 = vmul.f32 1.442695, %v3204_v27  ;;  %v1148_v2 = vmul.f32 %v860_v35, %v860_v35 }
 0x15b   : > { %v5859_v58 = vmul.f32 %v5622_v37, %v5622_v37  ;;  %v2486_v6 = vsel %vm5790_vm10, %v2485_v45, %v2481_v51  ;;  %v5865_v7 = vmul.f32 %v5639_v38, %v5639_v38  ;;  %v5869_v12 = vmul.f32 %v5643_v36, %v5643_v36  ;;  %v3767_v36 = vld [vmem:[%s8557_s0 + $0x7e0] sm:$0xff] }
 0x15c   : > { %3892 = vpow2.f32 %v3345_v44  ;;  %v3347_v28 = vmul.f32 1.442695, %v3205_v42  ;;  %v8766_v39 = vsub.f32 0.0, %v5689_v25  ;;  %v5874_v37 = vadd.f32 %v5352_v23, %v1143_v62 }
 0x15d   : > { %v3887_v24 = vpop.eup %3886  ;;  %v1431_v18 = vmul.f32 %v1143_v62, %v1143_v62  ;;  %v1432_v11 = vmul.f32 %v1144_v5, %v1144_v5  ;;  %v1433_v20 = vmul.f32 %v1145_v53, %v1145_v53  ;;  %v1434_v50 = vmul.f32 %v1146_v1, %v1146_v1 }
 0x15e   : > { %v3206_v35 = vmul.f32 %v2486_v6, %v8766_v39  ;;  %3894 = vpow2.f32 %v3347_v28  ;;  %3490 = vst [vmem:[%s5316_s18 + $0x150] sm:$0xff] %v3887_v24  ;;  %v1435_v54 = vmul.f32 %v1147_v26, %v1147_v26  ;;  %v1436_v32 = vmul.f32 %v1148_v2, %v1148_v2 }
 0x15f   : > { %v3889_v57 = vpop.eup %3888  ;;  %v5882_v23 = vadd.f32 %v5356_v59, %v1144_v5  ;;  %v5885_v10 = vadd.f32 %v5360_v30, %v1145_v53  ;;  %v1527_v22 = vmul.f32 3.38, %v1431_v18  ;;  %v1528_v13 = vmul.f32 3.38, %v1432_v11  ;;  %v3769_v59 = vld [vmem:[%s8557_s0 + $0x7f0] sm:$0xff]  ;;  %v5897_v30 = vpop.permute.xlu2 %832 }
 0x160   : > { %v3349_v38 = vmul.f32 1.442695, %v3206_v35  ;;  %v3891_v25 = vpop.eup %3890  ;;  %3491 = vst [vmem:[%s5316_s18 + $0x158] sm:$0xff] %v3889_v57  ;;  %v5892_v43 = vadd.f32 %v5370_v3, %v1146_v1  ;;  %v1529_v31 = vmul.f32 3.38, %v1433_v20  ;;  %v5900_v14 = vadd.f32 %v5374_v40, %v1147_v26 }
 0x161   : > { %3492 = vst [vmem:[%s5316_s18 + $0x160] sm:$0xff] %v3891_v25  ;;  %v1530_v9 = vmul.f32 3.38, %v1434_v50  ;;  %v1531_v45 = vmul.f32 3.38, %v1435_v54  ;;  %v5906_v3 = vadd.f32 %v5397_v29, %v1148_v2  ;;  %v1719_v55 = vsub.f32 0.0, %v5874_v37 }
 0x162   : > { %3896 = vpow2.f32 %v3349_v38  ;;  %v3893_v63 = vpop.eup %3892  ;;  %v1532_v19 = vmul.f32 3.38, %v1436_v32  ;;  %v5902_v15 = vadd.f32 0.083333336, %v1527_v22  ;;  %v5908_v60 = vadd.f32 0.083333336, %v1528_v13 }
 0x163   : > { %3493 = vst [vmem:[%s5316_s18 + $0x168] sm:$0xff] %v3893_v63  ;;  %v5910_v34 = vadd.f32 0.083333336, %v1529_v31  ;;  %v1720_v48 = vsub.f32 0.0, %v5882_v23  ;;  %v5916_v40 = vsub.f32 %v3767_v36, %v5897_v30  ;;  %v5919_v61 = vsub.f32 %v3768_v47, %v5897_v30 }
 0x164   : > { %v3895_v16 = vpop.eup %3894  ;;  %3898 = vrcp.f32 %v5902_v15  ;;  %v5922_v29 = vadd.f32 0.083333336, %v1530_v9  ;;  %v5924_v27 = vadd.f32 0.083333336, %v1531_v45  ;;  %v1721_v4 = vsub.f32 0.0, %v5885_v10 }
 0x165   : > { %3494 = vst [vmem:[%s5316_s18 + $0x170] sm:$0xff] %v3895_v16  ;;  %v5928_v62 = vsub.f32 %v3769_v59, %v5897_v30  ;;  %v5930_v52 = vadd.f32 0.083333336, %v1532_v19  ;;  %v1824_v33 = vand.u32 2147483647, %v5902_v15  ;;  %v1826_v5 = vand.u32 2147483648, %v5902_v15 }
 0x166   : > { %3900 = vrcp.f32 %v5908_v60  ;;  %v1722_v42 = vsub.f32 0.0, %v5892_v43  ;;  %v1838_v44 = vand.u32 2147483647, %v5908_v60  ;;  %v1840_v53 = vand.u32 2147483648, %v5908_v60  ;;  %v3770_v19 = vld [vmem:[%s8557_s0 + $0x7f8] sm:$0xff] }
 0x167   : > { %3902 = vrcp.f32 %v5910_v34  ;;  %vm8767_vm5 = vcmask 433152   ;;  %v1723_v51 = vsub.f32 0.0, %v5900_v14  ;;  %v1724_v1 = vsub.f32 0.0, %v5906_v3 }
 0x168   : > { %v3897_v41 = vpop.eup %3896  ;;  %v1852_v26 = vand.u32 2147483647, %v5910_v34  ;;  %v1854_v2 = vand.u32 2147483648, %v5910_v34  ;;  %vm1820_vm8 = vweird.f32 %v5902_v15  ;;  %vm1834_vm0 = vweird.f32 %v5908_v60 }
 0x169   : > { %3495 = vst.msk [vmem:[%s5316_s18 + $0x178] sm:$0xff] %vm8767_vm5, %v3897_v41  ;;  %vm1848_vm12 = vweird.f32 %v5910_v34  ;;  %3904 = vrcp.f32 %v5922_v29  ;;  %vm5949_vm1 = vcmp.eq.f32.partialorder %v1824_v33, 8.507059e+37  ;;  %v1827_v24 = vor.u32 1.1754944e-38, %v1826_v5 }
 0x16a   : > { %v3899_v6 = vpop.eup %3898  ;;  %v1866_v39 = vand.u32 2147483647, %v5922_v29  ;;  %v1868_v35 = vand.u32 2147483648, %v5922_v29  ;;  %vm5956_vm6 = vcmp.eq.f32.partialorder %v1838_v44, 8.507059e+37  ;;  %v1841_v20 = vor.u32 1.1754944e-38, %v1840_v53 }
 0x16b   : > { %v1816_v18 = vmul.f32 %v3899_v6, %v5902_v15  ;;  %vm1862_vm13 = vweird.f32 %v5922_v29  ;;  %3906 = vrcp.f32 %v5924_v27  ;;  %vm1821_vm14 = vweird.f32 %v3899_v6 }
 0x16c   : > { %v3901_v57 = vpop.eup %3900  ;;  %vm5962_vm15 = vcmp.eq.f32.partialorder %v1852_v26, 8.507059e+37  ;;  %v1855_v50 = vor.u32 1.1754944e-38, %v1854_v2  ;;  %v1880_v54 = vand.u32 2147483647, %v5924_v27  ;;  %v1882_v32 = vand.u32 2147483648, %v5924_v27  ;;  %vm5983_vm11 = vmor %vm1820_vm8, %vm1821_vm14 }
 0x16d   : > { %v3903_v36 = vpop.eup %3902  ;;  %v1817_v25 = vsub.f32 1.0, %v1816_v18  ;;  %v1830_v22 = vmul.f32 %v3901_v57, %v5908_v60  ;;  %vm1876_vm9 = vweird.f32 %v5924_v27  ;;  %3908 = vrcp.f32 %v5930_v52 }
 0x16e   : > { %vm1835_vm7 = vweird.f32 %v3901_v57  ;;  %v1844_v13 = vmul.f32 %v3903_v36, %v5910_v34  ;;  %vm5972_vm10 = vcmp.eq.f32.partialorder %v1866_v39, 8.507059e+37  ;;  %v1869_v31 = vor.u32 1.1754944e-38, %v1868_v35 }
 0x16f   : > { %v3905_v9 = vpop.eup %3904  ;;  %v1818_v59 = vmul.f32 %v3899_v6, %v1817_v25  ;;  %v1831_v63 = vsub.f32 1.0, %v1830_v22  ;;  %vm1849_vm2 = vweird.f32 %v3903_v36  ;;  %v1894_v45 = vand.u32 2147483647, %v5930_v52  ;;  %vm5997_vm8 = vmor %vm1834_vm0, %vm1835_vm7 }
 0x170   : > { %v1845_v33 = vsub.f32 1.0, %v1844_v13  ;;  %v1858_v5 = vmul.f32 %v3905_v9, %v5922_v29  ;;  %vm5988_vm3 = vcmp.eq.f32.partialorder %v1880_v54, 8.507059e+37  ;;  %v1883_v44 = vor.u32 1.1754944e-38, %v1882_v32  ;;  %vm6008_vm14 = vmor %vm1848_vm12, %vm1849_vm2 }
 0x171   : > { %v1896_v53 = vand.u32 2147483648, %v5930_v52  ;;  %v3907_v26 = vpop.eup %3906  ;;  %v1819_v2 = vadd.f32 %v3899_v6, %v1818_v59  ;;  %v1832_v39 = vmul.f32 %v3901_v57, %v1831_v63  ;;  %vm1863_vm4 = vweird.f32 %v3905_v9 }
 0x172   : > { %vm1890_vm5 = vweird.f32 %v5930_v52  ;;  %v1846_v35 = vmul.f32 %v3903_v36, %v1845_v33  ;;  %v1859_v18 = vsub.f32 1.0, %v1858_v5  ;;  %v1872_v54 = vmul.f32 %v3907_v26, %v5924_v27  ;;  %vm6023_vm12 = vmor %vm1862_vm13, %vm1863_vm4 }
 0x173   : > { %v918_v32 = vsub.f32 %v3770_v19, %v5897_v30  ;;  %v3909_v25 = vpop.eup %3908  ;;  %v1823_v22 = vsel %vm5983_vm11, %v3899_v6, %v1819_v2  ;;  %v1833_v13 = vadd.f32 %v3901_v57, %v1832_v39  ;;  %vm1877_vm0 = vweird.f32 %v3907_v26 }
 0x174   : > { %vm6012_vm7 = vcmp.eq.f32.partialorder %v1894_v45, 8.507059e+37  ;;  %v1897_v63 = vor.u32 1.1754944e-38, %v1896_v53  ;;  %v1828_v19 = vsel %vm5949_vm1, %v1827_v24, %v1823_v22  ;;  %v1847_v33 = vadd.f32 %v3903_v36, %v1846_v35  ;;  %v3771_v24 = vld [vmem:[%s8557_s0 + $0x800] sm:$0xff]  ;;  %vm6042_vm1 = vmor %vm1876_vm9, %vm1877_vm0 }
 0x175   : > { %v1860_v16 = vmul.f32 %v3905_v9, %v1859_v18  ;;  %v1873_v6 = vsub.f32 1.0, %v1872_v54  ;;  %v1837_v5 = vsel %vm5997_vm8, %v3901_v57, %v1833_v13  ;;  %v1886_v45 = vmul.f32 %v3909_v25, %v5930_v52 }
 0x176   : > { %vm1891_vm2 = vweird.f32 %v3909_v25  ;;  %v3159_v28 = vmul.f32 %v1828_v19, %v1719_v55  ;;  %v1842_v57 = vsel %vm5956_vm6, %v1841_v20, %v1837_v5  ;;  %v1851_v29 = vsel %vm6008_vm14, %v3903_v36, %v1847_v33  ;;  %v3772_v36 = vld [vmem:[%s8557_s0 + $0x808] sm:$0xff]  ;;  %v8794_v33 = vld [vmem:[#allocation60_spill] sm:$0xff] }
 0x177   : > { %v1861_v53 = vadd.f32 %v3905_v9, %v1860_v16  ;;  %v1874_v2 = vmul.f32 %v3907_v26, %v1873_v6  ;;  %v1856_v39 = vsel %vm5962_vm15, %v1855_v50, %v1851_v29  ;;  %v1887_v55 = vsub.f32 1.0, %v1886_v45  ;;  %vm6065_vm6 = vmor %vm1890_vm5, %vm1891_vm2 }
 0x178   : > { %v3160_v11 = vmul.f32 %v1842_v57, %v1720_v48  ;;  %v3255_v20 = vmul.f32 1.442695, %v3159_v28  ;;  %v3161_v27 = vmul.f32 %v1856_v39, %v1721_v4  ;;  %v919_v15 = vsub.f32 %v3771_v24, %v5897_v30  ;;  %v6058_v48 = vpop.permute.xlu1 %688  ;;  %v8797_v39 = vld [vmem:[#allocation65_spill] sm:$0xff] }
 0x179   : > { %v1865_v38 = vsel %vm6023_vm12, %v3905_v9, %v1861_v53  ;;  %v1875_v50 = vadd.f32 %v3907_v26, %v1874_v2  ;;  %v1888_v18 = vmul.f32 %v3909_v25, %v1887_v55  ;;  %8790 = vst [vmem:[#allocation13_spill] sm:$0xff] %v6058_v48  ;;  %v920_v47 = vsub.f32 %v3772_v36, %v5897_v30  ;;  %v3713_v36 = vld [vmem:[%s8557_s0 + $0x630] sm:$0xff] }
 0x17a   : > { %v1870_v35 = vsel %vm5972_vm10, %v1869_v31, %v1865_v38  ;;  %3910 = vpow2.f32 %v3255_v20  ;;  %v3257_v23 = vmul.f32 1.442695, %v3160_v11  ;;  %v3259_v4 = vmul.f32 1.442695, %v3161_v27 }
 0x17b   : > { %v1879_v54 = vsel %vm6042_vm1, %v3907_v26, %v1875_v50  ;;  %v3162_v10 = vmul.f32 %v1870_v35, %v1722_v42  ;;  %v1889_v22 = vadd.f32 %v3909_v25, %v1888_v18  ;;  %v1203_v26 = vmul.f32 %v5916_v40, %v5916_v40  ;;  %v8798_v50 = vld [vmem:[#allocation23_spill] sm:$0xff] }
 0x17c   : > { %v1884_v31 = vsel %vm5988_vm3, %v1883_v44, %v1879_v54  ;;  %3912 = vpow2.f32 %v3257_v23  ;;  %v1204_v43 = vmul.f32 %v5919_v61, %v5919_v61  ;;  %v1205_v30 = vmul.f32 %v5928_v62, %v5928_v62  ;;  %v8793_v61 = vld [vmem:[#allocation56_spill] sm:$0xff]  ;;  %v3714_v23 = vld [vmem:[%s8557_s0 + $0x638] sm:$0xff] }
 0x17d   : > { %v3163_v52 = vmul.f32 %v1884_v31, %v1723_v51  ;;  %3914 = vpow2.f32 %v3259_v4  ;;  %v3261_v13 = vmul.f32 1.442695, %v3162_v10  ;;  %v1893_v42 = vsel %vm6065_vm6, %v3909_v25, %v1889_v22  ;;  %v3715_v31 = vld [vmem:[%s8557_s0 + $0x640] sm:$0xff] }
 0x17e   : > { %v1206_v41 = vmul.f32 %v918_v32, %v918_v32  ;;  %v1207_v44 = vmul.f32 %v919_v15, %v919_v15  ;;  %v1898_v40 = vsel %vm6012_vm7, %v1897_v63, %v1893_v42  ;;  %v1208_v51 = vmul.f32 %v920_v47, %v920_v47  ;;  %v8795_v32 = vld [vmem:[#allocation61_spill] sm:$0xff]  ;;  %v8796_v63 = vld [vmem:[#allocation64_spill] sm:$0xff] }
 0x17f   : > { %3916 = vpow2.f32 %v3261_v13  ;;  %v3263_v14 = vmul.f32 1.442695, %v3163_v52  ;;  %v1112_v19 = vmul.f32 %v5646_v0, %v5646_v0  ;;  %v1299_v25 = vadd.f32 %v5650_v8, %v8793_v61  ;;  %v8799_v15 = vld [vmem:[#allocation68_spill] sm:$0xff] }
 0x180   : > { %v3911_v60 = vpop.eup %3910  ;;  %v1300_v16 = vadd.f32 %v5652_v46, %v8794_v33  ;;  %v3164_v62 = vmul.f32 %v1898_v40, %v1724_v1  ;;  %v1301_v59 = vadd.f32 %v5859_v58, %v8795_v32  ;;  %v1302_v6 = vadd.f32 %v5865_v7, %v8796_v63  ;;  %v231_v46 = vld [vmem:[%s8557_s0 + $0x290] sm:$0xff]  ;;  %v6115_v38 = vpop.permute.xlu1 %796 }
 0x181   : > { %3918 = vpow2.f32 %v3263_v14  ;;  %3447 = vst [vmem:[%s5316_s18] sm:$0xff] %v3911_v60  ;;  %v1491_v0 = vmul.f32 %v1203_v26, %v1203_v26  ;;  %v1492_v45 = vmul.f32 %v1204_v43, %v1204_v43  ;;  %v1493_v8 = vmul.f32 %v1205_v30, %v1205_v30 }
 0x182   : > { %v3913_v5 = vpop.eup %3912  ;;  %v3265_v34 = vmul.f32 1.442695, %v3164_v62  ;;  %v1494_v28 = vmul.f32 %v1206_v41, %v1206_v41  ;;  %v6103_v3 = vadd.f32 %v1299_v25, %v1203_v26  ;;  %v1495_v58 = vmul.f32 %v1207_v44, %v1207_v44 }
 0x183   : > { %v3915_v24 = vpop.eup %3914  ;;  %3448 = vst [vmem:[%s5316_s18 + $0x8] sm:$0xff] %v3913_v5  ;;  %v1496_v1 = vmul.f32 %v1208_v51, %v1208_v51  ;;  %v1587_v7 = vmul.f32 3.38, %v1491_v0  ;;  %v6106_v57 = vadd.f32 %v1300_v16, %v1204_v43  ;;  %v1588_v29 = vmul.f32 3.38, %v1492_v45 }
 0x184   : > { %3920 = vpow2.f32 %v3265_v34  ;;  %3449 = vst [vmem:[%s5316_s18 + $0x10] sm:$0xff] %v3915_v24  ;;  %v1589_v53 = vmul.f32 3.38, %v1493_v8  ;;  %v1303_v37 = vadd.f32 %v5869_v12, %v8797_v39  ;;  %v6110_v55 = vadd.f32 %v1301_v59, %v1205_v30 }
 0x185   : > { %v3917_v2 = vpop.eup %3916  ;;  %v1590_v11 = vmul.f32 3.38, %v1494_v28  ;;  %v1591_v20 = vmul.f32 3.38, %v1495_v58  ;;  %v6118_v27 = vsub.f32 %v231_v46, %v8798_v50  ;;  %v1304_v35 = vadd.f32 %v1112_v19, %v8799_v15  ;;  %v3716_v58 = vld [vmem:[%s8557_s0 + $0x648] sm:$0xff] }
 0x186   : > { %3450 = vst [vmem:[%s5316_s18 + $0x18] sm:$0xff] %v3917_v2  ;;  %v6122_v18 = vadd.f32 0.083333336, %v1587_v7  ;;  %v6124_v12 = vadd.f32 0.083333336, %v1588_v29  ;;  %v6129_v9 = vadd.f32 %v1302_v6, %v1206_v41  ;;  %v6131_v10 = vadd.f32 %v1303_v37, %v1207_v44  ;;  %v3717_v2 = vld [vmem:[%s8557_s0 + $0x650] sm:$0xff] }
 0x187   : > { %v3919_v54 = vpop.eup %3918  ;;  %v1592_v4 = vmul.f32 3.38, %v1496_v1  ;;  %v6133_v47 = vadd.f32 0.083333336, %v1589_v53  ;;  %v6139_v22 = vadd.f32 %v1304_v35, %v1208_v51  ;;  %v1779_v26 = vsub.f32 0.0, %v6103_v3 }
 0x188   : > { %3451 = vst [vmem:[%s5316_s18 + $0x20] sm:$0xff] %v3919_v54  ;;  %v1780_v52 = vsub.f32 0.0, %v6106_v57  ;;  %v6144_v13 = vsub.f32 %v3713_v36, %v6115_v38  ;;  %v6146_v43 = vadd.f32 0.083333336, %v1590_v11  ;;  %v1781_v42 = vsub.f32 0.0, %v6110_v55 }
 0x189   : > { %3922 = vrcp.f32 %v6122_v18  ;;  %v6151_v30 = vsub.f32 %v3714_v23, %v6115_v38  ;;  %v6153_v44 = vadd.f32 0.083333336, %v1591_v20  ;;  %v2666_v40 = vand.u32 2147483648, %v6122_v18 }
 0x18a   : > { %v3921_v41 = vpop.eup %3920  ;;  %3924 = vrcp.f32 %v6124_v12  ;;  %v6158_v14 = vsub.f32 %v3715_v31, %v6115_v38  ;;  %vm8800_vm13 = vcmask 433152   ;;  %v6162_v51 = vadd.f32 0.083333336, %v1592_v4 }
 0x18b   : > { %3453 = vst.msk [vmem:[%s5316_s18 + $0x28] sm:$0xff] %vm8800_vm13, %v3921_v41  ;;  %v1782_v60 = vsub.f32 0.0, %v6129_v9  ;;  %v2680_v19 = vand.u32 2147483648, %v6124_v12  ;;  %3926 = vrcp.f32 %v6133_v47  ;;  %v1783_v61 = vsub.f32 0.0, %v6131_v10 }
 0x18c   : > { %v1784_v25 = vsub.f32 0.0, %v6139_v22  ;;  %v2664_v33 = vand.u32 2147483647, %v6122_v18  ;;  %v2694_v16 = vand.u32 2147483648, %v6133_v47  ;;  %vm2660_vm15 = vweird.f32 %v6122_v18 }
 0x18d   : > { %v2678_v62 = vand.u32 2147483647, %v6124_v12  ;;  %3928 = vrcp.f32 %v6146_v43  ;;  %v2708_v32 = vand.u32 2147483648, %v6146_v43  ;;  %v6175_v59 = vor.u32 1.1754944e-38, %v2666_v40 }
 0x18e   : > { %vm2674_vm9 = vweird.f32 %v6124_v12  ;;  %v2692_v63 = vand.u32 2147483647, %v6133_v47  ;;  %3930 = vrcp.f32 %v6153_v44  ;;  %v6180_v0 = vor.u32 1.1754944e-38, %v2680_v19 }
 0x18f   : > { %v3923_v6 = vpop.eup %3922  ;;  %vm2688_vm10 = vweird.f32 %v6133_v47  ;;  %v2706_v5 = vand.u32 2147483647, %v6146_v43  ;;  %v2722_v34 = vand.u32 2147483648, %v6153_v44  ;;  %vm6186_vm11 = vcmp.eq.f32.partialorder %v2664_v33, 8.507059e+37 }
 0x190   : > { %v3925_v45 = vpop.eup %3924  ;;  %v2656_v8 = vmul.f32 %v3923_v6, %v6122_v18  ;;  %v2695_v24 = vor.u32 1.1754944e-38, %v2694_v16  ;;  %v6191_v46 = vor.u32 1.1754944e-38, %v2708_v32  ;;  %3932 = vrcp.f32 %v6162_v51 }
 0x191   : > { %v3927_v1 = vpop.eup %3926  ;;  %vm2661_vm4 = vweird.f32 %v3923_v6  ;;  %v2670_v7 = vmul.f32 %v3925_v45, %v6124_v12  ;;  %vm2675_vm5 = vweird.f32 %v3925_v45  ;;  %vm6198_vm8 = vcmp.eq.f32.partialorder %v2678_v62, 8.507059e+37 }
 0x192   : > { %v2720_v53 = vand.u32 2147483647, %v6153_v44  ;;  %v2657_v39 = vsub.f32 1.0, %v2656_v8  ;;  %v2684_v37 = vmul.f32 %v3927_v1, %v6133_v47  ;;  %vm2689_vm0 = vweird.f32 %v3927_v1  ;;  %vm2662_vm12 = vmor %vm2660_vm15, %vm2661_vm4 }
 0x193   : > { %vm6208_vm7 = vcmp.eq.f32.partialorder %v2692_v63, 8.507059e+37  ;;  %v2723_v20 = vor.u32 1.1754944e-38, %v2722_v34  ;;  %v3929_v36 = vpop.eup %3928  ;;  %v2671_v15 = vsub.f32 1.0, %v2670_v7  ;;  %v2734_v35 = vand.u32 2147483647, %v6162_v51  ;;  %v3718_v63 = vld [vmem:[%s8557_s0 + $0x658] sm:$0xff]  ;;  %vm2676_vm3 = vmor %vm2674_vm9, %vm2675_vm5 }
 0x194   : > { %v2736_v23 = vand.u32 2147483648, %v6162_v51  ;;  %v6216_v54 = vsub.f32 %v3716_v58, %v6115_v38  ;;  %v3931_v4 = vpop.eup %3930  ;;  %v2658_v31 = vmul.f32 %v3923_v6, %v2657_v39  ;;  %v2685_v41 = vsub.f32 1.0, %v2684_v37  ;;  %vm2690_vm15 = vmor %vm2688_vm10, %vm2689_vm0 }
 0x195   : > { %v2698_v40 = vmul.f32 %v3929_v36, %v6146_v43  ;;  %vm6219_vm2 = vcmp.eq.f32.partialorder %v2706_v5, 8.507059e+37  ;;  %v6224_v33 = vsub.f32 %v3717_v2, %v6115_v38  ;;  %v2672_v16 = vmul.f32 %v3925_v45, %v2671_v15 }
 0x196   : > { %vm2703_vm1 = vweird.f32 %v3929_v36  ;;  %v2712_v62 = vmul.f32 %v3931_v4, %v6153_v44  ;;  %vm6227_vm13 = vcmp.eq.f32.partialorder %v2720_v53, 8.507059e+37  ;;  %v3933_v5 = vpop.eup %3932  ;;  %v2659_v34 = vadd.f32 %v3923_v6, %v2658_v31 }
 0x197   : > { %v2686_v8 = vmul.f32 %v3927_v1, %v2685_v41  ;;  %v2699_v58 = vsub.f32 1.0, %v2698_v40  ;;  %v2737_v7 = vor.u32 1.1754944e-38, %v2736_v23  ;;  %v2673_v2 = vadd.f32 %v3925_v45, %v2672_v16 }
 0x198   : > { %v2713_v39 = vsub.f32 1.0, %v2712_v62  ;;  %v2726_v53 = vmul.f32 %v3933_v5, %v6162_v51  ;;  %vm2731_vm14 = vweird.f32 %v3933_v5  ;;  %vm6238_vm6 = vcmp.eq.f32.partialorder %v2734_v35, 8.507059e+37 }
 0x199   : > { %v2663_v15 = vsel %vm2662_vm12, %v3923_v6, %v2659_v34  ;;  %v2687_v31 = vadd.f32 %v3927_v1, %v2686_v8  ;;  %v2700_v23 = vmul.f32 %v3929_v36, %v2699_v58  ;;  %v866_v41 = vsub.f32 %v3718_v63, %v6115_v38 }
 0x19a   : > { %v2668_v18 = vsel %vm6186_vm11, %v6175_v59, %v2663_v15  ;;  %v2677_v40 = vsel %vm2676_vm3, %v3925_v45, %v2673_v2  ;;  %v2714_v35 = vmul.f32 %v3931_v4, %v2713_v39  ;;  %v2727_v16 = vsub.f32 1.0, %v2726_v53  ;;  %v3689_v2 = vld [vmem:[%s8557_s0 + $0x570] sm:$0xff]  ;;  %v3690_v39 = vld [vmem:[%s8557_s0 + $0x578] sm:$0xff] }
 0x19b   : > { %v2682_v12 = vsel %vm6198_vm8, %v6180_v0, %v2677_v40  ;;  %v2691_v6 = vsel %vm2690_vm15, %v3927_v1, %v2687_v31  ;;  %v2701_v62 = vadd.f32 %v3929_v36, %v2700_v23  ;;  %v3219_v38 = vmul.f32 %v2668_v18, %v1779_v26  ;;  %v3691_v23 = vld [vmem:[%s8557_s0 + $0x580] sm:$0xff] }
 0x19c   : > { %v2696_v28 = vsel %vm6208_vm7, %v2695_v24, %v2691_v6  ;;  %vm8813_vm9 = vweird.f32 %v6146_v43  ;;  %v2715_v47 = vadd.f32 %v3931_v4, %v2714_v35  ;;  %v2728_v59 = vmul.f32 %v3933_v5, %v2727_v16  ;;  %v8821_v35 = vld [vmem:[#allocation3_spill] sm:$0xff] }
 0x19d   : > { %vm2704_vm11 = vmor %vm8813_vm9, %vm2703_vm1  ;;  %v3220_v45 = vmul.f32 %v2682_v12, %v1780_v52  ;;  %vm8814_vm10 = vweird.f32 %v3931_v4  ;;  %vm8815_vm3 = vweird.f32 %v6153_v44  ;;  %v3221_v3 = vmul.f32 %v2696_v28, %v1781_v42  ;;  %v8822_v12 = vld [vmem:[#allocation4_spill] sm:$0xff] }
 0x19e   : > { %v2705_v63 = vsel %vm2704_vm11, %v3929_v36, %v2701_v62  ;;  %vm2718_vm4 = vmor %vm8815_vm3, %vm8814_vm10  ;;  %v3375_v26 = vmul.f32 1.442695, %v3219_v38  ;;  %v1149_v0 = vmul.f32 %v6144_v13, %v6144_v13  ;;  %v2729_v1 = vadd.f32 %v3933_v5, %v2728_v59  ;;  %v232_v13 = vld [vmem:[%s8557_s0 + $0x298] sm:$0xff] }
 0x19f   : > { %v2710_v43 = vsel %vm6219_vm2, %v6191_v46, %v2705_v63  ;;  %v2719_v24 = vsel %vm2718_vm4, %v3931_v4, %v2715_v47  ;;  %v3377_v57 = vmul.f32 1.442695, %v3220_v45  ;;  %vm8816_vm5 = vweird.f32 %v6162_v51  ;;  %v8817_v36 = vld [vmem:[#allocation69_spill] sm:$0xff] }
 0x1a0   : > { %v2724_v52 = vsel %vm6227_vm13, %v2723_v20, %v2719_v24  ;;  %vm2732_vm8 = vmor %vm8816_vm5, %vm2731_vm14  ;;  %v3222_v55 = vmul.f32 %v2710_v43, %v1782_v60  ;;  %3934 = vpow2.f32 %v3375_v26  ;;  %v3379_v42 = vmul.f32 1.442695, %v3221_v3  ;;  %v8823_v59 = vld [vmem:[#allocation5_spill] sm:$0xff]  ;;  %v3737_v26 = vld [vmem:[%s8557_s0 + $0x6f0] sm:$0xff] }
 0x1a1   : > { %v2733_v44 = vsel %vm2732_vm8, %v3933_v5, %v2729_v1  ;;  %v3223_v46 = vmul.f32 %v2724_v52, %v1783_v61  ;;  %3936 = vpow2.f32 %v3377_v57  ;;  %v1150_v29 = vmul.f32 %v6151_v30, %v6151_v30  ;;  %v8820_v5 = vld [vmem:[#allocation78_spill] sm:$0xff]  ;;  %v3738_v52 = vld [vmem:[%s8557_s0 + $0x6f8] sm:$0xff] }
 0x1a2   : > { %v2738_v51 = vsel %vm6238_vm6, %v2737_v7, %v2733_v44  ;;  %3938 = vpow2.f32 %v3379_v42  ;;  %v3381_v9 = vmul.f32 1.442695, %v3222_v55  ;;  %v1151_v60 = vmul.f32 %v6158_v14, %v6158_v14  ;;  %v8818_v14 = vld [vmem:[#allocation70_spill] sm:$0xff]  ;;  %v6364_v55 = vpop.permute.xlu0 %812  ;;  %v8825_v44 = vld [vmem:[#allocation7_spill] sm:$0xff] }
 0x1a3   : > { %v3224_v11 = vmul.f32 %v2738_v51, %v1784_v25  ;;  %v3383_v20 = vmul.f32 1.442695, %v3223_v46  ;;  %v1152_v10 = vmul.f32 %v6216_v54, %v6216_v54  ;;  %v1153_v61 = vmul.f32 %v6224_v33, %v6224_v33  ;;  %v8819_v25 = vld [vmem:[#allocation71_spill] sm:$0xff]  ;;  %v8824_v42 = vld [vmem:[#allocation6_spill] sm:$0xff] }
 0x1a4   : > { %v618_v30 = vsub.f32 %v232_v13, %v8798_v50  ;;  %v6301_v4 = vmul.f32 %v8817_v36, %v8817_v36  ;;  %3940 = vpow2.f32 %v3381_v9  ;;  %v1154_v19 = vmul.f32 %v866_v41, %v866_v41  ;;  %v3739_v51 = vld [vmem:[%s8557_s0 + $0x700] sm:$0xff] }
 0x1a5   : > { %v6305_v22 = vmul.f32 %v8818_v14, %v8818_v14  ;;  %v6309_v32 = vmul.f32 %v8819_v25, %v8819_v25  ;;  %3942 = vpow2.f32 %v3383_v20  ;;  %v3385_v54 = vmul.f32 1.442695, %v3224_v11 }
 0x1a6   : > { %v3935_v33 = vpop.eup %3934  ;;  %v6313_v50 = vmul.f32 %v8820_v5, %v8820_v5  ;;  %v6317_v34 = vmul.f32 %v6118_v27, %v6118_v27  ;;  %v1437_v8 = vmul.f32 %v1149_v0, %v1149_v0  ;;  %v1438_v58 = vmul.f32 %v1150_v29, %v1150_v29 }
 0x1a7   : > { %v3937_v7 = vpop.eup %3936  ;;  %3944 = vpow2.f32 %v3385_v54  ;;  %3508 = vst [vmem:[%s5316_s18 + $0x1e0] sm:$0xff] %v3935_v33  ;;  %v1439_v53 = vmul.f32 %v1151_v60, %v1151_v60  ;;  %v1440_v37 = vmul.f32 %v1152_v10, %v1152_v10  ;;  %v1441_v15 = vmul.f32 %v1153_v61, %v1153_v61 }
 0x1a8   : > { %v3939_v31 = vpop.eup %3938  ;;  %v6326_v27 = vmul.f32 %v618_v30, %v618_v30  ;;  %3509 = vst [vmem:[%s5316_s18 + $0x1e8] sm:$0xff] %v3937_v7  ;;  %v1442_v41 = vmul.f32 %v1154_v19, %v1154_v19  ;;  %v1533_v18 = vmul.f32 3.38, %v1437_v8  ;;  %v1534_v40 = vmul.f32 3.38, %v1438_v58 }
 0x1a9   : > { %3510 = vst [vmem:[%s5316_s18 + $0x1f0] sm:$0xff] %v3939_v31  ;;  %v6334_v16 = vadd.f32 %v8821_v35, %v1149_v0  ;;  %v6337_v6 = vadd.f32 %v8822_v12, %v1150_v29  ;;  %v1535_v62 = vmul.f32 3.38, %v1439_v53  ;;  %v1536_v38 = vmul.f32 3.38, %v1440_v37 }
 0x1aa   : > { %v3941_v28 = vpop.eup %3940  ;;  %v6340_v47 = vsub.f32 %v3689_v2, %v5551_v21  ;;  %v6343_v45 = vadd.f32 %v8823_v59, %v1151_v60  ;;  %v1537_v63 = vmul.f32 3.38, %v1441_v15  ;;  %v6345_v3 = vadd.f32 0.083333336, %v1533_v18  ;;  %v8826_v60 = vld [vmem:[#allocation8_spill] sm:$0xff] }
 0x1ab   : > { %v3943_v0 = vpop.eup %3942  ;;  %v6351_v43 = vsub.f32 %v3690_v39, %v5551_v21  ;;  %v6354_v24 = vsub.f32 %v3691_v23, %v5551_v21  ;;  %3511 = vst [vmem:[%s5316_s18 + $0x1f8] sm:$0xff] %v3941_v28  ;;  %v6357_v1 = vadd.f32 0.083333336, %v1534_v40  ;;  %v6359_v57 = vadd.f32 0.083333336, %v1535_v62 }
 0x1ac   : > { %3512 = vst [vmem:[%s5316_s18 + $0x200] sm:$0xff] %v3943_v0  ;;  %v6368_v13 = vadd.f32 %v8824_v42, %v1152_v10  ;;  %v6371_v46 = vadd.f32 %v8825_v44, %v1153_v61  ;;  %v1538_v29 = vmul.f32 3.38, %v1442_v41  ;;  %3946 = vrcp.f32 %v6345_v3 }
 0x1ad   : > { %v3945_v9 = vpop.eup %3944  ;;  %v6378_v11 = vadd.f32 %v8826_v60, %v1154_v19  ;;  %v6380_v20 = vadd.f32 0.083333336, %v1536_v38  ;;  %v1725_v30 = vsub.f32 0.0, %v6334_v16  ;;  %vm8827_vm14 = vcmask 433152   ;;  %v3740_v60 = vld [vmem:[%s8557_s0 + $0x708] sm:$0xff] }
 0x1ae   : > { %3513 = vst.msk [vmem:[%s5316_s18 + $0x208] sm:$0xff] %vm8827_vm14, %v3945_v9  ;;  %3948 = vrcp.f32 %v6357_v1  ;;  %v6389_v36 = vsub.f32 %v3737_v26, %v6364_v55  ;;  %v6392_v14 = vsub.f32 %v3738_v52, %v6364_v55  ;;  %v6394_v19 = vadd.f32 0.083333336, %v1537_v63  ;;  %v3742_v63 = vld [vmem:[%s8557_s0 + $0x718] sm:$0xff] }
 0x1af   : > { %v1908_v25 = vand.u32 2147483647, %v6345_v3  ;;  %3950 = vrcp.f32 %v6359_v57  ;;  %v6399_v54 = vsub.f32 %v3739_v51, %v6364_v55  ;;  %v6401_v33 = vadd.f32 0.083333336, %v1538_v29 }
 0x1b0   : > { %v1910_v8 = vand.u32 2147483648, %v6345_v3  ;;  %v1924_v58 = vand.u32 2147483648, %v6357_v1  ;;  %v1922_v2 = vand.u32 2147483647, %v6357_v1  ;;  %v1938_v39 = vand.u32 2147483648, %v6359_v57 }
 0x1b1   : > { %3952 = vrcp.f32 %v6380_v20  ;;  %vm1904_vm0 = vweird.f32 %v6345_v3  ;;  %v1936_v15 = vand.u32 2147483647, %v6359_v57  ;;  %v1952_v31 = vand.u32 2147483648, %v6380_v20 }
 0x1b2   : > { %v3947_v53 = vpop.eup %3946  ;;  %vm6415_vm7 = vcmp.eq.f32.partialorder %v1908_v25, 8.507059e+37  ;;  %vm1918_vm12 = vweird.f32 %v6357_v1  ;;  %3954 = vrcp.f32 %v6394_v19  ;;  %v1911_v40 = vor.u32 1.1754944e-38, %v1910_v8 }
 0x1b3   : > { %v1900_v23 = vmul.f32 %v3947_v53, %v6345_v3  ;;  %v1925_v35 = vor.u32 1.1754944e-38, %v1924_v58  ;;  %vm1932_vm2 = vweird.f32 %v6359_v57  ;;  %v1950_v12 = vand.u32 2147483647, %v6380_v20 }
 0x1b4   : > { %v3949_v18 = vpop.eup %3948  ;;  %v1966_v62 = vand.u32 2147483648, %v6394_v19  ;;  %vm6425_vm1 = vcmp.eq.f32.partialorder %v1922_v2, 8.507059e+37  ;;  %v1939_v26 = vor.u32 1.1754944e-38, %v1938_v39  ;;  %3956 = vrcp.f32 %v6401_v33 }
 0x1b5   : > { %v3951_v38 = vpop.eup %3950  ;;  %v1901_v28 = vsub.f32 1.0, %v1900_v23  ;;  %v1914_v59 = vmul.f32 %v3949_v18, %v6357_v1  ;;  %vm1905_vm6 = vweird.f32 %v3947_v53  ;;  %vm6431_vm13 = vcmp.eq.f32.partialorder %v1936_v15, 8.507059e+37 }
 0x1b6   : > { %v1928_v0 = vmul.f32 %v3951_v38, %v6359_v57  ;;  %vm1946_vm15 = vweird.f32 %v6380_v20  ;;  %v1953_v42 = vor.u32 1.1754944e-38, %v1952_v31  ;;  %v1964_v44 = vand.u32 2147483647, %v6394_v19  ;;  %vm1906_vm5 = vmor %vm1904_vm0, %vm1905_vm6 }
 0x1b7   : > { %v3953_v29 = vpop.eup %3952  ;;  %v1902_v51 = vmul.f32 %v3947_v53, %v1901_v28  ;;  %v1915_v9 = vsub.f32 1.0, %v1914_v59  ;;  %vm1919_vm9 = vweird.f32 %v3949_v18  ;;  %vm1933_vm11 = vweird.f32 %v3951_v38 }
 0x1b8   : > { %v1929_v25 = vsub.f32 1.0, %v1928_v0  ;;  %v1942_v8 = vmul.f32 %v3953_v29, %v6380_v20  ;;  %vm6441_vm10 = vcmp.eq.f32.partialorder %v1950_v12, 8.507059e+37  ;;  %v1967_v2 = vor.u32 1.1754944e-38, %v1966_v62  ;;  %v3955_v15 = vpop.eup %3954  ;;  %v3741_v62 = vld [vmem:[%s8557_s0 + $0x710] sm:$0xff]  ;;  %vm1920_vm6 = vmor %vm1918_vm12, %vm1919_vm9 }
 0x1b9   : > { %v1980_v39 = vand.u32 2147483648, %v6401_v33  ;;  %v1903_v31 = vadd.f32 %v3947_v53, %v1902_v51  ;;  %v1916_v23 = vmul.f32 %v3949_v18, %v1915_v9  ;;  %vm1947_vm4 = vweird.f32 %v3953_v29 }
 0x1ba   : > { %v1978_v28 = vand.u32 2147483647, %v6401_v33  ;;  %v1930_v59 = vmul.f32 %v3951_v38, %v1929_v25  ;;  %v1943_v12 = vsub.f32 1.0, %v1942_v8  ;;  %v1956_v0 = vmul.f32 %v3955_v15, %v6394_v19  ;;  %v3957_v9 = vpop.eup %3956 }
 0x1bb   : > { %vm6452_vm8 = vcmp.eq.f32.partialorder %v1964_v44, 8.507059e+37  ;;  %v888_v51 = vsub.f32 %v3740_v60, %v6364_v55  ;;  %v1907_v7 = vsel %vm1906_vm5, %v3947_v53, %v1903_v31  ;;  %v1917_v5 = vadd.f32 %v3949_v18, %v1916_v23  ;;  %vm1934_vm5 = vmor %vm1932_vm2, %vm1933_vm11 }
 0x1bc   : > { %vm1961_vm14 = vweird.f32 %v3955_v15  ;;  %vm1974_vm0 = vweird.f32 %v6401_v33  ;;  %v1981_v3 = vor.u32 1.1754944e-38, %v1980_v39  ;;  %v1912_v25 = vsel %vm6415_vm7, %v1911_v40, %v1907_v7  ;;  %vm1948_vm7 = vmor %vm1946_vm15, %vm1947_vm4 }
 0x1bd   : > { %v1931_v44 = vadd.f32 %v3951_v38, %v1930_v59  ;;  %v1944_v8 = vmul.f32 %v3953_v29, %v1943_v12  ;;  %v1957_v61 = vsub.f32 1.0, %v1956_v0  ;;  %v1921_v10 = vsel %vm1920_vm6, %v3949_v18, %v1917_v5 }
 0x1be   : > { %v1970_v53 = vmul.f32 %v3957_v9, %v6401_v33  ;;  %vm6470_vm3 = vcmp.eq.f32.partialorder %v1978_v28, 8.507059e+37  ;;  %v3165_v7 = vmul.f32 %v1912_v25, %v1725_v30  ;;  %v889_v1 = vsub.f32 %v3741_v62, %v6364_v55 }
 0x1bf   : > { %v1926_v41 = vsel %vm6425_vm1, %v1925_v35, %v1921_v10  ;;  %v1935_v40 = vsel %vm1934_vm5, %v3951_v38, %v1931_v44  ;;  %v1945_v5 = vadd.f32 %v3953_v29, %v1944_v8  ;;  %v1958_v18 = vmul.f32 %v3955_v15, %v1957_v61 }
 0x1c0   : > { %v1940_v57 = vsel %vm6431_vm13, %v1939_v26, %v1935_v40  ;;  %v1971_v39 = vsub.f32 1.0, %v1970_v53  ;;  %v8840_v31 = vsub.f32 0.0, %v6337_v6  ;;  %v3267_v30 = vmul.f32 1.442695, %v3165_v7 }
 0x1c1   : > { %v1949_v10 = vsel %vm1948_vm7, %v3953_v29, %v1945_v5  ;;  %v1959_v35 = vadd.f32 %v3955_v15, %v1958_v18  ;;  %vm1975_vm12 = vweird.f32 %v3957_v9  ;;  %v8841_v61 = vsub.f32 0.0, %v6343_v45  ;;  %v3692_v45 = vld [vmem:[%s8557_s0 + $0x588] sm:$0xff] }
 0x1c2   : > { %v3166_v16 = vmul.f32 %v1926_v41, %v8840_v31  ;;  %v1954_v26 = vsel %vm6441_vm10, %v1953_v42, %v1949_v10  ;;  %vm8842_vm2 = vweird.f32 %v6394_v19  ;;  %v1972_v6 = vmul.f32 %v3957_v9, %v1971_v39  ;;  %vm1976_vm13 = vmor %vm1974_vm0, %vm1975_vm12 }
 0x1c3   : > { %v3167_v38 = vmul.f32 %v1940_v57, %v8841_v61  ;;  %vm1962_vm1 = vmor %vm8842_vm2, %vm1961_vm14  ;;  %3958 = vpow2.f32 %v3267_v30  ;;  %v8843_v23 = vsub.f32 0.0, %v6368_v13  ;;  %v890_v59 = vsub.f32 %v3742_v63, %v6364_v55  ;;  %v3693_v13 = vld [vmem:[%s8557_s0 + $0x590] sm:$0xff]  ;;  %v3694_v55 = vld [vmem:[%s8557_s0 + $0x598] sm:$0xff] }
 0x1c4   : > { %v3269_v20 = vmul.f32 1.442695, %v3166_v16  ;;  %v1963_v52 = vsel %vm1962_vm1, %v3955_v15, %v1959_v35  ;;  %v1973_v58 = vadd.f32 %v3957_v9, %v1972_v6  ;;  %v1173_v19 = vmul.f32 %v6389_v36, %v6389_v36  ;;  %v8848_v61 = vld [vmem:[#allocation62_spill] sm:$0xff] }
 0x1c5   : > { %v3168_v28 = vmul.f32 %v1954_v26, %v8843_v23  ;;  %v3271_v29 = vmul.f32 1.442695, %v3167_v38  ;;  %v1968_v42 = vsel %vm6452_vm8, %v1967_v2, %v1963_v52  ;;  %v8844_v37 = vsub.f32 0.0, %v6371_v46 }
 0x1c6   : > { %3960 = vpow2.f32 %v3269_v20  ;;  %v1174_v36 = vmul.f32 %v6392_v14, %v6392_v14  ;;  %v1977_v12 = vsel %vm1976_vm13, %v3957_v9, %v1973_v58  ;;  %v1175_v0 = vmul.f32 %v6399_v54, %v6399_v54 }
 0x1c7   : > { %v3169_v2 = vmul.f32 %v1968_v42, %v8844_v37  ;;  %3962 = vpow2.f32 %v3271_v29  ;;  %v3273_v15 = vmul.f32 1.442695, %v3168_v28  ;;  %v1176_v62 = vmul.f32 %v888_v51, %v888_v51  ;;  %v6564_v29 = vpop.permute.xlu2 %844  ;;  %v8849_v42 = vld [vmem:[#allocation63_spill] sm:$0xff]  ;;  %v3787_v37 = vld [vmem:[%s8557_s0 + $0x880] sm:$0xff] }
 0x1c8   : > { %v1177_v25 = vmul.f32 %v889_v1, %v889_v1  ;;  %v1982_v44 = vsel %vm6470_vm3, %v1981_v3, %v1977_v12  ;;  %v1178_v8 = vmul.f32 %v890_v59, %v890_v59  ;;  %v776_v53 = vsub.f32 %v3692_v45, %v5551_v21 }
 0x1c9   : > { %3964 = vpow2.f32 %v3273_v15  ;;  %v3275_v33 = vmul.f32 1.442695, %v3169_v2  ;;  %v3959_v46 = vpop.eup %3958  ;;  %v777_v7 = vsub.f32 %v3693_v13, %v5551_v21  ;;  %v778_v14 = vsub.f32 %v3694_v55, %v5551_v21  ;;  %v3786_v55 = vld [vmem:[%s8557_s0 + $0x878] sm:$0xff]  ;;  %v8850_v2 = vld [vmem:[#allocation66_spill] sm:$0xff] }
 0x1ca   : > { %v8845_v9 = vsub.f32 0.0, %v6378_v11  ;;  %v6530_v54 = vmul.f32 %v6340_v47, %v6340_v47  ;;  %v6534_v51 = vmul.f32 %v6351_v43, %v6351_v43  ;;  %3454 = vst [vmem:[%s5316_s18 + $0x30] sm:$0xff] %v3959_v46  ;;  %v1461_v3 = vmul.f32 %v1173_v19, %v1173_v19  ;;  %v8846_v11 = vld [vmem:[#allocation58_spill] sm:$0xff]  ;;  %v8847_v43 = vld [vmem:[#allocation59_spill] sm:$0xff] }
 0x1cb   : > { %3966 = vpow2.f32 %v3275_v33  ;;  %v1462_v40 = vmul.f32 %v1174_v36, %v1174_v36  ;;  %v1463_v5 = vmul.f32 %v1175_v0, %v1175_v0  ;;  %v1464_v21 = vmul.f32 %v1176_v62, %v1176_v62 }
 0x1cc   : > { %v3170_v41 = vmul.f32 %v1982_v44, %v8845_v9  ;;  %v3961_v60 = vpop.eup %3960  ;;  %v6539_v57 = vadd.f32 %v8846_v11, %v1173_v19  ;;  %v1465_v47 = vmul.f32 %v1177_v25, %v1177_v25  ;;  %v1466_v39 = vmul.f32 %v1178_v8, %v1178_v8 }
 0x1cd   : > { %v3963_v18 = vpop.eup %3962  ;;  %3455 = vst [vmem:[%s5316_s18 + $0x38] sm:$0xff] %v3961_v60  ;;  %v1557_v31 = vmul.f32 3.38, %v1461_v3  ;;  %v6543_v16 = vadd.f32 %v8847_v43, %v1174_v36  ;;  %v1558_v30 = vmul.f32 3.38, %v1462_v40  ;;  %v6547_v35 = vmul.f32 %v6354_v24, %v6354_v24  ;;  %v3785_v24 = vld [vmem:[%s8557_s0 + $0x870] sm:$0xff] }
 0x1ce   : > { %v3277_v1 = vmul.f32 1.442695, %v3170_v41  ;;  %3456 = vst [vmem:[%s5316_s18 + $0x40] sm:$0xff] %v3963_v18  ;;  %v1559_v63 = vmul.f32 3.38, %v1463_v5  ;;  %v6550_v38 = vadd.f32 %v8848_v61, %v1175_v0  ;;  %v6552_v20 = vmul.f32 %v776_v53, %v776_v53  ;;  %v8851_v36 = vld [vmem:[#allocation67_spill] sm:$0xff] }
 0x1cf   : > { %v3965_v10 = vpop.eup %3964  ;;  %v1560_v26 = vmul.f32 3.38, %v1464_v21  ;;  %v1561_v6 = vmul.f32 3.38, %v1465_v47  ;;  %v6554_v52 = vmul.f32 %v777_v7, %v777_v7  ;;  %v6557_v23 = vadd.f32 0.083333336, %v1557_v31 }
 0x1d0   : > { %3968 = vpow2.f32 %v3277_v1  ;;  %3457 = vst [vmem:[%s5316_s18 + $0x48] sm:$0xff] %v3965_v10  ;;  %v6559_v28 = vadd.f32 0.083333336, %v1558_v30  ;;  %v6566_v45 = vmul.f32 %v778_v14, %v778_v14  ;;  %v6569_v58 = vadd.f32 %v8849_v42, %v1176_v62 }
 0x1d1   : > { %v3967_v59 = vpop.eup %3966  ;;  %v1562_v19 = vmul.f32 3.38, %v1466_v39  ;;  %v6571_v13 = vadd.f32 0.083333336, %v1559_v63  ;;  %v6581_v15 = vadd.f32 %v8850_v2, %v1177_v25  ;;  %v6584_v12 = vadd.f32 %v8851_v36, %v1178_v8 }
 0x1d2   : > { %3458 = vst [vmem:[%s5316_s18 + $0x50] sm:$0xff] %v3967_v59  ;;  %v6588_v44 = vadd.f32 0.083333336, %v1560_v26  ;;  %3970 = vrcp.f32 %v6557_v23  ;;  %v6593_v46 = vsub.f32 %v3785_v24, %v6564_v29  ;;  %v6595_v7 = vadd.f32 0.083333336, %v1561_v6 }
 0x1d3   : > { %3972 = vrcp.f32 %v6559_v28  ;;  %v6599_v25 = vsub.f32 %v3786_v55, %v6564_v29  ;;  %v6602_v8 = vsub.f32 %v3787_v37, %v6564_v29  ;;  %vm8852_vm15 = vcmask 433152   ;;  %v3788_v55 = vld [vmem:[%s8557_s0 + $0x888] sm:$0xff] }
 0x1d4   : > { %v6606_v14 = vadd.f32 0.083333336, %v1562_v19  ;;  %v2246_v9 = vand.u32 2147483648, %v6557_v23  ;;  %v2260_v41 = vand.u32 2147483648, %v6559_v28  ;;  %3974 = vrcp.f32 %v6571_v13 }
 0x1d5   : > { %v2244_v1 = vand.u32 2147483647, %v6557_v23  ;;  %v2274_v40 = vand.u32 2147483648, %v6571_v13  ;;  %v2258_v21 = vand.u32 2147483647, %v6559_v28  ;;  %3976 = vrcp.f32 %v6588_v44 }
 0x1d6   : > { %v3969_v53 = vpop.eup %3968  ;;  %v2288_v18 = vand.u32 2147483648, %v6588_v44  ;;  %vm2240_vm9 = vweird.f32 %v6557_v23  ;;  %vm2254_vm11 = vweird.f32 %v6559_v28  ;;  %v2272_v11 = vand.u32 2147483647, %v6571_v13 }
 0x1d7   : > { %3459 = vst.msk [vmem:[%s5316_s18 + $0x58] sm:$0xff] %vm8852_vm15, %v3969_v53  ;;  %3978 = vrcp.f32 %v6595_v7  ;;  %v2247_v39 = vor.u32 1.1754944e-38, %v2246_v9  ;;  %v6623_v31 = vor.u32 1.1754944e-38, %v2260_v41  ;;  %vm2268_vm10 = vweird.f32 %v6571_v13  ;;  %v3789_v9 = vld [vmem:[%s8557_s0 + $0x890] sm:$0xff] }
 0x1d8   : > { %v3971_v47 = vpop.eup %3970  ;;  %v2302_v43 = vand.u32 2147483648, %v6595_v7  ;;  %vm6628_vm3 = vcmp.eq.f32.partialorder %v2244_v1, 8.507059e+37  ;;  %v2275_v61 = vor.u32 1.1754944e-38, %v2274_v40  ;;  %v2286_v26 = vand.u32 2147483647, %v6588_v44 }
 0x1d9   : > { %v3973_v30 = vpop.eup %3972  ;;  %v2236_v63 = vmul.f32 %v3971_v47, %v6557_v23  ;;  %3980 = vrcp.f32 %v6606_v14  ;;  %vm2241_vm8 = vweird.f32 %v3971_v47  ;;  %vm6636_vm14 = vcmp.eq.f32.partialorder %v2258_v21, 8.507059e+37 }
 0x1da   : > { %v3975_v6 = vpop.eup %3974  ;;  %v2250_v24 = vmul.f32 %v3973_v30, %v6559_v28  ;;  %v6640_v42 = vor.u32 1.1754944e-38, %v2288_v18  ;;  %v2300_v19 = vand.u32 2147483647, %v6595_v7  ;;  %vm2255_vm6 = vweird.f32 %v3973_v30  ;;  %vm2242_vm12 = vmor %vm2240_vm9, %vm2241_vm8 }
 0x1db   : > { %v2237_v37 = vsub.f32 1.0, %v2236_v63  ;;  %v2264_v2 = vmul.f32 %v3975_v6, %v6571_v13  ;;  %vm6648_vm5 = vcmp.eq.f32.partialorder %v2272_v11, 8.507059e+37  ;;  %v2303_v53 = vor.u32 1.1754944e-38, %v2302_v43  ;;  %v3977_v41 = vpop.eup %3976  ;;  %vm2256_vm4 = vmor %vm2254_vm11, %vm2255_vm6 }
 0x1dc   : > { %v2251_v1 = vsub.f32 1.0, %v2250_v24  ;;  %vm2269_vm7 = vweird.f32 %v3975_v6  ;;  %v2314_v40 = vand.u32 2147483647, %v6606_v14  ;;  %v2316_v21 = vand.u32 2147483648, %v6606_v14 }
 0x1dd   : > { %v3979_v18 = vpop.eup %3978  ;;  %v2238_v63 = vmul.f32 %v3971_v47, %v2237_v37  ;;  %v2265_v11 = vsub.f32 1.0, %v2264_v2  ;;  %v2278_v5 = vmul.f32 %v3977_v41, %v6588_v44  ;;  %vm6659_vm2 = vcmp.eq.f32.partialorder %v2286_v26, 8.507059e+37  ;;  %vm2270_vm9 = vmor %vm2268_vm10, %vm2269_vm7 }
 0x1de   : > { %v936_v60 = vsub.f32 %v3788_v55, %v6564_v29  ;;  %v2252_v3 = vmul.f32 %v3973_v30, %v2251_v1  ;;  %vm2283_vm1 = vweird.f32 %v3977_v41  ;;  %v2292_v24 = vmul.f32 %v3979_v18, %v6595_v7 }
 0x1df   : > { %vm6665_vm13 = vcmp.eq.f32.partialorder %v2300_v19, 8.507059e+37  ;;  %v937_v62 = vsub.f32 %v3789_v9, %v6564_v29  ;;  %v3981_v37 = vpop.eup %3980  ;;  %v2239_v2 = vadd.f32 %v3971_v47, %v2238_v63  ;;  %v2266_v0 = vmul.f32 %v3975_v6, %v2265_v11 }
 0x1e0   : > { %v2279_v48 = vsub.f32 1.0, %v2278_v5  ;;  %v2253_v26 = vadd.f32 %v3973_v30, %v2252_v3  ;;  %v2293_v55 = vsub.f32 1.0, %v2292_v24  ;;  %v2306_v1 = vmul.f32 %v3981_v37, %v6606_v14 }
 0x1e1   : > { %vm6674_vm0 = vcmp.eq.f32.partialorder %v2314_v40, 8.507059e+37  ;;  %v2317_v49 = vor.u32 1.1754944e-38, %v2316_v21  ;;  %v2243_v17 = vsel %vm2242_vm12, %v3971_v47, %v2239_v2  ;;  %v2267_v5 = vadd.f32 %v3975_v6, %v2266_v0  ;;  %v3790_v47 = vld [vmem:[%s8557_s0 + $0x898] sm:$0xff] }
 0x1e2   : > { %v2280_v9 = vmul.f32 %v3977_v41, %v2279_v48  ;;  %vm2311_vm15 = vweird.f32 %v3981_v37  ;;  %v2248_v23 = vsel %vm6628_vm3, %v2247_v39, %v2243_v17  ;;  %v2257_v3 = vsel %vm2256_vm4, %v3973_v30, %v2253_v26 }
 0x1e3   : > { %v2294_v40 = vmul.f32 %v3979_v18, %v2293_v55  ;;  %v2307_v63 = vsub.f32 1.0, %v2306_v1  ;;  %v2262_v28 = vsel %vm6636_vm14, %v6623_v31, %v2257_v3  ;;  %v2271_v48 = vsel %vm2270_vm9, %v3975_v6, %v2267_v5 }
 0x1e4   : > { %v2281_v0 = vadd.f32 %v3977_v41, %v2280_v9  ;;  %v8865_v10 = vsub.f32 0.0, %v6539_v57  ;;  %v2276_v39 = vsel %vm6648_vm5, %v2275_v61, %v2271_v48  ;;  %vm8866_vm11 = vweird.f32 %v6588_v44 }
 0x1e5   : > { %vm2284_vm10 = vmor %vm8866_vm11, %vm2283_vm1  ;;  %v2295_v13 = vadd.f32 %v3979_v18, %v2294_v40  ;;  %v2308_v30 = vmul.f32 %v3981_v37, %v2307_v63  ;;  %v8867_v21 = vsub.f32 0.0, %v6543_v16  ;;  %vm8868_vm3 = vweird.f32 %v3979_v18 }
 0x1e6   : > { %v3189_v17 = vmul.f32 %v2248_v23, %v8865_v10  ;;  %v2285_v24 = vsel %vm2284_vm10, %v3977_v41, %v2281_v0  ;;  %vm8869_vm4 = vweird.f32 %v6595_v7  ;;  %v8870_v57 = vsub.f32 0.0, %v6550_v38 }
 0x1e7   : > { %v3190_v11 = vmul.f32 %v2262_v28, %v8867_v21  ;;  %vm2298_vm8 = vmor %vm8869_vm4, %vm8868_vm3  ;;  %v938_v61 = vsub.f32 %v3790_v47, %v6564_v29  ;;  %v2290_v44 = vsel %vm6659_vm2, %v6640_v42, %v2285_v24  ;;  %v2309_v36 = vadd.f32 %v3981_v37, %v2308_v30  ;;  %v3726_v24 = vld [vmem:[%s8557_s0 + $0x698] sm:$0xff] }
 0x1e8   : > { %v3191_v31 = vmul.f32 %v2276_v39, %v8870_v57  ;;  %v3315_v6 = vmul.f32 1.442695, %v3189_v17  ;;  %v2299_v59 = vsel %vm2298_vm8, %v3979_v18, %v2295_v13  ;;  %vm8871_vm14 = vweird.f32 %v6606_v14  ;;  %v3725_v39 = vld [vmem:[%s8557_s0 + $0x690] sm:$0xff]  ;;  %v6763_v13 = vpop.permute.xlu1 %804 }
 0x1e9   : > { %v3317_v2 = vmul.f32 1.442695, %v3190_v11  ;;  %v2304_v16 = vsel %vm6665_vm13, %v2303_v53, %v2299_v59  ;;  %vm2312_vm6 = vmor %vm8871_vm14, %vm2311_vm15  ;;  %v8872_v38 = vsub.f32 0.0, %v6569_v58  ;;  %v8873_v26 = vsub.f32 0.0, %v6581_v15 }
 0x1ea   : > { %3982 = vpow2.f32 %v3315_v6  ;;  %v3319_v41 = vmul.f32 1.442695, %v3191_v31  ;;  %v2313_v29 = vsel %vm2312_vm6, %v3981_v37, %v2309_v36  ;;  %v1221_v42 = vmul.f32 %v6593_v46, %v6593_v46 }
 0x1eb   : > { %v3192_v7 = vmul.f32 %v2290_v44, %v8872_v38  ;;  %v3193_v43 = vmul.f32 %v2304_v16, %v8873_v26  ;;  %3984 = vpow2.f32 %v3317_v2  ;;  %v2318_v33 = vsel %vm6674_vm0, %v2317_v49, %v2313_v29  ;;  %v3727_v44 = vld [vmem:[%s8557_s0 + $0x6a0] sm:$0xff] }
 0x1ec   : > { %3986 = vpow2.f32 %v3319_v41  ;;  %v1222_v14 = vmul.f32 %v6599_v25, %v6599_v25  ;;  %v8874_v58 = vsub.f32 0.0, %v6584_v12  ;;  %v1223_v15 = vmul.f32 %v6602_v8, %v6602_v8 }
 0x1ed   : > { %v3321_v53 = vmul.f32 1.442695, %v3192_v7  ;;  %v3323_v55 = vmul.f32 1.442695, %v3193_v43  ;;  %v1224_v37 = vmul.f32 %v936_v60, %v936_v60  ;;  %v1225_v1 = vmul.f32 %v937_v62, %v937_v62 }
 0x1ee   : > { %v3194_v18 = vmul.f32 %v2318_v33, %v8874_v58  ;;  %v1317_v49 = vadd.f32 %v6530_v54, %v6301_v4  ;;  %v1318_v46 = vadd.f32 %v6534_v51, %v6305_v22  ;;  %v1319_v12 = vadd.f32 %v6547_v35, %v6309_v32 }
 0x1ef   : > { %3988 = vpow2.f32 %v3321_v53  ;;  %v1320_v8 = vadd.f32 %v6552_v20, %v6313_v50  ;;  %v1226_v60 = vmul.f32 %v938_v61, %v938_v61  ;;  %v1321_v62 = vadd.f32 %v6554_v52, %v6317_v34 }
 0x1f0   : > { %3990 = vpow2.f32 %v3323_v55  ;;  %v3325_v25 = vmul.f32 1.442695, %v3194_v18  ;;  %v3983_v19 = vpop.eup %3982  ;;  %v1322_v4 = vadd.f32 %v6566_v45, %v6326_v27  ;;  %v1509_v22 = vmul.f32 %v1221_v42, %v1221_v42 }
 0x1f1   : > { %v3985_v54 = vpop.eup %3984  ;;  %3478 = vst [vmem:[%s5316_s18 + $0xf0] sm:$0xff] %v3983_v19  ;;  %v1510_v5 = vmul.f32 %v1222_v14, %v1222_v14  ;;  %v1511_v32 = vmul.f32 %v1223_v15, %v1223_v15  ;;  %v1512_v50 = vmul.f32 %v1224_v37, %v1224_v37  ;;  %v1513_v35 = vmul.f32 %v1225_v1, %v1225_v1 }
 0x1f2   : > { %3992 = vpow2.f32 %v3325_v25  ;;  %v3987_v51 = vpop.eup %3986  ;;  %3479 = vst [vmem:[%s5316_s18 + $0xf8] sm:$0xff] %v3985_v54  ;;  %v1605_v20 = vmul.f32 3.38, %v1509_v22  ;;  %v1514_v23 = vmul.f32 %v1226_v60, %v1226_v60  ;;  %v6745_v45 = vadd.f32 %v1317_v49, %v1221_v42  ;;  %v3728_v22 = vld [vmem:[%s8557_s0 + $0x6a8] sm:$0xff] }
 0x1f3   : > { %3480 = vst [vmem:[%s5316_s18 + $0x100] sm:$0xff] %v3987_v51  ;;  %v1606_v34 = vmul.f32 3.38, %v1510_v5  ;;  %v1607_v52 = vmul.f32 3.38, %v1511_v32  ;;  %v6747_v3 = vadd.f32 %v1318_v46, %v1222_v14  ;;  %v6749_v40 = vadd.f32 %v1319_v12, %v1223_v15 }
 0x1f4   : > { %v1608_v63 = vmul.f32 3.38, %v1512_v50  ;;  %v6752_v47 = vadd.f32 %v1320_v8, %v1224_v37  ;;  %v1609_v28 = vmul.f32 3.38, %v1513_v35  ;;  %v6754_v48 = vadd.f32 0.083333336, %v1605_v20 }
 0x1f5   : > { %v3989_v9 = vpop.eup %3988  ;;  %v6756_v10 = vadd.f32 0.083333336, %v1606_v34  ;;  %v6758_v17 = vadd.f32 0.083333336, %v1607_v52  ;;  %vm8875_vm0 = vcmask 433152   ;;  %v6767_v30 = vadd.f32 %v1321_v62, %v1225_v1  ;;  %v3729_v34 = vld [vmem:[%s8557_s0 + $0x6b0] sm:$0xff] }
 0x1f6   : > { %v3991_v27 = vpop.eup %3990  ;;  %3481 = vst [vmem:[%s5316_s18 + $0x108] sm:$0xff] %v3989_v9  ;;  %v6769_v21 = vadd.f32 %v1322_v4, %v1226_v60  ;;  %v1610_v11 = vmul.f32 3.38, %v1514_v23  ;;  %3994 = vrcp.f32 %v6754_v48  ;;  %v6775_v57 = vadd.f32 0.083333336, %v1608_v63 }
 0x1f7   : > { %3482 = vst [vmem:[%s5316_s18 + $0x110] sm:$0xff] %v3991_v27  ;;  %v1797_v31 = vsub.f32 0.0, %v6745_v45  ;;  %v1798_v6 = vsub.f32 0.0, %v6747_v3  ;;  %v1799_v61 = vsub.f32 0.0, %v6749_v40  ;;  %v6783_v59 = vadd.f32 0.083333336, %v1609_v28 }
 0x1f8   : > { %v3993_v0 = vpop.eup %3992  ;;  %v1800_v36 = vsub.f32 0.0, %v6752_v47  ;;  %3996 = vrcp.f32 %v6756_v10  ;;  %v6788_v2 = vsub.f32 %v3725_v39, %v6763_v13  ;;  %v2916_v16 = vand.u32 2147483647, %v6754_v48 }
 0x1f9   : > { %3483 = vst.msk [vmem:[%s5316_s18 + $0x118] sm:$0xff] %vm8875_vm0, %v3993_v0  ;;  %v2918_v38 = vand.u32 2147483648, %v6754_v48  ;;  %v2932_v7 = vand.u32 2147483648, %v6756_v10  ;;  %3998 = vrcp.f32 %v6758_v17  ;;  %v6794_v41 = vadd.f32 0.083333336, %v1610_v11 }
 0x1fa   : > { %v2946_v29 = vand.u32 2147483648, %v6758_v17  ;;  %v6798_v26 = vsub.f32 %v3726_v24, %v6763_v13  ;;  %v6801_v43 = vsub.f32 %v3727_v44, %v6763_v13  ;;  %v1801_v42 = vsub.f32 0.0, %v6767_v30 }
 0x1fb   : > { %v2930_v33 = vand.u32 2147483647, %v6756_v10  ;;  %4000 = vrcp.f32 %v6775_v57  ;;  %v2960_v53 = vand.u32 2147483648, %v6775_v57  ;;  %v1802_v58 = vsub.f32 0.0, %v6769_v21 }
 0x1fc   : > { %v6807_v14 = vpop.eup %3994  ;;  %vm2912_vm5 = vweird.f32 %v6754_v48  ;;  %v2944_v18 = vand.u32 2147483647, %v6758_v17  ;;  %4002 = vrcp.f32 %v6783_v59  ;;  %vm6815_vm7 = vcmp.eq.f32.partialorder %v2916_v16, 8.507059e+37 }
 0x1fd   : > { %v2908_v55 = vmul.f32 %v6807_v14, %v6754_v48  ;;  %v2919_v37 = vor.u32 1.1754944e-38, %v2918_v38  ;;  %vm2926_vm12 = vweird.f32 %v6756_v10  ;;  %v6820_v1 = vor.u32 1.1754944e-38, %v2932_v7  ;;  %v3730_v48 = vld [vmem:[%s8557_s0 + $0x6b8] sm:$0xff] }
 0x1fe   : > { %v2958_v49 = vand.u32 2147483647, %v6775_v57  ;;  %v3997_v46 = vpop.eup %3996  ;;  %vm2913_vm2 = vweird.f32 %v6807_v14  ;;  %vm2940_vm1 = vweird.f32 %v6758_v17  ;;  %v2947_v25 = vor.u32 1.1754944e-38, %v2946_v29 }
 0x1ff   : > { %v2974_v12 = vand.u32 2147483648, %v6783_v59  ;;  %4004 = vrcp.f32 %v6794_v41  ;;  %v3999_v8 = vpop.eup %3998  ;;  %v2909_v19 = vsub.f32 1.0, %v2908_v55  ;;  %v2922_v60 = vmul.f32 %v3997_v46, %v6756_v10  ;;  %vm2914_vm3 = vmor %vm2912_vm5, %vm2913_vm2 }
 0x200   : > { %vm6828_vm13 = vcmp.eq.f32.partialorder %v2930_v33, 8.507059e+37  ;;  %v6832_v4 = vor.u32 1.1754944e-38, %v2960_v53  ;;  %v2972_v54 = vand.u32 2147483647, %v6783_v59  ;;  %vm2927_vm15 = vweird.f32 %v3997_v46 }
 0x201   : > { %v2936_v51 = vmul.f32 %v3999_v8, %v6758_v17  ;;  %vm2941_vm9 = vweird.f32 %v3999_v8  ;;  %vm6839_vm11 = vcmp.eq.f32.partialorder %v2944_v18, 8.507059e+37  ;;  %vm2954_vm10 = vweird.f32 %v6775_v57  ;;  %v4001_v50 = vpop.eup %4000  ;;  %vm2928_vm5 = vmor %vm2926_vm12, %vm2927_vm15 }
 0x202   : > { %v2986_v32 = vand.u32 2147483647, %v6794_v41  ;;  %v2910_v35 = vmul.f32 %v6807_v14, %v2909_v19  ;;  %v2923_v20 = vsub.f32 1.0, %v2922_v60  ;;  %v2975_v9 = vor.u32 1.1754944e-38, %v2974_v12  ;;  %v4003_v52 = vpop.eup %4002 }
 0x203   : > { %v2988_v23 = vand.u32 2147483648, %v6794_v41  ;;  %v2937_v27 = vsub.f32 1.0, %v2936_v51  ;;  %v2950_v63 = vmul.f32 %v4001_v50, %v6775_v57  ;;  %vm2955_vm4 = vweird.f32 %v4001_v50 }
 0x204   : > { %vm6852_vm8 = vcmp.eq.f32.partialorder %v2958_v49, 8.507059e+37  ;;  %v876_v0 = vsub.f32 %v3728_v22, %v6763_v13  ;;  %v2911_v39 = vadd.f32 %v6807_v14, %v2910_v35  ;;  %v2924_v11 = vmul.f32 %v3997_v46, %v2923_v20 }
 0x205   : > { %v2964_v24 = vmul.f32 %v4003_v52, %v6783_v59  ;;  %vm6859_vm6 = vcmp.eq.f32.partialorder %v2972_v54, 8.507059e+37  ;;  %vm2982_vm0 = vweird.f32 %v6794_v41  ;;  %v4005_v16 = vpop.eup %4004  ;;  %v2938_v38 = vmul.f32 %v3999_v8, %v2937_v27 }
 0x206   : > { %v2951_v7 = vsub.f32 1.0, %v2950_v63  ;;  %v2989_v29 = vor.u32 1.1754944e-38, %v2988_v23  ;;  %v877_v33 = vsub.f32 %v3729_v34, %v6763_v13  ;;  %v2915_v53 = vsel %vm2914_vm3, %v6807_v14, %v2911_v39  ;;  %vm2942_vm3 = vmor %vm2940_vm1, %vm2941_vm9 }
 0x207   : > { %v2925_v18 = vadd.f32 %v3997_v46, %v2924_v11  ;;  %v2965_v55 = vsub.f32 1.0, %v2964_v24  ;;  %v2978_v49 = vmul.f32 %v4005_v16, %v6794_v41  ;;  %vm6871_vm14 = vcmp.eq.f32.partialorder %v2986_v32, 8.507059e+37  ;;  %v8890_v11 = vld [vmem:[#allocation42_spill] sm:$0xff] }
 0x208   : > { %v2920_v19 = vsel %vm6815_vm7, %v2919_v37, %v2915_v53  ;;  %v2939_v14 = vadd.f32 %v3999_v8, %v2938_v38  ;;  %v2952_v60 = vmul.f32 %v4001_v50, %v2951_v7  ;;  %vm2983_vm2 = vweird.f32 %v4005_v16  ;;  %vm2956_vm7 = vmor %vm2954_vm10, %vm2955_vm4  ;;  %v8891_v7 = vld [vmem:[#allocation43_spill] sm:$0xff] }
 0x209   : > { %v2929_v54 = vsel %vm2928_vm5, %v3997_v46, %v2925_v18  ;;  %v2966_v22 = vmul.f32 %v4003_v52, %v2965_v55  ;;  %v2979_v51 = vsub.f32 1.0, %v2978_v49  ;;  %v3237_v32 = vmul.f32 %v2920_v19, %v1797_v31  ;;  %vm2984_vm15 = vmor %vm2982_vm0, %vm2983_vm2  ;;  %v3755_v18 = vld [vmem:[%s8557_s0 + $0x780] sm:$0xff]  ;;  %v8892_v49 = vld [vmem:[#allocation44_spill] sm:$0xff] }
 0x20a   : > { %v2934_v15 = vsel %vm6828_vm13, %v6820_v1, %v2929_v54  ;;  %v2943_v37 = vsel %vm2942_vm3, %v3999_v8, %v2939_v14  ;;  %v2953_v10 = vadd.f32 %v4001_v50, %v2952_v60  ;;  %v878_v35 = vsub.f32 %v3730_v48, %v6763_v13  ;;  %v3756_v14 = vld [vmem:[%s8557_s0 + $0x788] sm:$0xff]  ;;  %v6951_v60 = vpop.permute.xlu0 %824  ;;  %v8893_v54 = vld [vmem:[#allocation45_spill] sm:$0xff] }
 0x20b   : > { %v2948_v46 = vsel %vm6839_vm11, %v2947_v25, %v2943_v37  ;;  %v2967_v17 = vadd.f32 %v4003_v52, %v2966_v22  ;;  %v2980_v20 = vmul.f32 %v4005_v16, %v2979_v51  ;;  %v3238_v45 = vmul.f32 %v2934_v15, %v1798_v6  ;;  %v8894_v37 = vld [vmem:[#allocation46_spill] sm:$0xff] }
 0x20c   : > { %v2957_v31 = vsel %vm2956_vm7, %v4001_v50, %v2953_v10  ;;  %vm8888_vm12 = vweird.f32 %v4003_v52  ;;  %vm8889_vm1 = vweird.f32 %v6783_v59  ;;  %v3239_v13 = vmul.f32 %v2948_v46, %v1799_v61 }
 0x20d   : > { %vm2970_vm13 = vmor %vm8889_vm1, %vm8888_vm12  ;;  %v3411_v1 = vmul.f32 1.442695, %v3237_v32  ;;  %v1161_v25 = vmul.f32 %v6788_v2, %v6788_v2  ;;  %v2962_v57 = vsel %vm6852_vm8, %v6832_v4, %v2957_v31  ;;  %v2981_v62 = vadd.f32 %v4005_v16, %v2980_v20  ;;  %v3757_v32 = vld [vmem:[%s8557_s0 + $0x790] sm:$0xff] }
 0x20e   : > { %v2971_v8 = vsel %vm2970_vm13, %v4003_v52, %v2967_v17  ;;  %v3413_v3 = vmul.f32 1.442695, %v3238_v45  ;;  %v3240_v40 = vmul.f32 %v2962_v57, %v1800_v36  ;;  %v3415_v61 = vmul.f32 1.442695, %v3239_v13 }
 0x20f   : > { %v2976_v6 = vsel %vm6859_vm6, %v2975_v9, %v2971_v8  ;;  %4006 = vpow2.f32 %v3411_v1  ;;  %v2985_v59 = vsel %vm2984_vm15, %v4005_v16, %v2981_v62  ;;  %v1162_v4 = vmul.f32 %v6798_v26, %v6798_v26 }
 0x210   : > { %v3241_v2 = vmul.f32 %v2976_v6, %v1801_v42  ;;  %4008 = vpow2.f32 %v3413_v3  ;;  %v2990_v5 = vsel %vm6871_vm14, %v2989_v29, %v2985_v59  ;;  %v3417_v41 = vmul.f32 1.442695, %v3240_v40 }
 0x211   : > { %4010 = vpow2.f32 %v3415_v61  ;;  %v1163_v47 = vmul.f32 %v6801_v43, %v6801_v43  ;;  %v3242_v36 = vmul.f32 %v2990_v5, %v1802_v58  ;;  %v1164_v9 = vmul.f32 %v876_v0, %v876_v0 }
 0x212   : > { %v3419_v50 = vmul.f32 1.442695, %v3241_v2  ;;  %v1165_v30 = vmul.f32 %v877_v33, %v877_v33  ;;  %4012 = vpow2.f32 %v3417_v41  ;;  %v1166_v42 = vmul.f32 %v878_v35, %v878_v35  ;;  %v8895_v35 = vld [vmem:[#allocation47_spill] sm:$0xff] }
 0x213   : > { %v3421_v26 = vmul.f32 1.442695, %v3242_v36  ;;  %v1449_v34 = vmul.f32 %v1161_v25, %v1161_v25  ;;  %v1450_v52 = vmul.f32 %v1162_v4, %v1162_v4  ;;  %v1451_v63 = vmul.f32 %v1163_v47, %v1163_v47 }
 0x214   : > { %4014 = vpow2.f32 %v3419_v50  ;;  %v1452_v43 = vmul.f32 %v1164_v9, %v1164_v9  ;;  %v1453_v28 = vmul.f32 %v1165_v30, %v1165_v30  ;;  %v1454_v58 = vmul.f32 %v1166_v42, %v1166_v42 }
 0x215   : > { %v4007_v23 = vpop.eup %4006  ;;  %4016 = vpow2.f32 %v3421_v26  ;;  %v1545_v0 = vmul.f32 3.38, %v1449_v34  ;;  %v1546_v39 = vmul.f32 3.38, %v1450_v52  ;;  %v6930_v24 = vadd.f32 %v8890_v11, %v1161_v25 }
 0x216   : > { %v4009_v27 = vpop.eup %4008  ;;  %3526 = vst [vmem:[%s5316_s18 + $0x270] sm:$0xff] %v4007_v23  ;;  %v1547_v44 = vmul.f32 3.38, %v1451_v63  ;;  %v1548_v16 = vmul.f32 3.38, %v1452_v43  ;;  %v6933_v29 = vadd.f32 %v8891_v7, %v1162_v4  ;;  %v6942_v12 = vadd.f32 %v8892_v49, %v1163_v47 }
 0x217   : > { %v4011_v21 = vpop.eup %4010  ;;  %3527 = vst [vmem:[%s5316_s18 + $0x278] sm:$0xff] %v4009_v27  ;;  %v1549_v33 = vmul.f32 3.38, %v1453_v28  ;;  %v6935_v53 = vadd.f32 0.083333336, %v1545_v0  ;;  %v6955_v22 = vadd.f32 %v8893_v54, %v1164_v9  ;;  %v6962_v10 = vadd.f32 %v8894_v37, %v1165_v30 }
 0x218   : > { %3528 = vst [vmem:[%s5316_s18 + $0x280] sm:$0xff] %v4011_v21  ;;  %v4013_v38 = vpop.eup %4012  ;;  %v6944_v48 = vadd.f32 0.083333336, %v1546_v39  ;;  %v6946_v19 = vadd.f32 0.083333336, %v1547_v44  ;;  %v6965_v46 = vadd.f32 %v8895_v35, %v1166_v42  ;;  %v1737_v20 = vsub.f32 0.0, %v6930_v24 }
 0x219   : > { %3529 = vst [vmem:[%s5316_s18 + $0x288] sm:$0xff] %v4013_v38  ;;  %v1550_v51 = vmul.f32 3.38, %v1454_v58  ;;  %4018 = vrcp.f32 %v6935_v53  ;;  %v6967_v17 = vadd.f32 0.083333336, %v1548_v16  ;;  %vm8896_vm9 = vcmask 433152  }
 0x21a   : > { %v4015_v55 = vpop.eup %4014  ;;  %v1738_v45 = vsub.f32 0.0, %v6933_v29  ;;  %4020 = vrcp.f32 %v6944_v48  ;;  %v6975_v31 = vsub.f32 %v3755_v18, %v6951_v60  ;;  %v6978_v13 = vsub.f32 %v3756_v14, %v6951_v60  ;;  %v3758_v18 = vld [vmem:[%s8557_s0 + $0x798] sm:$0xff]  ;;  %v3759_v24 = vld [vmem:[%s8557_s0 + $0x7a0] sm:$0xff] }
 0x21b   : > { %3530 = vst [vmem:[%s5316_s18 + $0x290] sm:$0xff] %v4015_v55  ;;  %v4017_v15 = vpop.eup %4016  ;;  %v6980_v1 = vadd.f32 0.083333336, %v1549_v33  ;;  %v1739_v25 = vsub.f32 0.0, %v6942_v12  ;;  %4022 = vrcp.f32 %v6946_v19  ;;  %v6985_v57 = vsub.f32 %v3757_v32, %v6951_v60 }
 0x21c   : > { %3531 = vst.msk [vmem:[%s5316_s18 + $0x298] sm:$0xff] %vm8896_vm9, %v4017_v15  ;;  %v6987_v8 = vadd.f32 0.083333336, %v1550_v51  ;;  %v1740_v62 = vsub.f32 0.0, %v6955_v22  ;;  %v2076_v3 = vand.u32 2147483647, %v6935_v53  ;;  %4024 = vrcp.f32 %v6967_v17 }
 0x21d   : > { %v2078_v6 = vand.u32 2147483648, %v6935_v53  ;;  %v1741_v40 = vsub.f32 0.0, %v6962_v10  ;;  %v2090_v61 = vand.u32 2147483647, %v6944_v48  ;;  %v2092_v59 = vand.u32 2147483648, %v6944_v48 }
 0x21e   : > { %v1742_v4 = vsub.f32 0.0, %v6965_v46  ;;  %vm2072_vm11 = vweird.f32 %v6935_v53  ;;  %v2104_v5 = vand.u32 2147483647, %v6946_v19  ;;  %v2106_v41 = vand.u32 2147483648, %v6946_v19 }
 0x21f   : > { %v4019_v2 = vpop.eup %4018  ;;  %vm2086_vm10 = vweird.f32 %v6944_v48  ;;  %v2120_v36 = vand.u32 2147483648, %v6967_v17  ;;  %4026 = vrcp.f32 %v6980_v1  ;;  %vm7004_vm4 = vcmp.eq.f32.partialorder %v2076_v3, 8.507059e+37 }
 0x220   : > { %v2068_v47 = vmul.f32 %v4019_v2, %v6935_v53  ;;  %v4021_v50 = vpop.eup %4020  ;;  %v2079_v30 = vor.u32 1.1754944e-38, %v2078_v6  ;;  %vm2100_vm8 = vweird.f32 %v6946_v19  ;;  %v2118_v42 = vand.u32 2147483647, %v6967_v17 }
 0x221   : > { %v2134_v26 = vand.u32 2147483648, %v6980_v1  ;;  %v4023_v23 = vpop.eup %4022  ;;  %v2082_v52 = vmul.f32 %v4021_v50, %v6944_v48  ;;  %vm7012_vm14 = vcmp.eq.f32.partialorder %v2090_v61, 8.507059e+37  ;;  %v2093_v63 = vor.u32 1.1754944e-38, %v2092_v59 }
 0x222   : > { %v2069_v34 = vsub.f32 1.0, %v2068_v47  ;;  %4028 = vrcp.f32 %v6987_v8  ;;  %vm2073_vm6 = vweird.f32 %v4019_v2  ;;  %v2096_v43 = vmul.f32 %v4023_v23, %v6946_v19  ;;  %v4025_v0 = vpop.eup %4024 }
 0x223   : > { %vm7018_vm0 = vcmp.eq.f32.partialorder %v2104_v5, 8.507059e+37  ;;  %v2107_v21 = vor.u32 1.1754944e-38, %v2106_v41  ;;  %vm2114_vm5 = vweird.f32 %v6967_v17  ;;  %v2132_v58 = vand.u32 2147483647, %v6980_v1  ;;  %vm2074_vm1 = vmor %vm2072_vm11, %vm2073_vm6 }
 0x224   : > { %v2070_v39 = vmul.f32 %v4019_v2, %v2069_v34  ;;  %v2083_v11 = vsub.f32 1.0, %v2082_v52  ;;  %vm2087_vm2 = vweird.f32 %v4021_v50  ;;  %v2121_v44 = vor.u32 1.1754944e-38, %v2120_v36 }
 0x225   : > { %v2097_v16 = vsub.f32 1.0, %v2096_v43  ;;  %vm2101_vm3 = vweird.f32 %v4023_v23  ;;  %v2110_v38 = vmul.f32 %v4025_v0, %v6967_v17  ;;  %vm7025_vm7 = vcmp.eq.f32.partialorder %v2118_v42, 8.507059e+37  ;;  %v4027_v55 = vpop.eup %4026  ;;  %vm2088_vm11 = vmor %vm2086_vm10, %vm2087_vm2  ;;  %v3760_v17 = vld [vmem:[%s8557_s0 + $0x7a8] sm:$0xff]  ;;  %v7123_v42 = vpop.permute.xlu1 %816 }
 0x226   : > { %v2135_v33 = vor.u32 1.1754944e-38, %v2134_v26  ;;  %v2071_v49 = vadd.f32 %v4019_v2, %v2070_v39  ;;  %v2084_v14 = vmul.f32 %v4021_v50, %v2083_v11  ;;  %v2146_v54 = vand.u32 2147483647, %v6987_v8  ;;  %vm2102_vm6 = vmor %vm2100_vm8, %vm2101_vm3 }
 0x227   : > { %v2148_v51 = vand.u32 2147483648, %v6987_v8  ;;  %v2098_v32 = vmul.f32 %v4023_v23, %v2097_v16  ;;  %v2111_v15 = vsub.f32 1.0, %v2110_v38  ;;  %vm2115_vm13 = vweird.f32 %v4025_v0 }
 0x228   : > { %v2124_v37 = vmul.f32 %v4027_v55, %v6980_v1  ;;  %vm7039_vm15 = vcmp.eq.f32.partialorder %v2132_v58, 8.507059e+37  ;;  %v4029_v3 = vpop.eup %4028  ;;  %v2075_v6 = vsel %vm2074_vm1, %v4019_v2, %v2071_v49  ;;  %v2085_v61 = vadd.f32 %v4021_v50, %v2084_v14  ;;  %vm2116_vm10 = vmor %vm2114_vm5, %vm2115_vm13 }
 0x229   : > { %vm2129_vm9 = vweird.f32 %v4027_v55  ;;  %vm2142_vm12 = vweird.f32 %v6987_v8  ;;  %v906_v59 = vsub.f32 %v3758_v18, %v6951_v60  ;;  %v2080_v53 = vsel %vm7004_vm4, %v2079_v30, %v2075_v6  ;;  %v8911_v6 = vld [vmem:[#allocation73_spill] sm:$0xff] }
 0x22a   : > { %v2099_v5 = vadd.f32 %v4023_v23, %v2098_v32  ;;  %v2112_v41 = vmul.f32 %v4025_v0, %v2111_v15  ;;  %v2125_v47 = vsub.f32 1.0, %v2124_v37  ;;  %v2089_v36 = vsel %vm2088_vm11, %v4021_v50, %v2085_v61 }
 0x22b   : > { %v2138_v2 = vmul.f32 %v4029_v3, %v6987_v8  ;;  %vm7054_vm1 = vcmp.eq.f32.partialorder %v2146_v54, 8.507059e+37  ;;  %v2149_v9 = vor.u32 1.1754944e-38, %v2148_v51  ;;  %v3177_v30 = vmul.f32 %v2080_v53, %v1737_v20  ;;  %v8910_v51 = vld [vmem:[#allocation72_spill] sm:$0xff] }
 0x22c   : > { %v2094_v48 = vsel %vm7012_vm14, %v2093_v63, %v2089_v36  ;;  %v2103_v26 = vsel %vm2102_vm6, %v4023_v23, %v2099_v5  ;;  %v2113_v34 = vadd.f32 %v4025_v0, %v2112_v41  ;;  %v2126_v50 = vmul.f32 %v4027_v55, %v2125_v47  ;;  %v8912_v5 = vld [vmem:[#allocation74_spill] sm:$0xff] }
 0x22d   : > { %v2108_v19 = vsel %vm7018_vm0, %v2107_v21, %v2103_v26  ;;  %v2139_v52 = vsub.f32 1.0, %v2138_v2  ;;  %v3178_v43 = vmul.f32 %v2094_v48, %v1738_v45  ;;  %v3291_v58 = vmul.f32 1.442695, %v3177_v30  ;;  %v3743_v2 = vld [vmem:[%s8557_s0 + $0x720] sm:$0xff]  ;;  %v8913_v30 = vld [vmem:[#allocation75_spill] sm:$0xff] }
 0x22e   : > { %v2117_v20 = vsel %vm2116_vm10, %v4025_v0, %v2113_v34  ;;  %v2127_v23 = vadd.f32 %v4027_v55, %v2126_v50  ;;  %vm2143_vm4 = vweird.f32 %v4029_v3  ;;  %v3179_v27 = vmul.f32 %v2108_v19, %v1739_v25  ;;  %v3744_v34 = vld [vmem:[%s8557_s0 + $0x728] sm:$0xff]  ;;  %v8914_v50 = vld [vmem:[#allocation76_spill] sm:$0xff] }
 0x22f   : > { %v2122_v63 = vsel %vm7025_vm7, %v2121_v44, %v2117_v20  ;;  %vm8909_vm8 = vweird.f32 %v6980_v1  ;;  %v2140_v29 = vmul.f32 %v4029_v3, %v2139_v52  ;;  %4030 = vpow2.f32 %v3291_v58  ;;  %vm2144_vm0 = vmor %vm2142_vm12, %vm2143_vm4  ;;  %v8915_v52 = vld [vmem:[#allocation77_spill] sm:$0xff]  ;;  %v3745_v20 = vld [vmem:[%s8557_s0 + $0x730] sm:$0xff] }
 0x230   : > { %vm2130_vm14 = vmor %vm8909_vm8, %vm2129_vm9  ;;  %v3293_v45 = vmul.f32 1.442695, %v3178_v43  ;;  %v3180_v21 = vmul.f32 %v2122_v63, %v1740_v62  ;;  %v3295_v12 = vmul.f32 1.442695, %v3179_v27  ;;  %v907_v25 = vsub.f32 %v3759_v24, %v6951_v60 }
 0x231   : > { %v2131_v28 = vsel %vm2130_vm14, %v4027_v55, %v2127_v23  ;;  %v2141_v39 = vadd.f32 %v4029_v3, %v2140_v29  ;;  %v908_v11 = vsub.f32 %v3760_v17, %v6951_v60  ;;  %v1191_v62 = vmul.f32 %v6975_v31, %v6975_v31 }
 0x232   : > { %v2136_v0 = vsel %vm7039_vm15, %v2135_v33, %v2131_v28  ;;  %4032 = vpow2.f32 %v3293_v45  ;;  %v3297_v22 = vmul.f32 1.442695, %v3180_v21  ;;  %v1192_v16 = vmul.f32 %v6978_v13, %v6978_v13 }
 0x233   : > { %v3181_v1 = vmul.f32 %v2136_v0, %v1741_v40  ;;  %4034 = vpow2.f32 %v3295_v12  ;;  %v2145_v44 = vsel %vm2144_vm0, %v4029_v3, %v2141_v39  ;;  %v1193_v60 = vmul.f32 %v6985_v57, %v6985_v57 }
 0x234   : > { %v1194_v38 = vmul.f32 %v906_v59, %v906_v59  ;;  %v2150_v8 = vsel %vm7054_vm1, %v2149_v9, %v2145_v44  ;;  %4036 = vpow2.f32 %v3297_v22  ;;  %v1195_v40 = vmul.f32 %v907_v25, %v907_v25 }
 0x235   : > { %v3299_v10 = vmul.f32 1.442695, %v3181_v1  ;;  %v4031_v7 = vpop.eup %4030  ;;  %v3182_v33 = vmul.f32 %v2150_v8, %v1742_v4  ;;  %v1196_v31 = vmul.f32 %v908_v11, %v908_v11  ;;  %v1479_v13 = vmul.f32 %v1191_v62, %v1191_v62 }
 0x236   : > { %3466 = vst [vmem:[%s5316_s18 + $0x90] sm:$0xff] %v4031_v7  ;;  %v1480_v57 = vmul.f32 %v1192_v16, %v1192_v16  ;;  %v1481_v49 = vmul.f32 %v1193_v60, %v1193_v60  ;;  %v1482_v14 = vmul.f32 %v1194_v38, %v1194_v38  ;;  %v7106_v32 = vadd.f32 %v8910_v51, %v1191_v62 }
 0x237   : > { %4038 = vpow2.f32 %v3299_v10  ;;  %v3301_v55 = vmul.f32 1.442695, %v3182_v33  ;;  %v1483_v15 = vmul.f32 %v1195_v40, %v1195_v40  ;;  %v1575_v37 = vmul.f32 3.38, %v1479_v13 }
 0x238   : > { %v4033_v18 = vpop.eup %4032  ;;  %v1484_v46 = vmul.f32 %v1196_v31, %v1196_v31  ;;  %v1576_v4 = vmul.f32 3.38, %v1480_v57  ;;  %v1577_v35 = vmul.f32 3.38, %v1481_v49  ;;  %v7110_v61 = vadd.f32 %v8911_v6, %v1192_v16  ;;  %v3746_v57 = vld [vmem:[%s8557_s0 + $0x738] sm:$0xff] }
 0x239   : > { %v4035_v54 = vpop.eup %4034  ;;  %3467 = vst [vmem:[%s5316_s18 + $0x98] sm:$0xff] %v4033_v18  ;;  %4040 = vpow2.f32 %v3301_v55  ;;  %v1578_v59 = vmul.f32 3.38, %v1482_v14  ;;  %v1579_v53 = vmul.f32 3.38, %v1483_v15  ;;  %v7114_v41 = vadd.f32 %v8912_v5, %v1193_v60  ;;  %v3747_v15 = vld [vmem:[%s8557_s0 + $0x740] sm:$0xff] }
 0x23a   : > { %3468 = vst [vmem:[%s5316_s18 + $0xa0] sm:$0xff] %v4035_v54  ;;  %v4037_v3 = vpop.eup %4036  ;;  %v7116_v47 = vadd.f32 0.083333336, %v1575_v37  ;;  %v7118_v36 = vadd.f32 0.083333336, %v1576_v4  ;;  %v7126_v48 = vadd.f32 %v8913_v30, %v1194_v38  ;;  %v7135_v19 = vadd.f32 %v8914_v50, %v1195_v40 }
 0x23b   : > { %3469 = vst [vmem:[%s5316_s18 + $0xa8] sm:$0xff] %v4037_v3  ;;  %v7128_v26 = vadd.f32 0.083333336, %v1577_v35  ;;  %v7138_v43 = vadd.f32 %v8915_v52, %v1196_v31  ;;  %v1580_v58 = vmul.f32 3.38, %v1484_v46  ;;  %v1767_v24 = vsub.f32 0.0, %v7106_v32 }
 0x23c   : > { %v7144_v23 = vadd.f32 0.083333336, %v1578_v59  ;;  %v1768_v27 = vsub.f32 0.0, %v7110_v61  ;;  %4042 = vrcp.f32 %v7116_v47  ;;  %v7149_v17 = vsub.f32 %v3743_v2, %v7123_v42 }
 0x23d   : > { %v4039_v9 = vpop.eup %4038  ;;  %v7151_v29 = vadd.f32 0.083333336, %v1579_v53  ;;  %v1769_v45 = vsub.f32 0.0, %v7114_v41  ;;  %4044 = vrcp.f32 %v7118_v36  ;;  %v7156_v28 = vsub.f32 %v3744_v34, %v7123_v42 }
 0x23e   : > { %3470 = vst [vmem:[%s5316_s18 + $0xb0] sm:$0xff] %v4039_v9  ;;  %vm8916_vm5 = vcmask 433152   ;;  %v2498_v21 = vand.u32 2147483648, %v7116_v47  ;;  %v2512_v12 = vand.u32 2147483648, %v7118_v36  ;;  %4046 = vrcp.f32 %v7128_v26 }
 0x23f   : > { %v4041_v63 = vpop.eup %4040  ;;  %v7164_v25 = vsub.f32 %v3745_v20, %v7123_v42  ;;  %v7166_v0 = vadd.f32 0.083333336, %v1580_v58  ;;  %v1770_v39 = vsub.f32 0.0, %v7126_v48  ;;  %v2496_v11 = vand.u32 2147483647, %v7116_v47  ;;  %v235_v48 = vld [vmem:[%s8557_s0 + $0x2b0] sm:$0xff] }
 0x240   : > { %3471 = vst.msk [vmem:[%s5316_s18 + $0xb8] sm:$0xff] %vm8916_vm5, %v4041_v63  ;;  %v2526_v1 = vand.u32 2147483648, %v7128_v26  ;;  %v1771_v22 = vsub.f32 0.0, %v7135_v19  ;;  %v2510_v62 = vand.u32 2147483647, %v7118_v36  ;;  %4048 = vrcp.f32 %v7144_v23 }
 0x241   : > { %v2540_v44 = vand.u32 2147483648, %v7144_v23  ;;  %v1772_v16 = vsub.f32 0.0, %v7138_v43  ;;  %vm2492_vm2 = vweird.f32 %v7116_v47  ;;  %v2524_v60 = vand.u32 2147483647, %v7128_v26 }
 0x242   : > { %4050 = vrcp.f32 %v7151_v29  ;;  %v7179_v38 = vpop.eup %4042  ;;  %v2499_v8 = vor.u32 1.1754944e-38, %v2498_v21  ;;  %vm2506_vm3 = vweird.f32 %v7118_v36  ;;  %v7182_v10 = vor.u32 1.1754944e-38, %v2512_v12  ;;  %v3748_v21 = vld [vmem:[%s8557_s0 + $0x748] sm:$0xff] }
 0x243   : > { %v2538_v40 = vand.u32 2147483647, %v7144_v23  ;;  %v2554_v7 = vand.u32 2147483648, %v7151_v29  ;;  %v7186_v33 = vpop.eup %4044  ;;  %v2488_v31 = vmul.f32 %v7179_v38, %v7116_v47  ;;  %vm7190_vm7 = vcmp.eq.f32.partialorder %v2496_v11, 8.507059e+37 }
 0x244   : > { %vm2520_vm12 = vweird.f32 %v7128_v26  ;;  %v2527_v18 = vor.u32 1.1754944e-38, %v2526_v1  ;;  %v7195_v55 = vor.u32 1.1754944e-38, %v2540_v44  ;;  %4052 = vrcp.f32 %v7166_v0  ;;  %v4047_v49 = vpop.eup %4046 }
 0x245   : > { %vm2493_vm13 = vweird.f32 %v7179_v38  ;;  %v2502_v14 = vmul.f32 %v7186_v33, %v7118_v36  ;;  %vm2507_vm15 = vweird.f32 %v7186_v33  ;;  %vm7205_vm9 = vcmp.eq.f32.partialorder %v2510_v62, 8.507059e+37 }
 0x246   : > { %v2552_v51 = vand.u32 2147483647, %v7151_v29  ;;  %v2489_v37 = vsub.f32 1.0, %v2488_v31  ;;  %v2516_v46 = vmul.f32 %v4047_v49, %v7128_v26  ;;  %vm2521_vm11 = vweird.f32 %v4047_v49  ;;  %v4049_v3 = vpop.eup %4048  ;;  %vm2494_vm10 = vmor %vm2492_vm2, %vm2493_vm13 }
 0x247   : > { %vm7214_vm6 = vcmp.eq.f32.partialorder %v2524_v60, 8.507059e+37  ;;  %v2555_v35 = vor.u32 1.1754944e-38, %v2554_v7  ;;  %v2503_v6 = vsub.f32 1.0, %v2502_v14  ;;  %v2566_v59 = vand.u32 2147483647, %v7166_v0  ;;  %vm2508_vm1 = vmor %vm2506_vm3, %vm2507_vm15 }
 0x248   : > { %v2568_v53 = vand.u32 2147483648, %v7166_v0  ;;  %v7223_v5 = vsub.f32 %v3746_v57, %v7123_v42  ;;  %v4051_v2 = vpop.eup %4050  ;;  %v2490_v9 = vmul.f32 %v7179_v38, %v2489_v37  ;;  %v2517_v30 = vsub.f32 1.0, %v2516_v46  ;;  %vm2522_vm2 = vmor %vm2520_vm12, %vm2521_vm11 }
 0x249   : > { %v2530_v34 = vmul.f32 %v4049_v3, %v7144_v23  ;;  %vm7227_vm4 = vcmp.eq.f32.partialorder %v2538_v40, 8.507059e+37  ;;  %v7232_v52 = vsub.f32 %v3747_v15, %v7123_v42  ;;  %v2504_v58 = vmul.f32 %v7186_v33, %v2503_v6 }
 0x24a   : > { %vm2535_vm8 = vweird.f32 %v4049_v3  ;;  %v2544_v20 = vmul.f32 %v4051_v2, %v7151_v29  ;;  %vm7236_vm0 = vcmp.eq.f32.partialorder %v2552_v51, 8.507059e+37  ;;  %v4053_v12 = vpop.eup %4052  ;;  %v2491_v11 = vadd.f32 %v7179_v38, %v2490_v9 }
 0x24b   : > { %v2518_v1 = vmul.f32 %v4047_v49, %v2517_v30  ;;  %v2531_v62 = vsub.f32 1.0, %v2530_v34  ;;  %v2569_v44 = vor.u32 1.1754944e-38, %v2568_v53  ;;  %v2505_v60 = vadd.f32 %v7186_v33, %v2504_v58  ;;  %v8933_v34 = vld [vmem:[#allocation2_spill] sm:$0xff] }
 0x24c   : > { %v2545_v40 = vsub.f32 1.0, %v2544_v20  ;;  %v2558_v7 = vmul.f32 %v4053_v12, %v7166_v0  ;;  %vm2563_vm5 = vweird.f32 %v4053_v12  ;;  %vm7251_vm14 = vcmp.eq.f32.partialorder %v2566_v59, 8.507059e+37 }
 0x24d   : > { %v2495_v57 = vsel %vm2494_vm10, %v7179_v38, %v2491_v11  ;;  %v2519_v14 = vadd.f32 %v4047_v49, %v2518_v1  ;;  %v2532_v47 = vmul.f32 %v4049_v3, %v2531_v62  ;;  %v896_v51 = vsub.f32 %v3748_v21, %v7123_v42 }
 0x24e   : > { %v2500_v15 = vsel %vm7190_vm7, %v2499_v8, %v2495_v57  ;;  %v2509_v37 = vsel %vm2508_vm1, %v7186_v33, %v2505_v60  ;;  %v2546_v46 = vmul.f32 %v4051_v2, %v2545_v40  ;;  %v2559_v38 = vsub.f32 1.0, %v2558_v7 }
 0x24f   : > { %v2514_v36 = vsel %vm7205_vm9, %v7182_v10, %v2509_v37  ;;  %v2523_v6 = vsel %vm2522_vm2, %v4047_v49, %v2519_v14  ;;  %v2533_v59 = vadd.f32 %v4049_v3, %v2532_v47  ;;  %v3207_v42 = vmul.f32 %v2500_v15, %v1767_v24  ;;  %v8934_v47 = vld [vmem:[#allocation24_spill] sm:$0xff] }
 0x250   : > { %v2528_v8 = vsel %vm7214_vm6, %v2527_v18, %v2523_v6  ;;  %vm8929_vm3 = vweird.f32 %v7144_v23  ;;  %v2547_v26 = vadd.f32 %v4051_v2, %v2546_v46  ;;  %v2560_v33 = vmul.f32 %v4053_v12, %v2559_v38 }
 0x251   : > { %vm2536_vm7 = vmor %vm8929_vm3, %vm2535_vm8  ;;  %v3208_v13 = vmul.f32 %v2514_v36, %v1768_v27  ;;  %vm8930_vm12 = vweird.f32 %v4051_v2  ;;  %vm8931_vm13 = vweird.f32 %v7151_v29  ;;  %v3209_v32 = vmul.f32 %v2528_v8, %v1769_v45  ;;  %v234_v45 = vld [vmem:[%s8557_s0 + $0x2a8] sm:$0xff]  ;;  %v8935_v36 = vld [vmem:[#allocation25_spill] sm:$0xff] }
 0x252   : > { %v2537_v53 = vsel %vm2536_vm7, %v4049_v3, %v2533_v59  ;;  %vm2550_vm15 = vmor %vm8931_vm13, %vm8930_vm12  ;;  %v3351_v24 = vmul.f32 1.442695, %v3207_v42  ;;  %v1179_v10 = vmul.f32 %v7149_v17, %v7149_v17  ;;  %v2561_v49 = vadd.f32 %v4053_v12, %v2560_v33  ;;  %v233_v17 = vld [vmem:[%s8557_s0 + $0x2a0] sm:$0xff]  ;;  %v3773_v8 = vld [vmem:[%s8557_s0 + $0x810] sm:$0xff] }
 0x253   : > { %v2542_v23 = vsel %vm7227_vm4, %v7195_v55, %v2537_v53  ;;  %v2551_v18 = vsel %vm2550_vm15, %v4051_v2, %v2547_v26  ;;  %v3353_v61 = vmul.f32 1.442695, %v3208_v13  ;;  %vm8932_vm9 = vweird.f32 %v7166_v0  ;;  %v8936_v13 = vld [vmem:[#allocation26_spill] sm:$0xff] }
 0x254   : > { %v2556_v27 = vsel %vm7236_vm0, %v2555_v35, %v2551_v18  ;;  %vm2564_vm11 = vmor %vm8932_vm9, %vm2563_vm5  ;;  %v3210_v41 = vmul.f32 %v2542_v23, %v1770_v39  ;;  %4054 = vpow2.f32 %v3351_v24  ;;  %v3355_v29 = vmul.f32 1.442695, %v3209_v32  ;;  %v236_v39 = vld [vmem:[%s8557_s0 + $0x2b8] sm:$0xff]  ;;  %v7369_v23 = vpop.permute.xlu0 %836 }
 0x255   : > { %v2565_v55 = vsel %vm2564_vm11, %v4053_v12, %v2561_v49  ;;  %v3211_v54 = vmul.f32 %v2556_v27, %v1771_v22  ;;  %4056 = vpow2.f32 %v3353_v61  ;;  %v1180_v0 = vmul.f32 %v7156_v28, %v7156_v28  ;;  %v237_v28 = vld [vmem:[%s8557_s0 + $0x2c0] sm:$0xff]  ;;  %v238_v22 = vld [vmem:[%s8557_s0 + $0x2c8] sm:$0xff] }
 0x256   : > { %v2570_v4 = vsel %vm7251_vm14, %v2569_v44, %v2565_v55  ;;  %4058 = vpow2.f32 %v3355_v29  ;;  %v3357_v35 = vmul.f32 1.442695, %v3210_v41  ;;  %v1181_v19 = vmul.f32 %v7164_v25, %v7164_v25  ;;  %v8937_v49 = vld [vmem:[#allocation27_spill] sm:$0xff]  ;;  %v3775_v41 = vld [vmem:[%s8557_s0 + $0x820] sm:$0xff]  ;;  %v8939_v55 = vld [vmem:[#allocation29_spill] sm:$0xff] }
 0x257   : > { %v3212_v3 = vmul.f32 %v2570_v4, %v1772_v16  ;;  %v3359_v2 = vmul.f32 1.442695, %v3211_v54  ;;  %v1182_v9 = vmul.f32 %v7223_v5, %v7223_v5  ;;  %v1183_v30 = vmul.f32 %v7232_v52, %v7232_v52 }
 0x258   : > { %v619_v25 = vsub.f32 %v233_v17, %v8933_v34  ;;  %v620_v50 = vsub.f32 %v234_v45, %v8933_v34  ;;  %4060 = vpow2.f32 %v3357_v35  ;;  %v1184_v58 = vmul.f32 %v896_v51, %v896_v51  ;;  %v8938_v17 = vld [vmem:[#allocation28_spill] sm:$0xff] }
 0x259   : > { %v621_v20 = vsub.f32 %v235_v48, %v8933_v34  ;;  %v622_v63 = vsub.f32 %v236_v39, %v8933_v34  ;;  %4062 = vpow2.f32 %v3359_v2  ;;  %v3361_v43 = vmul.f32 1.442695, %v3212_v3 }
 0x25a   : > { %v4055_v16 = vpop.eup %4054  ;;  %v623_v5 = vsub.f32 %v237_v28, %v8933_v34  ;;  %v7334_v21 = vsub.f32 %v238_v22, %v8933_v34  ;;  %v1467_v52 = vmul.f32 %v1179_v10, %v1179_v10  ;;  %v1468_v12 = vmul.f32 %v1180_v0, %v1180_v0 }
 0x25b   : > { %v4057_v11 = vpop.eup %4056  ;;  %4064 = vpow2.f32 %v3361_v43  ;;  %3496 = vst [vmem:[%s5316_s18 + $0x180] sm:$0xff] %v4055_v16  ;;  %v1469_v1 = vmul.f32 %v1181_v19, %v1181_v19  ;;  %v1470_v62 = vmul.f32 %v1182_v9, %v1182_v9  ;;  %v1471_v44 = vmul.f32 %v1183_v30, %v1183_v30 }
 0x25c   : > { %v4059_v60 = vpop.eup %4058  ;;  %v7337_v40 = vmul.f32 %v619_v25, %v619_v25  ;;  %3497 = vst [vmem:[%s5316_s18 + $0x188] sm:$0xff] %v4057_v11  ;;  %v1472_v7 = vmul.f32 %v1184_v58, %v1184_v58  ;;  %v1563_v31 = vmul.f32 3.38, %v1467_v52  ;;  %v1564_v57 = vmul.f32 3.38, %v1468_v12 }
 0x25d   : > { %v7340_v14 = vmul.f32 %v620_v50, %v620_v50  ;;  %3498 = vst [vmem:[%s5316_s18 + $0x190] sm:$0xff] %v4059_v60  ;;  %v7344_v51 = vadd.f32 %v8934_v47, %v1179_v10  ;;  %v1565_v15 = vmul.f32 3.38, %v1469_v1  ;;  %v1566_v37 = vmul.f32 3.38, %v1470_v62  ;;  %v3774_v10 = vld [vmem:[%s8557_s0 + $0x818] sm:$0xff] }
 0x25e   : > { %v4061_v46 = vpop.eup %4060  ;;  %v7346_v38 = vmul.f32 %v621_v20, %v621_v20  ;;  %v7349_v6 = vadd.f32 %v8935_v36, %v1180_v0  ;;  %v1567_v59 = vmul.f32 3.38, %v1471_v44  ;;  %v7351_v42 = vadd.f32 0.083333336, %v1563_v31 }
 0x25f   : > { %v4063_v26 = vpop.eup %4062  ;;  %v7356_v33 = vmul.f32 %v622_v63, %v622_v63  ;;  %3499 = vst [vmem:[%s5316_s18 + $0x198] sm:$0xff] %v4061_v46  ;;  %v7360_v53 = vadd.f32 %v8936_v13, %v1181_v19  ;;  %v7362_v32 = vadd.f32 0.083333336, %v1564_v57  ;;  %v7364_v24 = vadd.f32 0.083333336, %v1565_v15 }
 0x260   : > { %v7371_v18 = vmul.f32 %v623_v5, %v623_v5  ;;  %3500 = vst [vmem:[%s5316_s18 + $0x1a0] sm:$0xff] %v4063_v26  ;;  %v7375_v61 = vadd.f32 %v8937_v49, %v1182_v9  ;;  %v1568_v27 = vmul.f32 3.38, %v1472_v7  ;;  %4066 = vrcp.f32 %v7351_v42 }
 0x261   : > { %v4065_v29 = vpop.eup %4064  ;;  %v7382_v45 = vadd.f32 %v8938_v17, %v1183_v30  ;;  %v7385_v54 = vadd.f32 %v8939_v55, %v1184_v58  ;;  %v7387_v0 = vadd.f32 0.083333336, %v1566_v37  ;;  %v1755_v48 = vsub.f32 0.0, %v7344_v51  ;;  %v3777_v51 = vld [vmem:[%s8557_s0 + $0x830] sm:$0xff] }
 0x262   : > { %vm8940_vm6 = vcmask 433152   ;;  %v1756_v39 = vsub.f32 0.0, %v7349_v6  ;;  %4068 = vrcp.f32 %v7362_v32  ;;  %v7395_v4 = vsub.f32 %v3773_v8, %v7369_v23 }
 0x263   : > { %3501 = vst.msk [vmem:[%s5316_s18 + $0x1a8] sm:$0xff] %vm8940_vm6, %v4065_v29  ;;  %v7398_v35 = vsub.f32 %v3774_v10, %v7369_v23  ;;  %v7400_v19 = vadd.f32 0.083333336, %v1567_v59  ;;  %v1757_v28 = vsub.f32 0.0, %v7360_v53  ;;  %4070 = vrcp.f32 %v7364_v24 }
 0x264   : > { %v7405_v22 = vsub.f32 %v3775_v41, %v7369_v23  ;;  %v7407_v3 = vadd.f32 0.083333336, %v1568_v27  ;;  %v1758_v2 = vsub.f32 0.0, %v7375_v61  ;;  %v2328_v9 = vand.u32 2147483647, %v7351_v42  ;;  %v3776_v41 = vld [vmem:[%s8557_s0 + $0x828] sm:$0xff] }
 0x265   : > { %v2330_v30 = vand.u32 2147483648, %v7351_v42  ;;  %v1759_v34 = vsub.f32 0.0, %v7382_v45  ;;  %v2342_v25 = vand.u32 2147483647, %v7362_v32  ;;  %v2344_v50 = vand.u32 2147483648, %v7362_v32 }
 0x266   : > { %4072 = vrcp.f32 %v7387_v0  ;;  %v4067_v58 = vpop.eup %4066  ;;  %v1760_v20 = vsub.f32 0.0, %v7385_v54  ;;  %vm2324_vm1 = vweird.f32 %v7351_v42  ;;  %v2356_v63 = vand.u32 2147483647, %v7364_v24 }
 0x267   : > { %v2358_v43 = vand.u32 2147483648, %v7364_v24  ;;  %v2320_v16 = vmul.f32 %v4067_v58, %v7351_v42  ;;  %vm2338_vm10 = vweird.f32 %v7362_v32  ;;  %v2372_v5 = vand.u32 2147483648, %v7387_v0 }
 0x268   : > { %4074 = vrcp.f32 %v7400_v19  ;;  %v4069_v52 = vpop.eup %4068  ;;  %vm7424_vm4 = vcmp.eq.f32.partialorder %v2328_v9, 8.507059e+37  ;;  %v2331_v11 = vor.u32 1.1754944e-38, %v2330_v30  ;;  %vm2352_vm8 = vweird.f32 %v7364_v24 }
 0x269   : > { %v2370_v1 = vand.u32 2147483647, %v7387_v0  ;;  %v2386_v62 = vand.u32 2147483648, %v7400_v19  ;;  %v4071_v44 = vpop.eup %4070  ;;  %v2321_v60 = vsub.f32 1.0, %v2320_v16  ;;  %v2334_v7 = vmul.f32 %v4069_v52, %v7362_v32 }
 0x26a   : > { %vm7432_vm14 = vcmp.eq.f32.partialorder %v2342_v25, 8.507059e+37  ;;  %v2345_v57 = vor.u32 1.1754944e-38, %v2344_v50  ;;  %4076 = vrcp.f32 %v7407_v3  ;;  %vm2325_vm0 = vweird.f32 %v4067_v58 }
 0x26b   : > { %v2348_v47 = vmul.f32 %v4071_v44, %v7364_v24  ;;  %vm7438_vm5 = vcmp.eq.f32.partialorder %v2356_v63, 8.507059e+37  ;;  %v2359_v37 = vor.u32 1.1754944e-38, %v2358_v43  ;;  %vm2366_vm2 = vweird.f32 %v7387_v0  ;;  %vm2326_vm15 = vmor %vm2324_vm1, %vm2325_vm0 }
 0x26c   : > { %v2384_v46 = vand.u32 2147483647, %v7400_v19  ;;  %v4073_v36 = vpop.eup %4072  ;;  %v2322_v59 = vmul.f32 %v4067_v58, %v2321_v60  ;;  %v2335_v8 = vsub.f32 1.0, %v2334_v7  ;;  %vm2339_vm3 = vweird.f32 %v4069_v52 }
 0x26d   : > { %v2373_v26 = vor.u32 1.1754944e-38, %v2372_v5  ;;  %v2349_v13 = vsub.f32 1.0, %v2348_v47  ;;  %vm2353_vm7 = vweird.f32 %v4071_v44  ;;  %v2362_v10 = vmul.f32 %v4073_v36, %v7387_v0  ;;  %vm2340_vm1 = vmor %vm2338_vm10, %vm2339_vm3  ;;  %v3778_v0 = vld [vmem:[%s8557_s0 + $0x838] sm:$0xff] }
 0x26e   : > { %vm7445_vm12 = vcmp.eq.f32.partialorder %v2370_v1, 8.507059e+37  ;;  %v2387_v27 = vor.u32 1.1754944e-38, %v2386_v62  ;;  %v4075_v29 = vpop.eup %4074  ;;  %v2323_v17 = vadd.f32 %v4067_v58, %v2322_v59  ;;  %v2336_v55 = vmul.f32 %v4069_v52, %v2335_v8  ;;  %vm2354_vm0 = vmor %vm2352_vm8, %vm2353_vm7 }
 0x26f   : > { %v2398_v9 = vand.u32 2147483647, %v7407_v3  ;;  %v2400_v30 = vand.u32 2147483648, %v7407_v3  ;;  %v2350_v25 = vmul.f32 %v4071_v44, %v2349_v13  ;;  %v2363_v50 = vsub.f32 1.0, %v2362_v10 }
 0x270   : > { %vm2367_vm9 = vweird.f32 %v4073_v36  ;;  %v2376_v63 = vmul.f32 %v4075_v29, %v7400_v19  ;;  %vm7459_vm11 = vcmp.eq.f32.partialorder %v2384_v46, 8.507059e+37  ;;  %v4077_v16 = vpop.eup %4076  ;;  %v2327_v5 = vsel %vm2326_vm15, %v4067_v58, %v2323_v17 }
 0x271   : > { %v2337_v1 = vadd.f32 %v4069_v52, %v2336_v55  ;;  %vm2381_vm6 = vweird.f32 %v4075_v29  ;;  %vm2394_vm13 = vweird.f32 %v7407_v3  ;;  %v924_v62 = vsub.f32 %v3776_v41, %v7369_v23  ;;  %vm2368_vm10 = vmor %vm2366_vm2, %vm2367_vm9 }
 0x272   : > { %v2332_v42 = vsel %vm7424_vm4, %v2331_v11, %v2327_v5  ;;  %v2351_v60 = vadd.f32 %v4071_v44, %v2350_v25  ;;  %v2364_v7 = vmul.f32 %v4073_v36, %v2363_v50  ;;  %v2377_v47 = vsub.f32 1.0, %v2376_v63  ;;  %v8954_v63 = vld [vmem:[#allocation48_spill] sm:$0xff] }
 0x273   : > { %v2341_v46 = vsel %vm2340_vm1, %v4069_v52, %v2337_v1  ;;  %v2390_v58 = vmul.f32 %v4077_v16, %v7407_v3  ;;  %vm7474_vm15 = vcmp.eq.f32.partialorder %v2398_v9, 8.507059e+37  ;;  %v2401_v12 = vor.u32 1.1754944e-38, %v2400_v30 }
 0x274   : > { %v3195_v11 = vmul.f32 %v2332_v42, %v1755_v48  ;;  %v2346_v32 = vsel %vm7432_vm14, %v2345_v57, %v2341_v46  ;;  %v2355_v8 = vsel %vm2354_vm0, %v4071_v44, %v2351_v60  ;;  %v2365_v13 = vadd.f32 %v4073_v36, %v2364_v7  ;;  %v243_v42 = vld [vmem:[%s8557_s0 + $0x2f0] sm:$0xff]  ;;  %v244_v46 = vld [vmem:[%s8557_s0 + $0x2f8] sm:$0xff] }
 0x275   : > { %v2378_v52 = vmul.f32 %v4075_v29, %v2377_v47  ;;  %v2360_v24 = vsel %vm7438_vm5, %v2359_v37, %v2355_v8  ;;  %v2391_v10 = vsub.f32 1.0, %v2390_v58  ;;  %v3196_v41 = vmul.f32 %v2346_v32, %v1756_v39 }
 0x276   : > { %v3327_v17 = vmul.f32 1.442695, %v3195_v11  ;;  %v2369_v48 = vsel %vm2368_vm10, %v4073_v36, %v2365_v13  ;;  %vm2395_vm4 = vweird.f32 %v4077_v16  ;;  %v3197_v31 = vmul.f32 %v2360_v24, %v1757_v28 }
 0x277   : > { %v2379_v44 = vadd.f32 %v4075_v29, %v2378_v52  ;;  %v2374_v57 = vsel %vm7445_vm12, %v2373_v26, %v2369_v48  ;;  %vm8953_vm8 = vweird.f32 %v7400_v19  ;;  %v2392_v6 = vmul.f32 %v4077_v16, %v2391_v10  ;;  %v239_v19 = vld [vmem:[%s8557_s0 + $0x2d0] sm:$0xff]  ;;  %vm2396_vm5 = vmor %vm2394_vm13, %vm2395_vm4  ;;  %v8955_v10 = vld [vmem:[#allocation22_spill] sm:$0xff] }
 0x278   : > { %vm2382_vm14 = vmor %vm8953_vm8, %vm2381_vm6  ;;  %4078 = vpow2.f32 %v3327_v17  ;;  %v3329_v39 = vmul.f32 1.442695, %v3196_v41  ;;  %v3198_v37 = vmul.f32 %v2374_v57, %v1758_v2  ;;  %v3331_v53 = vmul.f32 1.442695, %v3197_v31  ;;  %v8956_v48 = vld [vmem:[#allocation9_spill] sm:$0xff]  ;;  %v3761_v57 = vld [vmem:[%s8557_s0 + $0x7b0] sm:$0xff] }
 0x279   : > { %v2383_v15 = vsel %vm2382_vm14, %v4075_v29, %v2379_v44  ;;  %v925_v28 = vsub.f32 %v3777_v51, %v7369_v23  ;;  %v2393_v55 = vadd.f32 %v4077_v16, %v2392_v6  ;;  %v926_v26 = vsub.f32 %v3778_v0, %v7369_v23  ;;  %v240_v23 = vld [vmem:[%s8557_s0 + $0x2d8] sm:$0xff]  ;;  %v7579_v6 = vpop.permute.xlu1 %828 }
 0x27a   : > { %v2388_v36 = vsel %vm7459_vm11, %v2387_v27, %v2383_v15  ;;  %4080 = vpow2.f32 %v3329_v39  ;;  %v3333_v2 = vmul.f32 1.442695, %v3198_v37  ;;  %v1209_v49 = vmul.f32 %v7395_v4, %v7395_v4  ;;  %v241_v27 = vld [vmem:[%s8557_s0 + $0x2e0] sm:$0xff] }
 0x27b   : > { %v3199_v61 = vmul.f32 %v2388_v36, %v1759_v34  ;;  %4082 = vpow2.f32 %v3331_v53  ;;  %v2397_v29 = vsel %vm2396_vm5, %v4077_v16, %v2393_v55  ;;  %v1210_v3 = vmul.f32 %v7398_v35, %v7398_v35  ;;  %v242_v35 = vld [vmem:[%s8557_s0 + $0x2e8] sm:$0xff]  ;;  %v8957_v53 = vld [vmem:[#allocation10_spill] sm:$0xff]  ;;  %v3762_v55 = vld [vmem:[%s8557_s0 + $0x7b8] sm:$0xff] }
 0x27c   : > { %v1211_v45 = vmul.f32 %v7405_v22, %v7405_v22  ;;  %v1212_v34 = vmul.f32 %v924_v62, %v924_v62  ;;  %v2402_v4 = vsel %vm7474_vm15, %v2401_v12, %v2397_v29  ;;  %4084 = vpow2.f32 %v3333_v2 }
 0x27d   : > { %v3335_v9 = vmul.f32 1.442695, %v3199_v61  ;;  %v1213_v30 = vmul.f32 %v925_v28, %v925_v28  ;;  %v7532_v50 = vmul.f32 %v7334_v21, %v7334_v21  ;;  %v625_v43 = vsub.f32 %v239_v19, %v8954_v63  ;;  %v8959_v61 = vld [vmem:[#allocation12_spill] sm:$0xff] }
 0x27e   : > { %v4079_v25 = vpop.eup %4078  ;;  %v3200_v22 = vmul.f32 %v2402_v4, %v1760_v20  ;;  %v1214_v16 = vmul.f32 %v926_v26, %v926_v26  ;;  %v626_v5 = vsub.f32 %v240_v23, %v8954_v63  ;;  %v7542_v1 = vsub.f32 %v241_v27, %v8954_v63  ;;  %v8958_v26 = vld [vmem:[#allocation11_spill] sm:$0xff]  ;;  %v3763_v27 = vld [vmem:[%s8557_s0 + $0x7c0] sm:$0xff] }
 0x27f   : > { %4086 = vpow2.f32 %v3335_v9  ;;  %3484 = vst [vmem:[%s5316_s18 + $0x120] sm:$0xff] %v4079_v25  ;;  %v1497_v21 = vmul.f32 %v1209_v49, %v1209_v49  ;;  %v1498_v7 = vmul.f32 %v1210_v3, %v1210_v3  ;;  %v1499_v54 = vmul.f32 %v1211_v45, %v1211_v45 }
 0x280   : > { %v4081_v62 = vpop.eup %4080  ;;  %v3337_v60 = vmul.f32 1.442695, %v3200_v22  ;;  %v1500_v20 = vmul.f32 %v1212_v34, %v1212_v34  ;;  %v7552_v58 = vsub.f32 %v242_v35, %v8954_v63  ;;  %v7556_v59 = vadd.f32 %v5311_v56, %v1209_v49 }
 0x281   : > { %v4083_v47 = vpop.eup %4082  ;;  %3485 = vst [vmem:[%s5316_s18 + $0x128] sm:$0xff] %v4081_v62  ;;  %v1501_v12 = vmul.f32 %v1213_v30, %v1213_v30  ;;  %v1593_v11 = vmul.f32 3.38, %v1497_v21  ;;  %v1502_v32 = vmul.f32 %v1214_v16, %v1214_v16  ;;  %v1594_v8 = vmul.f32 3.38, %v1498_v7 }
 0x282   : > { %4088 = vpow2.f32 %v3337_v60  ;;  %3486 = vst [vmem:[%s5316_s18 + $0x130] sm:$0xff] %v4083_v47  ;;  %v1595_v13 = vmul.f32 3.38, %v1499_v54  ;;  %v4085_v52 = vpop.eup %4084  ;;  %v7560_v24 = vsub.f32 %v243_v42, %v8954_v63  ;;  %v7563_v41 = vadd.f32 %v8955_v10, %v1210_v3  ;;  %v3764_v10 = vld [vmem:[%s8557_s0 + $0x7c8] sm:$0xff] }
 0x283   : > { %v1596_v17 = vmul.f32 3.38, %v1500_v20  ;;  %v1597_v51 = vmul.f32 3.38, %v1501_v12  ;;  %v7566_v56 = vsub.f32 %v244_v46, %v8954_v63  ;;  %3487 = vst [vmem:[%s5316_s18 + $0x138] sm:$0xff] %v4085_v52  ;;  %v7570_v44 = vadd.f32 %v8956_v48, %v1211_v45 }
 0x284   : > { %v7572_v31 = vadd.f32 0.083333336, %v1593_v11  ;;  %v7574_v0 = vadd.f32 0.083333336, %v1594_v8  ;;  %v7581_v15 = vmul.f32 %v625_v43, %v625_v43  ;;  %v7583_v37 = vmul.f32 %v626_v5, %v626_v5 }
 0x285   : > { %v4087_v39 = vpop.eup %4086  ;;  %v7586_v28 = vadd.f32 %v8957_v53, %v1212_v34  ;;  %v7588_v36 = vadd.f32 0.083333336, %v1595_v13  ;;  %v7595_v19 = vadd.f32 %v8958_v26, %v1213_v30  ;;  %v7598_v2 = vadd.f32 %v8959_v61, %v1214_v16 }
 0x286   : > { %3488 = vst [vmem:[%s5316_s18 + $0x140] sm:$0xff] %v4087_v39  ;;  %v1598_v49 = vmul.f32 3.38, %v1502_v32  ;;  %v1785_v23 = vsub.f32 0.0, %v7556_v59  ;;  %v7604_v29 = vadd.f32 0.083333336, %v1596_v17  ;;  %4090 = vrcp.f32 %v7572_v31 }
 0x287   : > { %v1786_v3 = vsub.f32 0.0, %v7563_v41  ;;  %v7609_v45 = vsub.f32 %v3761_v57, %v7579_v6  ;;  %v7611_v4 = vadd.f32 0.083333336, %v1597_v51  ;;  %4092 = vrcp.f32 %v7574_v0  ;;  %v3765_v39 = vld [vmem:[%s8557_s0 + $0x7d0] sm:$0xff] }
 0x288   : > { %v4089_v34 = vpop.eup %4088  ;;  %v7616_v30 = vsub.f32 %v3762_v55, %v7579_v6  ;;  %vm8960_vm2 = vcmask 433152   ;;  %v2750_v25 = vand.u32 2147483648, %v7572_v31  ;;  %v2764_v35 = vand.u32 2147483648, %v7574_v0 }
 0x289   : > { %3489 = vst.msk [vmem:[%s5316_s18 + $0x148] sm:$0xff] %vm8960_vm2, %v4089_v34  ;;  %4094 = vrcp.f32 %v7588_v36  ;;  %v7624_v63 = vsub.f32 %v3763_v27, %v7579_v6  ;;  %v7626_v43 = vadd.f32 0.083333336, %v1598_v49  ;;  %v2748_v16 = vand.u32 2147483647, %v7572_v31 }
 0x28a   : > { %v2778_v5 = vand.u32 2147483648, %v7588_v36  ;;  %v2762_v62 = vand.u32 2147483647, %v7574_v0  ;;  %4096 = vrcp.f32 %v7604_v29  ;;  %v2792_v42 = vand.u32 2147483648, %v7604_v29 }
 0x28b   : > { %vm2744_vm3 = vweird.f32 %v7572_v31  ;;  %v2776_v7 = vand.u32 2147483647, %v7588_v36  ;;  %4098 = vrcp.f32 %v7611_v4  ;;  %v2751_v20 = vor.u32 1.1754944e-38, %v2750_v25 }
 0x28c   : > { %v7639_v54 = vpop.eup %4090  ;;  %vm2758_vm7 = vweird.f32 %v7574_v0  ;;  %v7642_v47 = vor.u32 1.1754944e-38, %v2764_v35  ;;  %v2790_v46 = vand.u32 2147483647, %v7604_v29  ;;  %v2806_v12 = vand.u32 2147483648, %v7611_v4 }
 0x28d   : > { %v7646_v11 = vpop.eup %4092  ;;  %v2740_v32 = vmul.f32 %v7639_v54, %v7572_v31  ;;  %vm7650_vm12 = vcmp.eq.f32.partialorder %v2748_v16, 8.507059e+37  ;;  %vm2772_vm13 = vweird.f32 %v7588_v36  ;;  %v2779_v13 = vor.u32 1.1754944e-38, %v2778_v5 }
 0x28e   : > { %v7655_v52 = vor.u32 1.1754944e-38, %v2792_v42  ;;  %4100 = vrcp.f32 %v7626_v43  ;;  %vm2745_vm9 = vweird.f32 %v7639_v54  ;;  %v2754_v51 = vmul.f32 %v7646_v11, %v7574_v0 }
 0x28f   : > { %v4095_v17 = vpop.eup %4094  ;;  %vm2759_vm11 = vweird.f32 %v7646_v11  ;;  %vm7665_vm6 = vcmp.eq.f32.partialorder %v2762_v62, 8.507059e+37  ;;  %v2804_v57 = vand.u32 2147483647, %v7611_v4  ;;  %v2741_v53 = vsub.f32 1.0, %v2740_v32  ;;  %vm2746_vm10 = vmor %vm2744_vm3, %vm2745_vm9 }
 0x290   : > { %v2768_v55 = vmul.f32 %v4095_v17, %v7588_v36  ;;  %vm2773_vm1 = vweird.f32 %v4095_v17  ;;  %vm7674_vm0 = vcmp.eq.f32.partialorder %v2776_v7, 8.507059e+37  ;;  %v2807_v61 = vor.u32 1.1754944e-38, %v2806_v12  ;;  %v4097_v49 = vpop.eup %4096  ;;  %vm2760_vm15 = vmor %vm2758_vm7, %vm2759_vm11 }
 0x291   : > { %v2755_v27 = vsub.f32 1.0, %v2754_v51  ;;  %v2818_v34 = vand.u32 2147483647, %v7626_v43  ;;  %v2820_v25 = vand.u32 2147483648, %v7626_v43  ;;  %v7683_v35 = vsub.f32 %v3764_v10, %v7579_v6  ;;  %v4099_v16 = vpop.eup %4098  ;;  %vm2774_vm3 = vmor %vm2772_vm13, %vm2773_vm1 }
 0x292   : > { %v2742_v5 = vmul.f32 %v7639_v54, %v2741_v53  ;;  %v2769_v62 = vsub.f32 1.0, %v2768_v55  ;;  %v2782_v42 = vmul.f32 %v4097_v49, %v7604_v29  ;;  %vm7687_vm4 = vcmp.eq.f32.partialorder %v2790_v46, 8.507059e+37  ;;  %v3766_v46 = vld [vmem:[%s8557_s0 + $0x7d8] sm:$0xff] }
 0x293   : > { %v7692_v12 = vsub.f32 %v3765_v39, %v7579_v6  ;;  %v2756_v32 = vmul.f32 %v7646_v11, %v2755_v27  ;;  %vm2787_vm8 = vweird.f32 %v4097_v49  ;;  %v2796_v51 = vmul.f32 %v4099_v16, %v7611_v4 }
 0x294   : > { %vm7696_vm5 = vcmp.eq.f32.partialorder %v2804_v57, 8.507059e+37  ;;  %v4101_v53 = vpop.eup %4100  ;;  %v2743_v39 = vadd.f32 %v7639_v54, %v2742_v5  ;;  %v2770_v55 = vmul.f32 %v4095_v17, %v2769_v62  ;;  %v2783_v60 = vsub.f32 1.0, %v2782_v42 }
 0x295   : > { %v2821_v27 = vor.u32 1.1754944e-38, %v2820_v25  ;;  %v2757_v57 = vadd.f32 %v7646_v11, %v2756_v32  ;;  %v2797_v21 = vsub.f32 1.0, %v2796_v51  ;;  %v2810_v22 = vmul.f32 %v4101_v53, %v7626_v43 }
 0x296   : > { %vm2815_vm2 = vweird.f32 %v4101_v53  ;;  %vm7711_vm14 = vcmp.eq.f32.partialorder %v2818_v34, 8.507059e+37  ;;  %v2747_v5 = vsel %vm2746_vm10, %v7639_v54, %v2743_v39  ;;  %v2771_v25 = vadd.f32 %v4095_v17, %v2770_v55 }
 0x297   : > { %v2784_v31 = vmul.f32 %v4097_v49, %v2783_v60  ;;  %v914_v62 = vsub.f32 %v3766_v46, %v7579_v6  ;;  %v2752_v42 = vsel %vm7650_vm12, %v2751_v20, %v2747_v5  ;;  %v2761_v32 = vsel %vm2760_vm15, %v7646_v11, %v2757_v57 }
 0x298   : > { %v2798_v34 = vmul.f32 %v4099_v16, %v2797_v21  ;;  %v2811_v54 = vsub.f32 1.0, %v2810_v22  ;;  %v2766_v0 = vsel %vm7665_vm6, %v7642_v47, %v2761_v32  ;;  %v2775_v51 = vsel %vm2774_vm3, %v4095_v17, %v2771_v25 }
 0x299   : > { %v2785_v39 = vadd.f32 %v4097_v49, %v2784_v31  ;;  %v3225_v6 = vmul.f32 %v2752_v42, %v1785_v23  ;;  %v2780_v60 = vsel %vm7674_vm0, %v2779_v13, %v2775_v51  ;;  %vm8973_vm7 = vweird.f32 %v7604_v29 }
 0x29a   : > { %vm2788_vm12 = vmor %vm8973_vm7, %vm2787_vm8  ;;  %v2799_v36 = vadd.f32 %v4099_v16, %v2798_v34  ;;  %v2812_v20 = vmul.f32 %v4101_v53, %v2811_v54  ;;  %v3226_v22 = vmul.f32 %v2766_v0, %v1786_v3  ;;  %vm8974_vm13 = vweird.f32 %v4099_v16  ;;  %v8982_v0 = vld [vmem:[#allocation13_spill] sm:$0xff] }
 0x29b   : > { %v2789_v21 = vsel %vm2788_vm12, %v4097_v49, %v2785_v39  ;;  %vm8975_vm9 = vweird.f32 %v7611_v4  ;;  %v8976_v59 = vsub.f32 0.0, %v7570_v44  ;;  %v3387_v47 = vmul.f32 1.442695, %v3225_v6 }
 0x29c   : > { %vm2802_vm11 = vmor %vm8975_vm9, %vm8974_vm13  ;;  %v1197_v11 = vmul.f32 %v7609_v45, %v7609_v45  ;;  %v2794_v29 = vsel %vm7687_vm4, %v7655_v52, %v2789_v21  ;;  %v2813_v13 = vadd.f32 %v4101_v53, %v2812_v20  ;;  %v3389_v41 = vmul.f32 1.442695, %v3226_v22 }
 0x29d   : > { %v3227_v23 = vmul.f32 %v2780_v60, %v8976_v59  ;;  %v2803_v8 = vsel %vm2802_vm11, %v4099_v16, %v2799_v36  ;;  %vm8977_vm6 = vweird.f32 %v7626_v43  ;;  %v8978_v44 = vsub.f32 0.0, %v7586_v28  ;;  %v3701_v28 = vld [vmem:[%s8557_s0 + $0x5d0] sm:$0xff]  ;;  %v3699_v36 = vld [vmem:[%s8557_s0 + $0x5c0] sm:$0xff] }
 0x29e   : > { %v2808_v3 = vsel %vm7696_vm5, %v2807_v61, %v2803_v8  ;;  %vm2816_vm1 = vmor %vm8977_vm6, %vm2815_vm2  ;;  %4102 = vpow2.f32 %v3387_v47  ;;  %v8979_v48 = vsub.f32 0.0, %v7595_v19  ;;  %v1198_v52 = vmul.f32 %v7616_v30, %v7616_v30  ;;  %v3702_v19 = vld [vmem:[%s8557_s0 + $0x5d8] sm:$0xff]  ;;  %v3700_v47 = vld [vmem:[%s8557_s0 + $0x5c8] sm:$0xff] }
 0x29f   : > { %v3228_v4 = vmul.f32 %v2794_v29, %v8978_v44  ;;  %v3391_v17 = vmul.f32 1.442695, %v3227_v23  ;;  %v2817_v45 = vsel %vm2816_vm1, %v4101_v53, %v2813_v13  ;;  %4104 = vpow2.f32 %v3389_v41  ;;  %v8983_v8 = vld [vmem:[#allocation30_spill] sm:$0xff] }
 0x2a0   : > { %v3229_v26 = vmul.f32 %v2808_v3, %v8979_v48  ;;  %v2822_v61 = vsel %vm7711_vm14, %v2821_v27, %v2817_v45  ;;  %v1199_v43 = vmul.f32 %v7624_v63, %v7624_v63  ;;  %v8980_v16 = vsub.f32 0.0, %v7598_v2  ;;  %v8985_v45 = vld [vmem:[#allocation32_spill] sm:$0xff] }
 0x2a1   : > { %4106 = vpow2.f32 %v3391_v17  ;;  %v3393_v49 = vmul.f32 1.442695, %v3228_v4  ;;  %v1200_v9 = vmul.f32 %v7683_v35, %v7683_v35  ;;  %v1201_v10 = vmul.f32 %v7692_v12, %v7692_v12  ;;  %v8984_v4 = vld [vmem:[#allocation31_spill] sm:$0xff] }
 0x2a2   : > { %v3230_v7 = vmul.f32 %v2822_v61, %v8980_v16  ;;  %v3395_v30 = vmul.f32 1.442695, %v3229_v26  ;;  %v7778_v63 = vmul.f32 %v7542_v1, %v7542_v1  ;;  %v7782_v46 = vmul.f32 %v7552_v58, %v7552_v58  ;;  %v3695_v1 = vld [vmem:[%s8557_s0 + $0x5a0] sm:$0xff]  ;;  %v8981_v58 = vld [vmem:[#allocation57_spill] sm:$0xff] }
 0x2a3   : > { %4108 = vpow2.f32 %v3393_v49  ;;  %v1202_v53 = vmul.f32 %v914_v62, %v914_v62  ;;  %v7786_v2 = vmul.f32 %v7560_v24, %v7560_v24  ;;  %v7790_v35 = vmul.f32 %v7566_v56, %v7566_v56  ;;  %v3696_v24 = vld [vmem:[%s8557_s0 + $0x5a8] sm:$0xff]  ;;  %v3697_v56 = vld [vmem:[%s8557_s0 + $0x5b0] sm:$0xff]  ;;  %v3698_v62 = vld [vmem:[%s8557_s0 + $0x5b8] sm:$0xff] }
 0x2a4   : > { %4110 = vpow2.f32 %v3395_v30  ;;  %v3397_v12 = vmul.f32 1.442695, %v3230_v7  ;;  %v4103_v55 = vpop.eup %4102  ;;  %v7796_v27 = vsub.f32 %v3701_v28, %v8981_v58  ;;  %v7799_v57 = vsub.f32 %v3702_v19, %v8981_v58  ;;  %v8987_v7 = vld [vmem:[#allocation34_spill] sm:$0xff] }
 0x2a5   : > { %v1485_v5 = vmul.f32 %v1197_v11, %v1197_v11  ;;  %v1486_v25 = vmul.f32 %v1198_v52, %v1198_v52  ;;  %v4105_v31 = vpop.eup %4104  ;;  %3514 = vst [vmem:[%s5316_s18 + $0x210] sm:$0xff] %v4103_v55  ;;  %v1487_v42 = vmul.f32 %v1199_v43, %v1199_v43  ;;  %v1488_v32 = vmul.f32 %v1200_v9, %v1200_v9 }
 0x2a6   : > { %4112 = vpow2.f32 %v3397_v12  ;;  %v1489_v34 = vmul.f32 %v1201_v10, %v1201_v10  ;;  %v779_v51 = vsub.f32 %v3695_v1, %v8982_v0  ;;  %3515 = vst [vmem:[%s5316_s18 + $0x218] sm:$0xff] %v4105_v31  ;;  %v1490_v39 = vmul.f32 %v1202_v53, %v1202_v53 }
 0x2a7   : > { %v4107_v54 = vpop.eup %4106  ;;  %v1581_v6 = vmul.f32 3.38, %v1485_v5  ;;  %v1582_v60 = vmul.f32 3.38, %v1486_v25  ;;  %v780_v20 = vsub.f32 %v3696_v24, %v8982_v0  ;;  %v7818_v22 = vsub.f32 %v3697_v56, %v8982_v0 }
 0x2a8   : > { %3516 = vst [vmem:[%s5316_s18 + $0x220] sm:$0xff] %v4107_v54  ;;  %v1583_v21 = vmul.f32 3.38, %v1487_v42  ;;  %v1584_v59 = vmul.f32 3.38, %v1488_v32  ;;  %v7825_v29 = vsub.f32 %v3698_v62, %v8982_v0  ;;  %v7828_v13 = vadd.f32 %v8983_v8, %v1197_v11  ;;  %v8986_v11 = vld [vmem:[#allocation33_spill] sm:$0xff] }
 0x2a9   : > { %v4109_v23 = vpop.eup %4108  ;;  %v1585_v41 = vmul.f32 3.38, %v1489_v34  ;;  %v7830_v3 = vadd.f32 0.083333336, %v1581_v6  ;;  %v7834_v17 = vadd.f32 %v8984_v4, %v1198_v52  ;;  %v7837_v48 = vadd.f32 %v8985_v45, %v1199_v43 }
 0x2aa   : > { %v4111_v44 = vpop.eup %4110  ;;  %3517 = vst [vmem:[%s5316_s18 + $0x228] sm:$0xff] %v4109_v23  ;;  %v7839_v26 = vadd.f32 0.083333336, %v1582_v60  ;;  %v7841_v61 = vadd.f32 0.083333336, %v1583_v21  ;;  %v7844_v49 = vsub.f32 %v3699_v36, %v8982_v0  ;;  %v7848_v28 = vadd.f32 %v8986_v11, %v1200_v9  ;;  %v8989_v9 = vld [vmem:[#allocation35_spill] sm:$0xff] }
 0x2ab   : > { %3518 = vst [vmem:[%s5316_s18 + $0x230] sm:$0xff] %v4111_v44  ;;  %v1586_v19 = vmul.f32 3.38, %v1490_v39  ;;  %4114 = vrcp.f32 %v7830_v3  ;;  %v7852_v52 = vsub.f32 %v3700_v47, %v8982_v0  ;;  %v7854_v43 = vmul.f32 %v779_v51, %v779_v51 }
 0x2ac   : > { %v4113_v16 = vpop.eup %4112  ;;  %v7857_v30 = vadd.f32 %v8987_v7, %v1201_v10  ;;  %v7859_v1 = vadd.f32 0.083333336, %v1584_v59  ;;  %v7861_v12 = vmul.f32 %v780_v20, %v780_v20  ;;  %vm8988_vm0 = vcmask 433152  }
 0x2ad   : > { %3519 = vst.msk [vmem:[%s5316_s18 + $0x238] sm:$0xff] %vm8988_vm0, %v4113_v16  ;;  %v7866_v55 = vadd.f32 %v8989_v9, %v1202_v53  ;;  %v1773_v24 = vsub.f32 0.0, %v7828_v13  ;;  %4116 = vrcp.f32 %v7839_v26  ;;  %v7870_v56 = vadd.f32 0.083333336, %v1585_v41  ;;  %v3791_v13 = vld [vmem:[%s8557_s0 + $0x8a0] sm:$0xff] }
 0x2ae   : > { %4118 = vrcp.f32 %v7841_v61  ;;  %v7875_v25 = vadd.f32 0.083333336, %v1586_v19  ;;  %v2580_v62 = vand.u32 2147483647, %v7830_v3  ;;  %v2582_v53 = vand.u32 2147483648, %v7830_v3 }
 0x2af   : > { %v2594_v32 = vand.u32 2147483647, %v7839_v26  ;;  %v2596_v34 = vand.u32 2147483648, %v7839_v26  ;;  %4120 = vrcp.f32 %v7859_v1  ;;  %vm2576_vm15 = vweird.f32 %v7830_v3 }
 0x2b0   : > { %v2608_v51 = vand.u32 2147483647, %v7841_v61  ;;  %v2610_v39 = vand.u32 2147483648, %v7841_v61  ;;  %vm2590_vm10 = vweird.f32 %v7839_v26  ;;  %v2624_v60 = vand.u32 2147483648, %v7859_v1 }
 0x2b1   : > { %v4115_v54 = vpop.eup %4114  ;;  %4122 = vrcp.f32 %v7870_v56  ;;  %vm7892_vm4 = vcmp.eq.f32.partialorder %v2580_v62, 8.507059e+37  ;;  %v2583_v21 = vor.u32 1.1754944e-38, %v2582_v53  ;;  %vm2604_vm8 = vweird.f32 %v7841_v61 }
 0x2b2   : > { %v2572_v6 = vmul.f32 %v4115_v54, %v7830_v3  ;;  %v2622_v59 = vand.u32 2147483647, %v7859_v1  ;;  %vm7899_vm14 = vcmp.eq.f32.partialorder %v2594_v32, 8.507059e+37  ;;  %v2597_v44 = vor.u32 1.1754944e-38, %v2596_v34 }
 0x2b3   : > { %v4117_v36 = vpop.eup %4116  ;;  %4124 = vrcp.f32 %v7875_v25  ;;  %vm7905_vm5 = vcmp.eq.f32.partialorder %v2608_v51, 8.507059e+37  ;;  %v2611_v11 = vor.u32 1.1754944e-38, %v2610_v39  ;;  %vm2618_vm2 = vweird.f32 %v7859_v1  ;;  %v3796_v51 = vld [vmem:[%s8557_s0 + $0x8c8] sm:$0xff] }
 0x2b4   : > { %v4119_v23 = vpop.eup %4118  ;;  %v2573_v47 = vsub.f32 1.0, %v2572_v6  ;;  %v2586_v8 = vmul.f32 %v4117_v36, %v7839_v26  ;;  %v2636_v19 = vand.u32 2147483647, %v7870_v56  ;;  %v2638_v16 = vand.u32 2147483648, %v7870_v56 }
 0x2b5   : > { %v2600_v4 = vmul.f32 %v4119_v23, %v7841_v61  ;;  %v4121_v7 = vpop.eup %4120  ;;  %vm2577_vm3 = vweird.f32 %v4115_v54  ;;  %v2625_v53 = vor.u32 1.1754944e-38, %v2624_v60  ;;  %vm2591_vm7 = vweird.f32 %v4117_v36 }
 0x2b6   : > { %v2574_v9 = vmul.f32 %v4115_v54, %v2573_v47  ;;  %v2587_v62 = vsub.f32 1.0, %v2586_v8  ;;  %vm2605_vm12 = vweird.f32 %v4119_v23  ;;  %v2614_v34 = vmul.f32 %v4121_v7, %v7859_v1  ;;  %vm2578_vm11 = vmor %vm2576_vm15, %vm2577_vm3  ;;  %v3792_v1 = vld [vmem:[%s8557_s0 + $0x8a8] sm:$0xff] }
 0x2b7   : > { %v2601_v32 = vsub.f32 1.0, %v2600_v4  ;;  %vm7913_vm13 = vcmp.eq.f32.partialorder %v2622_v59, 8.507059e+37  ;;  %v4123_v39 = vpop.eup %4122  ;;  %v2650_v42 = vand.u32 2147483647, %v7875_v25  ;;  %v2652_v47 = vand.u32 2147483648, %v7875_v25  ;;  %vm2592_vm15 = vmor %vm2590_vm10, %vm2591_vm7 }
 0x2b8   : > { %v2575_v6 = vadd.f32 %v4115_v54, %v2574_v9  ;;  %v2588_v0 = vmul.f32 %v4117_v36, %v2587_v62  ;;  %v2615_v8 = vsub.f32 1.0, %v2614_v34  ;;  %v2628_v4 = vmul.f32 %v4123_v39, %v7870_v56  ;;  %vm2606_vm3 = vmor %vm2604_vm8, %vm2605_vm12 }
 0x2b9   : > { %v2602_v60 = vmul.f32 %v4119_v23, %v2601_v32  ;;  %vm7923_vm6 = vcmp.eq.f32.partialorder %v2636_v19, 8.507059e+37  ;;  %v2639_v31 = vor.u32 1.1754944e-38, %v2638_v16  ;;  %v4125_v10 = vpop.eup %4124  ;;  %vm2619_vm1 = vweird.f32 %v4121_v7 }
 0x2ba   : > { %v2579_v5 = vsel %vm2578_vm11, %v4115_v54, %v2575_v6  ;;  %v2589_v9 = vadd.f32 %v4117_v36, %v2588_v0  ;;  %vm2633_vm0 = vweird.f32 %v4123_v39  ;;  %vm2646_vm9 = vweird.f32 %v7875_v25  ;;  %vm2620_vm10 = vmor %vm2618_vm2, %vm2619_vm1 }
 0x2bb   : > { %v2584_v3 = vsel %vm7892_vm4, %v2583_v21, %v2579_v5  ;;  %v2603_v62 = vadd.f32 %v4119_v23, %v2602_v60  ;;  %v2616_v19 = vmul.f32 %v4121_v7, %v2615_v8  ;;  %v2629_v32 = vsub.f32 1.0, %v2628_v4 }
 0x2bc   : > { %v2593_v34 = vsel %vm2592_vm15, %v4117_v36, %v2589_v9  ;;  %v2642_v54 = vmul.f32 %v4125_v10, %v7875_v25  ;;  %vm7937_vm11 = vcmp.eq.f32.partialorder %v2650_v42, 8.507059e+37  ;;  %v2653_v20 = vor.u32 1.1754944e-38, %v2652_v47 }
 0x2bd   : > { %v3213_v5 = vmul.f32 %v2584_v3, %v1773_v24  ;;  %v2598_v26 = vsel %vm7899_vm14, %v2597_v44, %v2593_v34  ;;  %v2607_v21 = vsel %vm2606_vm3, %v4119_v23, %v2603_v62  ;;  %v2617_v16 = vadd.f32 %v4121_v7, %v2616_v19  ;;  %v849_v24 = vpop.permute.xlu0 %848 }
 0x2be   : > { %v2630_v36 = vmul.f32 %v4123_v39, %v2629_v32  ;;  %v2612_v61 = vsel %vm7905_vm5, %v2611_v11, %v2607_v21  ;;  %v2643_v42 = vsub.f32 1.0, %v2642_v54  ;;  %v9002_v6 = vsub.f32 0.0, %v7834_v17 }
 0x2bf   : > { %v3363_v60 = vmul.f32 1.442695, %v3213_v5  ;;  %v2621_v23 = vsel %vm2620_vm10, %v4121_v7, %v2617_v16  ;;  %vm2647_vm4 = vweird.f32 %v4125_v10  ;;  %v9003_v44 = vsub.f32 0.0, %v7837_v48  ;;  %v3793_v7 = vld [vmem:[%s8557_s0 + $0x8b0] sm:$0xff] }
 0x2c0   : > { %v3214_v47 = vmul.f32 %v2598_v26, %v9002_v6  ;;  %v2631_v41 = vadd.f32 %v4123_v39, %v2630_v36  ;;  %v2626_v17 = vsel %vm7913_vm13, %v2625_v53, %v2621_v23  ;;  %vm9004_vm8 = vweird.f32 %v7870_v56  ;;  %v3794_v53 = vld [vmem:[%s8557_s0 + $0x8b8] sm:$0xff]  ;;  %v3795_v56 = vld [vmem:[%s8557_s0 + $0x8c0] sm:$0xff]  ;;  %vm2648_vm5 = vmor %vm2646_vm9, %vm2647_vm4 }
 0x2c1   : > { %v3215_v45 = vmul.f32 %v2612_v61, %v9003_v44  ;;  %vm2634_vm14 = vmor %vm9004_vm8, %vm2633_vm0  ;;  %v2644_v11 = vmul.f32 %v4125_v10, %v2643_v42  ;;  %4126 = vpow2.f32 %v3363_v60  ;;  %v9005_v4 = vsub.f32 0.0, %v7848_v28 }
 0x2c2   : > { %v3365_v8 = vmul.f32 1.442695, %v3214_v47  ;;  %v2635_v48 = vsel %vm2634_vm14, %v4123_v39, %v2631_v41  ;;  %v939_v62 = vsub.f32 %v3791_v13, %v849_v24  ;;  %v940_v28 = vsub.f32 %v3792_v1, %v849_v24 }
 0x2c3   : > { %v3216_v9 = vmul.f32 %v2626_v17, %v9005_v4  ;;  %v3367_v3 = vmul.f32 1.442695, %v3215_v45  ;;  %v2640_v39 = vsel %vm7923_vm6, %v2639_v31, %v2635_v48  ;;  %v2645_v19 = vadd.f32 %v4125_v10, %v2644_v11 }
 0x2c4   : > { %4128 = vpow2.f32 %v3365_v8  ;;  %v9006_v32 = vsub.f32 0.0, %v7857_v30  ;;  %v941_v5 = vsub.f32 %v3793_v7, %v849_v24  ;;  %v942_v21 = vsub.f32 %v3794_v53, %v849_v24 }
 0x2c5   : > { %4130 = vpow2.f32 %v3367_v3  ;;  %v3369_v54 = vmul.f32 1.442695, %v3216_v9  ;;  %v2649_v26 = vsel %vm2648_vm5, %v4125_v10, %v2645_v19  ;;  %v943_v16 = vsub.f32 %v3795_v56, %v849_v24 }
 0x2c6   : > { %v3217_v34 = vmul.f32 %v2640_v39, %v9006_v32  ;;  %v944_v36 = vsub.f32 %v3796_v51, %v849_v24  ;;  %v2654_v31 = vsel %vm7937_vm11, %v2653_v20, %v2649_v26  ;;  %v1227_v61 = vmul.f32 %v939_v62, %v939_v62  ;;  %v3779_v62 = vld [vmem:[%s8557_s0 + $0x840] sm:$0xff]  ;;  %v8032_v32 = vpop.permute.xlu1 %840 }
 0x2c7   : > { %4132 = vpow2.f32 %v3369_v54  ;;  %v4127_v42 = vpop.eup %4126  ;;  %v9007_v25 = vsub.f32 0.0, %v7866_v55  ;;  %v1228_v6 = vmul.f32 %v940_v28, %v940_v28  ;;  %v1229_v47 = vmul.f32 %v941_v5, %v941_v5 }
 0x2c8   : > { %v3371_v59 = vmul.f32 1.442695, %v3217_v34  ;;  %v1230_v60 = vmul.f32 %v942_v21, %v942_v21  ;;  %v1133_v10 = vmul.f32 %v7818_v22, %v7818_v22  ;;  %3502 = vst [vmem:[%s5316_s18 + $0x1b0] sm:$0xff] %v4127_v42  ;;  %v1231_v13 = vmul.f32 %v943_v16, %v943_v16 }
 0x2c9   : > { %v3218_v30 = vmul.f32 %v2654_v31, %v9007_v25  ;;  %v1232_v0 = vmul.f32 %v944_v36, %v944_v36  ;;  %v1134_v24 = vmul.f32 %v7825_v29, %v7825_v29  ;;  %v1135_v55 = vmul.f32 %v7844_v49, %v7844_v49 }
 0x2ca   : > { %4134 = vpow2.f32 %v3371_v59  ;;  %v4129_v20 = vpop.eup %4128  ;;  %v1136_v23 = vmul.f32 %v7852_v52, %v7852_v52  ;;  %v1323_v22 = vadd.f32 %v7854_v43, %v7337_v40  ;;  %v1324_v45 = vadd.f32 %v7861_v12, %v7340_v14  ;;  %v3703_v40 = vld [vmem:[%s8557_s0 + $0x5e0] sm:$0xff] }
 0x2cb   : > { %v3373_v41 = vmul.f32 1.442695, %v3218_v30  ;;  %v4131_v44 = vpop.eup %4130  ;;  %3503 = vst [vmem:[%s5316_s18 + $0x1b8] sm:$0xff] %v4129_v20  ;;  %v1515_v1 = vmul.f32 %v1227_v61, %v1227_v61  ;;  %v1516_v17 = vmul.f32 %v1228_v6, %v1228_v6  ;;  %v1517_v29 = vmul.f32 %v1229_v47, %v1229_v47 }
 0x2cc   : > { %3504 = vst [vmem:[%s5316_s18 + $0x1c0] sm:$0xff] %v4131_v44  ;;  %v1518_v11 = vmul.f32 %v1230_v60, %v1230_v60  ;;  %v1519_v49 = vmul.f32 %v1231_v13, %v1231_v13  ;;  %v1325_v52 = vadd.f32 %v1133_v10, %v7346_v38  ;;  %v1520_v7 = vmul.f32 %v1232_v0, %v1232_v0 }
 0x2cd   : > { %4136 = vpow2.f32 %v3373_v41  ;;  %v4133_v8 = vpop.eup %4132  ;;  %v1611_v48 = vmul.f32 3.38, %v1515_v1  ;;  %v1612_v4 = vmul.f32 3.38, %v1516_v17  ;;  %v1326_v14 = vadd.f32 %v1134_v24, %v7356_v33 }
 0x2ce   : > { %3505 = vst [vmem:[%s5316_s18 + $0x1c8] sm:$0xff] %v4133_v8  ;;  %v8011_v43 = vadd.f32 %v1323_v22, %v1227_v61  ;;  %v1613_v12 = vmul.f32 3.38, %v1517_v29  ;;  %v1614_v9 = vmul.f32 3.38, %v1518_v11  ;;  %v1327_v53 = vadd.f32 %v1135_v55, %v7371_v18  ;;  %v3780_v18 = vld [vmem:[%s8557_s0 + $0x848] sm:$0xff] }
 0x2cf   : > { %v8014_v56 = vadd.f32 %v1324_v45, %v1228_v6  ;;  %v1615_v38 = vmul.f32 3.38, %v1519_v49  ;;  %v8016_v51 = vadd.f32 0.083333336, %v1611_v48  ;;  %v1328_v39 = vadd.f32 %v1136_v23, %v7532_v50  ;;  %v3781_v50 = vld [vmem:[%s8557_s0 + $0x850] sm:$0xff] }
 0x2d0   : > { %v4135_v3 = vpop.eup %4134  ;;  %v8023_v33 = vadd.f32 %v1325_v52, %v1229_v47  ;;  %v8025_v19 = vadd.f32 0.083333336, %v1612_v4  ;;  %v8027_v28 = vadd.f32 0.083333336, %v1613_v12  ;;  %v8035_v34 = vsub.f32 %v3703_v40, %v8981_v58 }
 0x2d1   : > { %3506 = vst [vmem:[%s5316_s18 + $0x1d0] sm:$0xff] %v4135_v3  ;;  %v8037_v54 = vadd.f32 %v1326_v14, %v1230_v60  ;;  %v1616_v5 = vmul.f32 3.38, %v1520_v7  ;;  %4138 = vrcp.f32 %v8016_v51  ;;  %v8043_v21 = vadd.f32 %v1327_v53, %v1231_v13 }
 0x2d2   : > { %v8045_v16 = vadd.f32 %v1328_v39, %v1232_v0  ;;  %v8047_v36 = vadd.f32 0.083333336, %v1614_v9  ;;  %v1803_v31 = vsub.f32 0.0, %v8011_v43  ;;  %vm9008_vm2 = vcmask 433152   ;;  %v3783_v43 = vld [vmem:[%s8557_s0 + $0x860] sm:$0xff] }
 0x2d3   : > { %v4137_v26 = vpop.eup %4136  ;;  %v1804_v59 = vsub.f32 0.0, %v8014_v56  ;;  %4140 = vrcp.f32 %v8025_v19  ;;  %v8055_v61 = vsub.f32 %v3779_v62, %v8032_v32  ;;  %v8058_v42 = vsub.f32 %v3780_v18, %v8032_v32 }
 0x2d4   : > { %3507 = vst.msk [vmem:[%s5316_s18 + $0x1d8] sm:$0xff] %vm9008_vm2, %v4137_v26  ;;  %v8060_v25 = vadd.f32 0.083333336, %v1615_v38  ;;  %v1805_v30 = vsub.f32 0.0, %v8023_v33  ;;  %4142 = vrcp.f32 %v8027_v28  ;;  %v8065_v6 = vsub.f32 %v3781_v50, %v8032_v32  ;;  %v3782_v26 = vld [vmem:[%s8557_s0 + $0x858] sm:$0xff] }
 0x2d5   : > { %v8067_v47 = vadd.f32 0.083333336, %v1616_v5  ;;  %v1806_v60 = vsub.f32 0.0, %v8037_v54  ;;  %v3000_v10 = vand.u32 2147483647, %v8016_v51  ;;  %v3002_v13 = vand.u32 2147483648, %v8016_v51 }
 0x2d6   : > { %v1807_v0 = vsub.f32 0.0, %v8043_v21  ;;  %v3014_v20 = vand.u32 2147483647, %v8025_v19  ;;  %v3016_v24 = vand.u32 2147483648, %v8025_v19  ;;  %4144 = vrcp.f32 %v8047_v36  ;;  %v3705_v5 = vld [vmem:[%s8557_s0 + $0x5f0] sm:$0xff] }
 0x2d7   : > { %v4139_v55 = vpop.eup %4138  ;;  %v1808_v23 = vsub.f32 0.0, %v8045_v16  ;;  %vm2996_vm7 = vweird.f32 %v8016_v51  ;;  %v3028_v41 = vand.u32 2147483647, %v8027_v28  ;;  %v3030_v44 = vand.u32 2147483648, %v8027_v28 }
 0x2d8   : > { %v2992_v22 = vmul.f32 %v4139_v55, %v8016_v51  ;;  %vm3010_vm12 = vweird.f32 %v8025_v19  ;;  %v3044_v45 = vand.u32 2147483648, %v8047_v36  ;;  %4146 = vrcp.f32 %v8060_v25 }
 0x2d9   : > { %v4141_v1 = vpop.eup %4140  ;;  %vm8084_vm13 = vcmp.eq.f32.partialorder %v3000_v10, 8.507059e+37  ;;  %v3003_v29 = vor.u32 1.1754944e-38, %v3002_v13  ;;  %vm3024_vm9 = vweird.f32 %v8027_v28  ;;  %v3042_v11 = vand.u32 2147483647, %v8047_v36 }
 0x2da   : > { %v3058_v49 = vand.u32 2147483648, %v8060_v25  ;;  %v4143_v8 = vpop.eup %4142  ;;  %v2993_v52 = vsub.f32 1.0, %v2992_v22  ;;  %v3006_v7 = vmul.f32 %v4141_v1, %v8025_v19  ;;  %vm8092_vm6 = vcmp.eq.f32.partialorder %v3014_v20, 8.507059e+37 }
 0x2db   : > { %v3017_v4 = vor.u32 1.1754944e-38, %v3016_v24  ;;  %4148 = vrcp.f32 %v8067_v47  ;;  %vm2997_vm1 = vweird.f32 %v4139_v55  ;;  %v3020_v40 = vmul.f32 %v4143_v8, %v8027_v28 }
 0x2dc   : > { %vm8098_vm0 = vcmp.eq.f32.partialorder %v3028_v41, 8.507059e+37  ;;  %v3031_v12 = vor.u32 1.1754944e-38, %v3030_v44  ;;  %vm3038_vm15 = vweird.f32 %v8047_v36  ;;  %v3056_v9 = vand.u32 2147483647, %v8060_v25  ;;  %v4145_v3 = vpop.eup %4144  ;;  %vm2998_vm8 = vmor %vm2996_vm7, %vm2997_vm1 }
 0x2dd   : > { %v2994_v53 = vmul.f32 %v4139_v55, %v2993_v52  ;;  %v3007_v38 = vsub.f32 1.0, %v3006_v7  ;;  %vm3011_vm3 = vweird.f32 %v4141_v1  ;;  %v3045_v62 = vor.u32 1.1754944e-38, %v3044_v45 }
 0x2de   : > { %v3021_v39 = vsub.f32 1.0, %v3020_v40  ;;  %vm3025_vm11 = vweird.f32 %v4143_v8  ;;  %v3034_v18 = vmul.f32 %v4145_v3, %v8047_v36  ;;  %vm8105_vm10 = vcmp.eq.f32.partialorder %v3042_v11, 8.507059e+37  ;;  %v4147_v10 = vpop.eup %4146  ;;  %vm3012_vm7 = vmor %vm3010_vm12, %vm3011_vm3  ;;  %v3784_v36 = vld [vmem:[%s8557_s0 + $0x868] sm:$0xff] }
 0x2df   : > { %v3059_v50 = vor.u32 1.1754944e-38, %v3058_v49  ;;  %v2995_v13 = vadd.f32 %v4139_v55, %v2994_v53  ;;  %v3008_v20 = vmul.f32 %v4141_v1, %v3007_v38  ;;  %v3070_v24 = vand.u32 2147483647, %v8067_v47  ;;  %vm3026_vm1 = vmor %vm3024_vm9, %vm3025_vm11 }
 0x2e0   : > { %v3072_v41 = vand.u32 2147483648, %v8067_v47  ;;  %v3022_v44 = vmul.f32 %v4143_v8, %v3021_v39  ;;  %v3035_v22 = vsub.f32 1.0, %v3034_v18  ;;  %vm3039_vm14 = vweird.f32 %v4145_v3 }
 0x2e1   : > { %v3048_v45 = vmul.f32 %v4147_v10, %v8060_v25  ;;  %vm8119_vm5 = vcmp.eq.f32.partialorder %v3056_v9, 8.507059e+37  ;;  %v4149_v49 = vpop.eup %4148  ;;  %v2999_v52 = vsel %vm2998_vm8, %v4139_v55, %v2995_v13  ;;  %v3009_v7 = vadd.f32 %v4141_v1, %v3008_v20  ;;  %vm3040_vm12 = vmor %vm3038_vm15, %vm3039_vm14 }
 0x2e2   : > { %vm3053_vm2 = vweird.f32 %v4147_v10  ;;  %vm3066_vm4 = vweird.f32 %v8067_v47  ;;  %v930_v40 = vsub.f32 %v3782_v26, %v8032_v32  ;;  %v3004_v51 = vsel %vm8084_vm13, %v3003_v29, %v2999_v52 }
 0x2e3   : > { %v3023_v53 = vadd.f32 %v4143_v8, %v3022_v44  ;;  %v3036_v9 = vmul.f32 %v4145_v3, %v3035_v22  ;;  %v3049_v38 = vsub.f32 1.0, %v3048_v45  ;;  %v3013_v39 = vsel %vm3012_vm7, %v4141_v1, %v3009_v7 }
 0x2e4   : > { %v3062_v55 = vmul.f32 %v4149_v49, %v8067_v47  ;;  %vm8134_vm8 = vcmp.eq.f32.partialorder %v3070_v24, 8.507059e+37  ;;  %v3073_v17 = vor.u32 1.1754944e-38, %v3072_v41  ;;  %v3243_v29 = vmul.f32 %v3004_v51, %v1803_v31 }
 0x2e5   : > { %v3018_v19 = vsel %vm8092_vm6, %v3017_v4, %v3013_v39  ;;  %v3027_v26 = vsel %vm3026_vm1, %v4143_v8, %v3023_v53  ;;  %v3037_v13 = vadd.f32 %v4145_v3, %v3036_v9  ;;  %v3050_v1 = vmul.f32 %v4147_v10, %v3049_v38 }
 0x2e6   : > { %v3032_v28 = vsel %vm8098_vm0, %v3031_v12, %v3027_v26  ;;  %v3063_v20 = vsub.f32 1.0, %v3062_v55  ;;  %v3244_v24 = vmul.f32 %v3018_v19, %v1804_v59  ;;  %v3423_v41 = vmul.f32 1.442695, %v3243_v29 }
 0x2e7   : > { %v3041_v31 = vsel %vm3040_vm12, %v4145_v3, %v3037_v13  ;;  %v3051_v8 = vadd.f32 %v4147_v10, %v3050_v1  ;;  %vm3067_vm13 = vweird.f32 %v4149_v49  ;;  %v3245_v48 = vmul.f32 %v3032_v28, %v1805_v30  ;;  %v9023_v28 = vld [vmem:[#allocation37_spill] sm:$0xff] }
 0x2e8   : > { %v3046_v4 = vsel %vm8105_vm10, %v3045_v62, %v3041_v31  ;;  %vm9021_vm9 = vweird.f32 %v8060_v25  ;;  %v3064_v56 = vmul.f32 %v4149_v49, %v3063_v20  ;;  %4150 = vpow2.f32 %v3423_v41  ;;  %v3704_v25 = vld [vmem:[%s8557_s0 + $0x5e8] sm:$0xff]  ;;  %vm3068_vm0 = vmor %vm3066_vm4, %vm3067_vm13 }
 0x2e9   : > { %vm3054_vm6 = vmor %vm9021_vm9, %vm3053_vm2  ;;  %v3425_v59 = vmul.f32 1.442695, %v3244_v24  ;;  %v3246_v12 = vmul.f32 %v3046_v4, %v1806_v60  ;;  %v3427_v33 = vmul.f32 1.442695, %v3245_v48  ;;  %v931_v30 = vsub.f32 %v3783_v43, %v8032_v32  ;;  %v9024_v43 = vld [vmem:[#allocation38_spill] sm:$0xff] }
 0x2ea   : > { %v3055_v14 = vsel %vm3054_vm6, %v4147_v10, %v3051_v8  ;;  %v3065_v44 = vadd.f32 %v4149_v49, %v3064_v56  ;;  %v932_v62 = vsub.f32 %v3784_v36, %v8032_v32  ;;  %v1215_v32 = vmul.f32 %v8055_v61, %v8055_v61  ;;  %v8229_v36 = vpop.permute.xlu1 %852 }
 0x2eb   : > { %v3060_v3 = vsel %vm8119_vm5, %v3059_v50, %v3055_v14  ;;  %4152 = vpow2.f32 %v3425_v59  ;;  %v3429_v60 = vmul.f32 1.442695, %v3246_v12  ;;  %v3706_v50 = vld [vmem:[%s8557_s0 + $0x5f8] sm:$0xff]  ;;  %v1216_v22 = vmul.f32 %v8058_v42, %v8058_v42  ;;  %v9025_v14 = vld [vmem:[#allocation39_spill] sm:$0xff] }
 0x2ec   : > { %v3247_v54 = vmul.f32 %v3060_v3, %v1807_v0  ;;  %4154 = vpow2.f32 %v3427_v33  ;;  %v3069_v10 = vsel %vm3068_vm0, %v4149_v49, %v3065_v44  ;;  %v1217_v47 = vmul.f32 %v8065_v6, %v8065_v6  ;;  %v9026_v3 = vld [vmem:[#allocation40_spill] sm:$0xff] }
 0x2ed   : > { %v1218_v45 = vmul.f32 %v930_v40, %v930_v40  ;;  %v3074_v21 = vsel %vm8134_vm8, %v3073_v17, %v3069_v10  ;;  %4156 = vpow2.f32 %v3429_v60  ;;  %v1219_v11 = vmul.f32 %v931_v30, %v931_v30  ;;  %v3798_v30 = vld [vmem:[%s8557_s0 + $0x8d8] sm:$0xff]  ;;  %v3799_v60 = vld [vmem:[%s8557_s0 + $0x8e0] sm:$0xff] }
 0x2ee   : > { %v3431_v0 = vmul.f32 1.442695, %v3247_v54  ;;  %v4151_v61 = vpop.eup %4150  ;;  %v788_v52 = vsub.f32 %v3704_v25, %v8981_v58  ;;  %v789_v49 = vsub.f32 %v3705_v5, %v8981_v58  ;;  %v3248_v7 = vmul.f32 %v3074_v21, %v1808_v23 }
 0x2ef   : > { %v1220_v42 = vmul.f32 %v932_v62, %v932_v62  ;;  %v790_v51 = vsub.f32 %v3706_v50, %v8981_v58  ;;  %v8197_v6 = vmul.f32 %v7796_v27, %v7796_v27  ;;  %3532 = vst [vmem:[%s5316_s18 + $0x2a0] sm:$0xff] %v4151_v61  ;;  %v1503_v40 = vmul.f32 %v1215_v32, %v1215_v32  ;;  %v9022_v58 = vld [vmem:[#allocation36_spill] sm:$0xff]  ;;  %v9027_v62 = vld [vmem:[#allocation41_spill] sm:$0xff] }
 0x2f0   : > { %4158 = vpow2.f32 %v3431_v0  ;;  %v3433_v9 = vmul.f32 1.442695, %v3248_v7  ;;  %v1504_v38 = vmul.f32 %v1216_v22, %v1216_v22  ;;  %v1505_v39 = vmul.f32 %v1217_v47, %v1217_v47 }
 0x2f1   : > { %v4153_v53 = vpop.eup %4152  ;;  %v1506_v55 = vmul.f32 %v1218_v45, %v1218_v45  ;;  %v8202_v16 = vmul.f32 %v7799_v57, %v7799_v57  ;;  %v8206_v23 = vadd.f32 %v9022_v58, %v1215_v32  ;;  %v1507_v27 = vmul.f32 %v1219_v11, %v1219_v11 }
 0x2f2   : > { %v4155_v18 = vpop.eup %4154  ;;  %3533 = vst [vmem:[%s5316_s18 + $0x2a8] sm:$0xff] %v4153_v53  ;;  %v1599_v17 = vmul.f32 3.38, %v1503_v40  ;;  %4160 = vpow2.f32 %v3433_v9  ;;  %v1508_v29 = vmul.f32 %v1220_v42, %v1220_v42  ;;  %v1600_v19 = vmul.f32 3.38, %v1504_v38 }
 0x2f3   : > { %3534 = vst [vmem:[%s5316_s18 + $0x2b0] sm:$0xff] %v4155_v18  ;;  %v1601_v26 = vmul.f32 3.38, %v1505_v39  ;;  %v4157_v13 = vpop.eup %4156  ;;  %v8211_v1 = vmul.f32 %v8035_v34, %v8035_v34  ;;  %v8214_v57 = vadd.f32 %v9023_v28, %v1216_v22  ;;  %v1602_v20 = vmul.f32 3.38, %v1506_v55  ;;  %v3797_v34 = vld [vmem:[%s8557_s0 + $0x8d0] sm:$0xff] }
 0x2f4   : > { %v1603_v24 = vmul.f32 3.38, %v1507_v27  ;;  %v8216_v41 = vmul.f32 %v788_v52, %v788_v52  ;;  %3535 = vst [vmem:[%s5316_s18 + $0x2b8] sm:$0xff] %v4157_v13  ;;  %v8220_v31 = vadd.f32 %v9024_v43, %v1217_v47  ;;  %v8222_v8 = vadd.f32 0.083333336, %v1599_v17 }
 0x2f5   : > { %v8224_v48 = vadd.f32 0.083333336, %v1600_v19  ;;  %v8231_v56 = vmul.f32 %v789_v49, %v789_v49  ;;  %v8233_v59 = vmul.f32 %v790_v51, %v790_v51  ;;  %v8236_v12 = vadd.f32 %v9025_v14, %v1218_v45 }
 0x2f6   : > { %v4159_v4 = vpop.eup %4158  ;;  %v8238_v33 = vadd.f32 0.083333336, %v1601_v26  ;;  %v8245_v44 = vadd.f32 %v9026_v3, %v1219_v11  ;;  %v8248_v25 = vadd.f32 %v9027_v62, %v1220_v42  ;;  %v1604_v5 = vmul.f32 3.38, %v1508_v29  ;;  %v3801_v62 = vld [vmem:[%s8557_s0 + $0x8f0] sm:$0xff] }
 0x2f7   : > { %3536 = vst [vmem:[%s5316_s18 + $0x2c0] sm:$0xff] %v4159_v4  ;;  %v1791_v54 = vsub.f32 0.0, %v8206_v23  ;;  %v8254_v32 = vadd.f32 0.083333336, %v1602_v20  ;;  %v1792_v50 = vsub.f32 0.0, %v8214_v57  ;;  %4162 = vrcp.f32 %v8222_v8 }
 0x2f8   : > { %v8259_v10 = vsub.f32 %v3797_v34, %v8229_v36  ;;  %v4161_v22 = vpop.eup %4160  ;;  %v8261_v47 = vadd.f32 0.083333336, %v1603_v24  ;;  %4164 = vrcp.f32 %v8224_v48  ;;  %v8266_v21 = vsub.f32 %v3798_v30, %v8229_v36  ;;  %v3800_v34 = vld [vmem:[%s8557_s0 + $0x8e8] sm:$0xff] }
 0x2f9   : > { %vm9028_vm15 = vcmask 433152   ;;  %v2834_v0 = vand.u32 2147483648, %v8222_v8  ;;  %v2848_v11 = vand.u32 2147483648, %v8224_v48  ;;  %4166 = vrcp.f32 %v8238_v33 }
 0x2fa   : > { %3537 = vst.msk [vmem:[%s5316_s18 + $0x2c8] sm:$0xff] %vm9028_vm15, %v4161_v22  ;;  %v8274_v61 = vsub.f32 %v3799_v60, %v8229_v36  ;;  %v8276_v52 = vadd.f32 0.083333336, %v1604_v5  ;;  %v2832_v7 = vand.u32 2147483647, %v8222_v8  ;;  %v2862_v42 = vand.u32 2147483648, %v8238_v33 }
 0x2fb   : > { %v2846_v40 = vand.u32 2147483647, %v8224_v48  ;;  %4168 = vrcp.f32 %v8254_v32  ;;  %v2876_v53 = vand.u32 2147483648, %v8254_v32  ;;  %vm2828_vm3 = vweird.f32 %v8222_v8 }
 0x2fc   : > { %v2860_v38 = vand.u32 2147483647, %v8238_v33  ;;  %4170 = vrcp.f32 %v8261_v47  ;;  %v2835_v55 = vor.u32 1.1754944e-38, %v2834_v0  ;;  %vm2842_vm11 = vweird.f32 %v8224_v48 }
 0x2fd   : > { %v4163_v39 = vpop.eup %4162  ;;  %v8290_v18 = vor.u32 1.1754944e-38, %v2848_v11  ;;  %v2890_v58 = vand.u32 2147483648, %v8261_v47  ;;  %vm8296_vm10 = vcmp.eq.f32.partialorder %v2832_v7, 8.507059e+37  ;;  %vm2856_vm4 = vweird.f32 %v8238_v33 }
 0x2fe   : > { %v8293_v27 = vpop.eup %4164  ;;  %v2824_v17 = vmul.f32 %v4163_v39, %v8222_v8  ;;  %v2863_v19 = vor.u32 1.1754944e-38, %v2862_v42  ;;  %v2874_v26 = vand.u32 2147483647, %v8254_v32  ;;  %4172 = vrcp.f32 %v8276_v52 }
 0x2ff   : > { %v4167_v13 = vpop.eup %4166  ;;  %vm2829_vm14 = vweird.f32 %v4163_v39  ;;  %v2838_v28 = vmul.f32 %v8293_v27, %v8224_v48  ;;  %vm8305_vm5 = vcmp.eq.f32.partialorder %v2846_v40, 8.507059e+37  ;;  %v8309_v24 = vor.u32 1.1754944e-38, %v2876_v53 }
 0x300   : > { %v2888_v43 = vand.u32 2147483647, %v8261_v47  ;;  %v2825_v4 = vsub.f32 1.0, %v2824_v17  ;;  %vm2843_vm2 = vweird.f32 %v8293_v27  ;;  %v2852_v14 = vmul.f32 %v4167_v13, %v8238_v33  ;;  %vm2830_vm12 = vmor %vm2828_vm3, %vm2829_vm14 }
 0x301   : > { %vm8317_vm7 = vcmp.eq.f32.partialorder %v2860_v38, 8.507059e+37  ;;  %v2891_v3 = vor.u32 1.1754944e-38, %v2890_v58  ;;  %v4169_v5 = vpop.eup %4168  ;;  %v2839_v60 = vsub.f32 1.0, %v2838_v28  ;;  %vm2857_vm8 = vweird.f32 %v4167_v13  ;;  %vm2844_vm0 = vmor %vm2842_vm11, %vm2843_vm2 }
 0x302   : > { %v2902_v22 = vand.u32 2147483647, %v8276_v52  ;;  %v2904_v0 = vand.u32 2147483648, %v8276_v52  ;;  %v4171_v11 = vpop.eup %4170  ;;  %v2826_v7 = vmul.f32 %v4163_v39, %v2825_v4  ;;  %v2853_v42 = vsub.f32 1.0, %v2852_v14  ;;  %vm2858_vm3 = vmor %vm2856_vm4, %vm2857_vm8 }
 0x303   : > { %v2866_v40 = vmul.f32 %v4169_v5, %v8254_v32  ;;  %vm8329_vm13 = vcmp.eq.f32.partialorder %v2874_v26, 8.507059e+37  ;;  %v8334_v38 = vsub.f32 %v3800_v34, %v8229_v36  ;;  %v2840_v58 = vmul.f32 %v8293_v27, %v2839_v60 }
 0x304   : > { %vm2871_vm9 = vweird.f32 %v4169_v5  ;;  %v2880_v17 = vmul.f32 %v4171_v11, %v8261_v47  ;;  %vm8338_vm6 = vcmp.eq.f32.partialorder %v2888_v43, 8.507059e+37  ;;  %v949_v4 = vsub.f32 %v3801_v62, %v8229_v36  ;;  %v4173_v26 = vpop.eup %4172 }
 0x305   : > { %v2827_v14 = vadd.f32 %v4163_v39, %v2826_v7  ;;  %v2854_v9 = vmul.f32 %v4167_v13, %v2853_v42  ;;  %v2867_v51 = vsub.f32 1.0, %v2866_v40  ;;  %v2841_v34 = vadd.f32 %v8293_v27, %v2840_v58 }
 0x306   : > { %v2881_v60 = vsub.f32 1.0, %v2880_v17  ;;  %v2894_v43 = vmul.f32 %v4173_v26, %v8276_v52  ;;  %vm8349_vm1 = vcmp.eq.f32.partialorder %v2902_v22, 8.507059e+37  ;;  %v2905_v45 = vor.u32 1.1754944e-38, %v2904_v0 }
 0x307   : > { %v2831_v62 = vsel %vm2830_vm12, %v4163_v39, %v2827_v14  ;;  %v2855_v7 = vadd.f32 %v4167_v13, %v2854_v9  ;;  %v2868_v42 = vmul.f32 %v4169_v5, %v2867_v51  ;;  %vm2899_vm15 = vweird.f32 %v4173_v26  ;;  %v3802_v39 = vld [vmem:[%s8557_s0 + $0x8f8] sm:$0xff] }
 0x308   : > { %v2836_v8 = vsel %vm8296_vm10, %v2835_v55, %v2831_v62  ;;  %v2845_v40 = vsel %vm2844_vm0, %v8293_v27, %v2841_v34  ;;  %v2882_v22 = vmul.f32 %v4171_v11, %v2881_v60  ;;  %v2895_v0 = vsub.f32 1.0, %v2894_v43 }
 0x309   : > { %v2850_v48 = vsel %vm8305_vm5, %v8290_v18, %v2845_v40  ;;  %v2859_v51 = vsel %vm2858_vm3, %v4167_v13, %v2855_v7  ;;  %v2869_v9 = vadd.f32 %v4169_v5, %v2868_v42  ;;  %v3231_v55 = vmul.f32 %v2836_v8, %v1791_v54 }
 0x30a   : > { %v2864_v27 = vsel %vm8317_vm7, %v2863_v19, %v2859_v51  ;;  %vm9041_vm11 = vweird.f32 %v8254_v32  ;;  %v2883_v33 = vadd.f32 %v4171_v11, %v2882_v22  ;;  %v2896_v29 = vmul.f32 %v4173_v26, %v2895_v0 }
 0x30b   : > { %vm2872_vm10 = vmor %vm9041_vm11, %vm2871_vm9  ;;  %v3232_v58 = vmul.f32 %v2850_v48, %v1792_v50  ;;  %vm9042_vm4 = vweird.f32 %v4171_v11  ;;  %vm9043_vm14 = vweird.f32 %v8261_v47  ;;  %v9044_v23 = vsub.f32 0.0, %v8220_v31 }
 0x30c   : > { %v2873_v17 = vsel %vm2872_vm10, %v4169_v5, %v2869_v9  ;;  %vm2886_vm5 = vmor %vm9043_vm14, %vm9042_vm4  ;;  %v3399_v18 = vmul.f32 1.442695, %v3231_v55  ;;  %v950_v19 = vsub.f32 %v3802_v39, %v8229_v36  ;;  %v2897_v20 = vadd.f32 %v4173_v26, %v2896_v29 }
 0x30d   : > { %v3233_v54 = vmul.f32 %v2864_v27, %v9044_v23  ;;  %v2878_v32 = vsel %vm8329_vm13, %v8309_v24, %v2873_v17  ;;  %v2887_v13 = vsel %vm2886_vm5, %v4171_v11, %v2883_v33  ;;  %v3401_v30 = vmul.f32 1.442695, %v3232_v58 }
 0x30e   : > { %v2892_v57 = vsel %vm8338_vm6, %v2891_v3, %v2887_v13  ;;  %vm9045_vm2 = vweird.f32 %v8276_v52  ;;  %v9046_v31 = vsub.f32 0.0, %v8236_v12  ;;  %4174 = vpow2.f32 %v3399_v18 }
 0x30f   : > { %vm2900_vm7 = vmor %vm9045_vm2, %vm2899_vm15  ;;  %v3403_v47 = vmul.f32 1.442695, %v3233_v54  ;;  %v9047_v5 = vsub.f32 0.0, %v8245_v44  ;;  %4176 = vpow2.f32 %v3401_v30  ;;  %v1233_v24 = vmul.f32 %v8259_v10, %v8259_v10 }
 0x310   : > { %v3234_v50 = vmul.f32 %v2878_v32, %v9046_v31  ;;  %v2901_v36 = vsel %vm2900_vm7, %v4173_v26, %v2897_v20  ;;  %v1234_v52 = vmul.f32 %v8266_v21, %v8266_v21  ;;  %v9048_v12 = vsub.f32 0.0, %v8248_v25 }
 0x311   : > { %v3235_v53 = vmul.f32 %v2892_v57, %v9047_v5  ;;  %v2906_v3 = vsel %vm8349_vm1, %v2905_v45, %v2901_v36  ;;  %4178 = vpow2.f32 %v3403_v47  ;;  %v1235_v44 = vmul.f32 %v8274_v61, %v8274_v61 }
 0x312   : > { %v3405_v11 = vmul.f32 1.442695, %v3234_v50  ;;  %v3236_v28 = vmul.f32 %v2906_v3, %v9048_v12  ;;  %v1236_v26 = vmul.f32 %v8334_v38, %v8334_v38  ;;  %v1237_v10 = vmul.f32 %v949_v4, %v949_v4 }
 0x313   : > { %v3407_v14 = vmul.f32 1.442695, %v3235_v53  ;;  %v1329_v45 = vadd.f32 %v8197_v6, %v7581_v15  ;;  %v1330_v21 = vadd.f32 %v8202_v16, %v7583_v37  ;;  %v1331_v49 = vadd.f32 %v8211_v1, %v7778_v63 }
 0x314   : > { %4180 = vpow2.f32 %v3405_v11  ;;  %v3409_v25 = vmul.f32 1.442695, %v3236_v28  ;;  %v1332_v61 = vadd.f32 %v8216_v41, %v7782_v46  ;;  %v4175_v34 = vpop.eup %4174  ;;  %v1238_v38 = vmul.f32 %v950_v19, %v950_v19 }
 0x315   : > { %4182 = vpow2.f32 %v3407_v14  ;;  %v1333_v4 = vadd.f32 %v8231_v56, %v7786_v2  ;;  %v1334_v15 = vadd.f32 %v8233_v59, %v7790_v35  ;;  %v4177_v6 = vpop.eup %4176  ;;  %3520 = vst [vmem:[%s5316_s18 + $0x240] sm:$0xff] %v4175_v34  ;;  %v1521_v37 = vmul.f32 %v1233_v24, %v1233_v24 }
 0x316   : > { %4184 = vpow2.f32 %v3409_v25  ;;  %3521 = vst [vmem:[%s5316_s18 + $0x248] sm:$0xff] %v4177_v6  ;;  %v1522_v63 = vmul.f32 %v1234_v52, %v1234_v52  ;;  %v1523_v1 = vmul.f32 %v1235_v44, %v1235_v44  ;;  %v1524_v46 = vmul.f32 %v1236_v26, %v1236_v26 }
 0x317   : > { %v4179_v16 = vpop.eup %4178  ;;  %v1525_v41 = vmul.f32 %v1237_v10, %v1237_v10  ;;  %v1617_v60 = vmul.f32 3.38, %v1521_v37  ;;  %v1526_v2 = vmul.f32 %v1238_v38, %v1238_v38  ;;  %v8425_v7 = vadd.f32 %v1329_v45, %v1233_v24 }
 0x318   : > { %3522 = vst [vmem:[%s5316_s18 + $0x250] sm:$0xff] %v4179_v16  ;;  %v1618_v56 = vmul.f32 3.38, %v1522_v63  ;;  %v1619_v62 = vmul.f32 3.38, %v1523_v1  ;;  %v8429_v22 = vadd.f32 %v1330_v21, %v1234_v52  ;;  %vm9049_vm1 = vcmask 433152  }
 0x319   : > { %v1620_v59 = vmul.f32 3.38, %v1524_v46  ;;  %v1621_v42 = vmul.f32 3.38, %v1525_v41  ;;  %v8427_v8 = vadd.f32 0.083333336, %v1617_v60  ;;  %v8437_v48 = vadd.f32 %v1331_v49, %v1235_v44 }
 0x31a   : > { %v4181_v43 = vpop.eup %4180  ;;  %v8431_v0 = vadd.f32 0.083333336, %v1618_v56  ;;  %v8433_v39 = vadd.f32 0.083333336, %v1619_v62  ;;  %v8439_v51 = vadd.f32 %v1332_v61, %v1236_v26  ;;  %v1622_v9 = vmul.f32 3.38, %v1526_v2 }
 0x31b   : > { %v4183_v35 = vpop.eup %4182  ;;  %3523 = vst [vmem:[%s5316_s18 + $0x258] sm:$0xff] %v4181_v43  ;;  %4186 = vrcp.f32 %v8427_v8  ;;  %v8442_v55 = vadd.f32 %v1333_v4, %v1237_v10  ;;  %v8444_v27 = vadd.f32 %v1334_v15, %v1238_v38  ;;  %v8446_v33 = vadd.f32 0.083333336, %v1620_v59 }
 0x31c   : > { %3524 = vst [vmem:[%s5316_s18 + $0x260] sm:$0xff] %v4183_v35  ;;  %v4185_v40 = vpop.eup %4184  ;;  %v8448_v29 = vadd.f32 0.083333336, %v1621_v42  ;;  %v1809_v58 = vsub.f32 0.0, %v8425_v7  ;;  %4188 = vrcp.f32 %v8431_v0  ;;  %v1810_v17 = vsub.f32 0.0, %v8429_v22 }
 0x31d   : > { %3525 = vst.msk [vmem:[%s5316_s18 + $0x268] sm:$0xff] %vm9049_vm1, %v4185_v40  ;;  %v3084_v23 = vand.u32 2147483647, %v8427_v8  ;;  %v3086_v54 = vand.u32 2147483648, %v8427_v8  ;;  %4190 = vrcp.f32 %v8433_v39  ;;  %v8456_v18 = vadd.f32 0.083333336, %v1622_v9 }
 0x31e   : > { %v1811_v19 = vsub.f32 0.0, %v8437_v48  ;;  %v1812_v32 = vsub.f32 0.0, %v8439_v51  ;;  %v3100_v13 = vand.u32 2147483648, %v8431_v0  ;;  %v1813_v20 = vsub.f32 0.0, %v8442_v55 }
 0x31f   : > { %v1814_v30 = vsub.f32 0.0, %v8444_v27  ;;  %v3098_v57 = vand.u32 2147483647, %v8431_v0  ;;  %4192 = vrcp.f32 %v8446_v33  ;;  %vm3080_vm8 = vweird.f32 %v8427_v8 }
 0x320   : > { %v3112_v50 = vand.u32 2147483647, %v8433_v39  ;;  %v3114_v47 = vand.u32 2147483648, %v8433_v39  ;;  %4194 = vrcp.f32 %v8448_v29  ;;  %vm8470_vm12 = vcmp.eq.f32.partialorder %v3084_v23, 8.507059e+37 }
 0x321   : > { %v4187_v31 = vpop.eup %4186  ;;  %v3087_v53 = vor.u32 1.1754944e-38, %v3086_v54  ;;  %vm3094_vm13 = vweird.f32 %v8431_v0  ;;  %v3128_v24 = vand.u32 2147483648, %v8446_v33  ;;  %v3101_v11 = vor.u32 1.1754944e-38, %v3100_v13 }
 0x322   : > { %v3076_v36 = vmul.f32 %v4187_v31, %v8427_v8  ;;  %v4189_v3 = vpop.eup %4188  ;;  %vm3108_vm9 = vweird.f32 %v8433_v39  ;;  %v3126_v52 = vand.u32 2147483647, %v8446_v33  ;;  %4196 = vrcp.f32 %v8456_v18 }
 0x323   : > { %v4191_v12 = vpop.eup %4190  ;;  %v3090_v14 = vmul.f32 %v4189_v3, %v8431_v0  ;;  %vm8480_vm6 = vcmp.eq.f32.partialorder %v3098_v57, 8.507059e+37  ;;  %v3140_v26 = vand.u32 2147483647, %v8448_v29  ;;  %v3142_v10 = vand.u32 2147483648, %v8448_v29 }
 0x324   : > { %v3077_v28 = vsub.f32 1.0, %v3076_v36  ;;  %vm3081_vm0 = vweird.f32 %v4187_v31  ;;  %v3104_v45 = vmul.f32 %v4191_v12, %v8433_v39  ;;  %vm8487_vm15 = vcmp.eq.f32.partialorder %v3112_v50, 8.507059e+37 }
 0x325   : > { %v3115_v25 = vor.u32 1.1754944e-38, %v3114_v47  ;;  %vm3122_vm3 = vweird.f32 %v8446_v33  ;;  %v4193_v49 = vpop.eup %4192  ;;  %v3091_v34 = vsub.f32 1.0, %v3090_v14  ;;  %vm3095_vm11 = vweird.f32 %v4189_v3  ;;  %vm3082_vm7 = vmor %vm3080_vm8, %vm3081_vm0 }
 0x326   : > { %v3078_v61 = vmul.f32 %v4187_v31, %v3077_v28  ;;  %v3129_v38 = vor.u32 1.1754944e-38, %v3128_v24  ;;  %vm3136_vm10 = vweird.f32 %v8448_v29  ;;  %v4195_v4 = vpop.eup %4194  ;;  %v3105_v15 = vsub.f32 1.0, %v3104_v45  ;;  %vm3096_vm2 = vmor %vm3094_vm13, %vm3095_vm11 }
 0x327   : > { %vm3109_vm4 = vweird.f32 %v4191_v12  ;;  %v3118_v6 = vmul.f32 %v4193_v49, %v8446_v33  ;;  %vm8494_vm14 = vcmp.eq.f32.partialorder %v3126_v52, 8.507059e+37  ;;  %v3154_v16 = vand.u32 2147483647, %v8456_v18 }
 0x328   : > { %v3079_v63 = vadd.f32 %v4187_v31, %v3078_v61  ;;  %v3092_v1 = vmul.f32 %v4189_v3, %v3091_v34  ;;  %v3132_v46 = vmul.f32 %v4195_v4, %v8448_v29  ;;  %vm8500_vm5 = vcmp.eq.f32.partialorder %v3140_v26, 8.507059e+37  ;;  %v4197_v43 = vpop.eup %4196  ;;  %vm3110_vm0 = vmor %vm3108_vm9, %vm3109_vm4 }
 0x329   : > { %v3143_v60 = vor.u32 1.1754944e-38, %v3142_v10  ;;  %v3106_v2 = vmul.f32 %v4191_v12, %v3105_v15  ;;  %v3119_v56 = vsub.f32 1.0, %v3118_v6  ;;  %vm3123_vm1 = vweird.f32 %v4193_v49 }
 0x32a   : > { %v3156_v62 = vand.u32 2147483648, %v8456_v18  ;;  %v3083_v35 = vsel %vm3082_vm7, %v4187_v31, %v3079_v63  ;;  %v3093_v59 = vadd.f32 %v4189_v3, %v3092_v1  ;;  %v3133_v42 = vsub.f32 1.0, %v3132_v46  ;;  %vm3124_vm13 = vmor %vm3122_vm3, %vm3123_vm1 }
 0x32b   : > { %v3146_v40 = vmul.f32 %v4197_v43, %v8456_v18  ;;  %v3088_v9 = vsel %vm8470_vm12, %v3087_v53, %v3083_v35  ;;  %v3107_v23 = vadd.f32 %v4191_v12, %v3106_v2  ;;  %v3120_v8 = vmul.f32 %v4193_v49, %v3119_v56 }
 0x32c   : > { %vm3137_vm8 = vweird.f32 %v4195_v4  ;;  %v3097_v54 = vsel %vm3096_vm2, %v4189_v3, %v3093_v59  ;;  %v3134_v13 = vmul.f32 %v4195_v4, %v3133_v42  ;;  %v3249_v31 = vmul.f32 %v3088_v9, %v1809_v58 }
 0x32d   : > { %v3147_v57 = vsub.f32 1.0, %v3146_v40  ;;  %v3102_v50 = vsel %vm8480_vm6, %v3101_v11, %v3097_v54  ;;  %v3111_v47 = vsel %vm3110_vm0, %v4191_v12, %v3107_v23  ;;  %v3121_v36 = vadd.f32 %v4193_v49, %v3120_v8  ;;  %vm3138_vm9 = vmor %vm3136_vm10, %vm3137_vm8 }
 0x32e   : > { %vm3151_vm12 = vweird.f32 %v4197_v43  ;;  %v3116_v0 = vsel %vm8487_vm15, %v3115_v25, %v3111_v47  ;;  %v3135_v39 = vadd.f32 %v4195_v4, %v3134_v13  ;;  %v3250_v53 = vmul.f32 %v3102_v50, %v1810_v17 }
 0x32f   : > { %v3148_v5 = vmul.f32 %v4197_v43, %v3147_v57  ;;  %v3125_v7 = vsel %vm3124_vm13, %v4193_v49, %v3121_v36  ;;  %v3157_v58 = vor.u32 1.1754944e-38, %v3156_v62  ;;  %v3251_v24 = vmul.f32 %v3116_v0, %v1811_v19 }
 0x330   : > { %v3435_v3 = vmul.f32 1.442695, %v3249_v31  ;;  %v3130_v11 = vsel %vm8494_vm14, %v3129_v38, %v3125_v7  ;;  %v3139_v33 = vsel %vm3138_vm9, %v4195_v4, %v3135_v39  ;;  %v3437_v12 = vmul.f32 1.442695, %v3250_v53 }
 0x331   : > { %v3149_v52 = vadd.f32 %v4197_v43, %v3148_v5  ;;  %v3144_v22 = vsel %vm8500_vm5, %v3143_v60, %v3139_v33  ;;  %vm9060_vm6 = vweird.f32 %v8456_v18  ;;  %v3252_v29 = vmul.f32 %v3130_v11, %v1812_v32 }
 0x332   : > { %vm3152_vm15 = vmor %vm9060_vm6, %vm3151_vm12  ;;  %4198 = vpow2.f32 %v3435_v3  ;;  %v3439_v48 = vmul.f32 1.442695, %v3251_v24  ;;  %vm3155_vm3 = vcmp.eq.f32.partialorder %v3154_v16, 8.507059e+37  ;;  %v3253_v19 = vmul.f32 %v3144_v22, %v1813_v20 }
 0x333   : > { %v3153_v17 = vsel %vm3152_vm15, %v4197_v43, %v3149_v52  ;;  %4200 = vpow2.f32 %v3437_v12  ;;  %v3441_v14 = vmul.f32 1.442695, %v3252_v29  ;;  %vm9061_vm11 = vcmask 433152  }
 0x334   : > { %v3158_v28 = vsel %vm3155_vm3, %v3157_v58, %v3153_v17  ;;  %4202 = vpow2.f32 %v3439_v48  ;;  %v3443_v18 = vmul.f32 1.442695, %v3253_v19 }
 0x335   : > { %v3254_v51 = vmul.f32 %v3158_v28, %v1814_v30  ;;  %4204 = vpow2.f32 %v3441_v14 }
 0x336   : > { %4206 = vpow2.f32 %v3443_v18 }
 0x337   : > { %v3445_v32 = vmul.f32 1.442695, %v3254_v51 }
 0x338   : > { %v4199_v44 = vpop.eup %4198 }
 0x339   : > { %v4201_v26 = vpop.eup %4200  ;;  %4208 = vpow2.f32 %v3445_v32  ;;  %3538 = vst [vmem:[%s5316_s18 + $0x2d0] sm:$0xff] %v4199_v44 }
 0x33a   : > { %v4203_v55 = vpop.eup %4202  ;;  %3539 = vst [vmem:[%s5316_s18 + $0x2d8] sm:$0xff] %v4201_v26 }
 0x33b   : > { %3540 = vst [vmem:[%s5316_s18 + $0x2e0] sm:$0xff] %v4203_v55  ;;  %v4205_v20 = vpop.eup %4204 }
 0x33c   : > { %v4207_v10 = vpop.eup %4206  ;;  %3541 = vst [vmem:[%s5316_s18 + $0x2e8] sm:$0xff] %v4205_v20 }
 0x33d   : > { %3542 = vst [vmem:[%s5316_s18 + $0x2f0] sm:$0xff] %v4207_v10 }
 0x33f   : > { %v4209_v45 = vpop.eup %4208 }
 0x340   : > { %3543 = vst.msk [vmem:[%s5316_s18 + $0x2f8] sm:$0xff] %vm9061_vm11, %v4209_v45 }
 0x341 PF: > { %s12_s9 = sadd.s32 1, %s4216_s9  }
 0x342   : > { %p9_p4 = scmp.ge.s32.totalorder %s12_s9, 6  }
 0x344   :  { %11 = sbr.rel (!%p9_p4) target bundleno = 1 (0x1), region = 60 }

</bundles_post_ra>
